<compile_context>
chip_gen: v6e
topology: v6e:2x2x1
jax: 0.10.0
libtpu: 0.0.40
codegen_flags: <defaults>
</compile_context>

<pallas_src>
import functools
import math

import jax
import jax.numpy as jnp
from jax.experimental import pallas as pl
from jax.experimental.pallas import tpu as pltpu

LN_EPS = 1e-5  # torch.nn.LayerNorm default


# ---------------------------------------------------------------------------
# helpers
# ---------------------------------------------------------------------------
def _round_up(n, m):
    return ((n + m - 1) // m) * m


@functools.cache
def _vmem_limit_bytes():
    """Explicit VMEM budget: ~75% of the physical per-core VMEM.
    v7x has only 64 MiB (vs 128 MiB on v5e/v6e), so don't rely on the
    16/32 MiB default scoped limit."""
    cap = 64 * 1024 * 1024  # conservative default = v7x physical VMEM
    try:
        cap = int(pltpu.get_tpu_info().vmem_capacity_bytes)
    except Exception:
        pass
    return int(min(cap, 128 * 1024 * 1024) * 0.75)


@functools.cache
def _single_buffer_ok():
    """Probe ONLY the pipeline_mode=pl.Buffered(1) feature with a tiny kernel.

    A genuine lowering/shape error in the real kernels is NOT masked by this:
    only the Buffered(1) capability is exercised here."""
    if not hasattr(pl, "Buffered"):
        return False

    def k(a_ref, o_ref):
        o_ref[...] = a_ref[...] * 2.0

    try:
        x = jnp.arange(8 * 128, dtype=jnp.float32).reshape(8, 128)
        y = pl.pallas_call(
            k,
            out_shape=jax.ShapeDtypeStruct((16, 128), jnp.float32),
            grid=(2,),
            in_specs=[pl.BlockSpec((8, 128), lambda i: (0, 0),
                                   pipeline_mode=pl.Buffered(1))],
            out_specs=pl.BlockSpec((8, 128), lambda i: (i, 0)),
        )(x)
        jax.block_until_ready(y)
        return bool(jnp.allclose(y[:8], x * 2.0))
    except Exception:
        return False


def _const_spec(shape, single_buffer):
    """BlockSpec for a grid-invariant (weight/bias) block.  With
    single_buffer=True the block is not double-buffered in VMEM (its
    index_map is constant -> fetched once)."""
    idx = lambda i: (0,) * len(shape)
    if single_buffer:
        return pl.BlockSpec(shape, idx, pipeline_mode=pl.Buffered(1))
    return pl.BlockSpec(shape, idx)


def _pick_mlp_row_tile(m_rows, d, h, w_itemsize, vmem_limit, single_buffer):
    """Largest row tile in {512, 256, 128} whose footprint (2 fused MLP
    branches) fits the VMEM budget.  Accounts for single-buffered weights so
    v7x (64 MiB) still reaches tm=512; clamped so the grid keeps >= 2 steps
    when there are enough rows (megacore sharding + DMA overlap)."""
    budget = int(vmem_limit * 0.9)
    wbuf = 1 if single_buffer else 2
    wts = wbuf * 2 * 2 * d * h * w_itemsize      # 2 branches x (fc1 + fc2)
    tm = 128
    for cand in (512, 256, 128):
        io = 2 * 2 * cand * d * 4                # x + out tiles, 2x buffered, f32 worst case
        tmp = cand * (2 * d + 2 * h) * 4         # LN / hidden f32 temporaries
        if wts + io + tmp + (2 << 20) <= budget:
            tm = cand
            break
    tm = min(tm, max(128, _round_up((m_rows + 1) // 2, 128)))
    return tm


def _layernorm_f32(x, gamma, beta):
    mu = jnp.mean(x, axis=-1, keepdims=True)
    var = jnp.mean((x - mu) * (x - mu), axis=-1, keepdims=True)
    return (x - mu) * jax.lax.rsqrt(var + LN_EPS) * gamma + beta


# ---------------------------------------------------------------------------
# kernel 1: both attention branches (LN + MHA + proj) + residual, per batch
# ---------------------------------------------------------------------------
def _attn_kernel(x_ref,
                 ga_ref, ba_ref, wqkv_a_ref, wproj_a_ref, bproj_a_ref,
                 gb_ref, bb_ref, wqkv_b_ref, wproj_b_ref, bproj_b_ref,
                 o_ref, *, num_heads, approx_recip):
    n, c = x_ref.shape[1], x_ref.shape[2]
    hd = c // num_heads

    x = x_ref[0].astype(jnp.float32)                          # (N, C)

    def branch(g_ref, b_ref, wqkv_ref, wproj_ref, bproj_ref):
        mxu_dt = wqkv_ref.dtype                               # bf16
        xn = _layernorm_f32(x, g_ref[...], b_ref[...])
        # qkv projection (qkv_bias=False).  q*scale is folded into Wqkv.
        qkv = jnp.dot(xn.astype(mxu_dt), wqkv_ref[...],
                      preferred_element_type=jnp.float32)     # (N, 3C) f32
        # batched-head view: (H, N, hd)
        q = qkv[:, :c].reshape(n, num_heads, hd).transpose(1, 0, 2)
        k = qkv[:, c:2 * c].reshape(n, num_heads, hd).transpose(1, 0, 2)
        v = qkv[:, 2 * c:].reshape(n, num_heads, hd).transpose(1, 0, 2)
        # scores: one batched MXU matmul over all heads
        s = jnp.einsum("hqd,hkd->hqk", q.astype(mxu_dt), k.astype(mxu_dt),
                       preferred_element_type=jnp.float32)    # (H, N, N)
        s = s - jnp.max(s, axis=-1, keepdims=True)
        e = jnp.exp(s)
        denom = jnp.sum(e, axis=-1, keepdims=True)
        if approx_recip:
            p = e * pl.reciprocal(denom, approx=True)         # EUP slot
        else:
            p = e / denom
        o = jnp.einsum("hqk,hkd->hqd", p.astype(mxu_dt), v.astype(mxu_dt),
                       preferred_element_type=jnp.float32)    # (H, N, hd)
        o = o.transpose(1, 0, 2).reshape(n, c)                # (N, C)
        return jnp.dot(o.astype(mxu_dt), wproj_ref[...],
                       preferred_element_type=jnp.float32) + bproj_ref[...]

    y = x + branch(ga_ref, ba_ref, wqkv_a_ref, wproj_a_ref, bproj_a_ref) \
          + branch(gb_ref, bb_ref, wqkv_b_ref, wproj_b_ref, bproj_b_ref)
    o_ref[0] = y.astype(o_ref.dtype)


def _fused_attn(x, pa, pb, *, num_heads, approx_recip, single_buffer,
                vmem_limit):
    """returns x + attn_a(LN_a(x)) + attn_b(LN_b(x)); grid over batch."""
    B, N, C = x.shape
    kernel = functools.partial(_attn_kernel, num_heads=num_heads,
                               approx_recip=approx_recip)
    cs = lambda shape: _const_spec(shape, single_buffer)

    return pl.pallas_call(
        kernel,
        out_shape=jax.ShapeDtypeStruct((B, N, C), x.dtype),
        grid_spec=pltpu.PrefetchScalarGridSpec(
            num_scalar_prefetch=0,
            grid=(B,),
            in_specs=[
                pl.BlockSpec((1, N, C), lambda b: (b, 0, 0)),   # x (also residual)
                cs((1, C)), cs((1, C)),                         # LN1 gamma/beta
                cs((C, 3 * C)), cs((C, C)), cs((1, C)),         # Wqkv_a, Wproj_a, bproj_a
                cs((1, C)), cs((1, C)),                         # LN11 gamma/beta
                cs((C, 3 * C)), cs((C, C)), cs((1, C)),         # Wqkv_b, Wproj_b, bproj_b
            ],
            out_specs=pl.BlockSpec((1, N, C), lambda b: (b, 0, 0)),
        ),
        compiler_params=pltpu.CompilerParams(
            dimension_semantics=("parallel",),
            vmem_limit_bytes=vmem_limit),
    )(x, pa["g"], pa["b"], pa["wqkv"], pa["wproj"], pa["bproj"],
      pb["g"], pb["b"], pb["wqkv"], pb["wproj"], pb["bproj"])


# ---------------------------------------------------------------------------
# kernel 2: both MLP branches (LN outer + LN inner + fc1 + GELU + fc2)
#           + residual, over row tiles
# ---------------------------------------------------------------------------
def _mlp_kernel(x_ref,
                goa_ref, boa_ref, gia_ref, bia_ref, w1a_ref, b1a_ref,
                w2a_ref, b2a_ref,
                gob_ref, bob_ref, gib_ref, bib_ref, w1b_ref, b1b_ref,
                w2b_ref, b2b_ref,
                o_ref, *, approx_gelu):
    x = x_ref[...].astype(jnp.float32)                        # (tm, D)

    def branch(go, bo, gi, bi, w1, b1, w2, b2):
        xn = _layernorm_f32(x, go[...], bo[...])              # PromptingBlock.norm2/21
        xn = _layernorm_f32(xn, gi[...], bi[...])             # Mlp.norm
        h = jnp.dot(xn.astype(w1.dtype), w1[...],
                    preferred_element_type=jnp.float32) + b1[...]
        h = jax.nn.gelu(h, approximate=approx_gelu)           # dropout(p=0) = identity
        return jnp.dot(h.astype(w2.dtype), w2[...],
                       preferred_element_type=jnp.float32) + b2[...]

    y = x + branch(goa_ref, boa_ref, gia_ref, bia_ref,
                   w1a_ref, b1a_ref, w2a_ref, b2a_ref) \
          + branch(gob_ref, bob_ref, gib_ref, bib_ref,
                   w1b_ref, b1b_ref, w2b_ref, b2b_ref)
    o_ref[...] = y.astype(o_ref.dtype)


def _fused_mlp(x, pa, pb, *, approx_gelu, tm, single_buffer, vmem_limit):
    """returns x + mlp_a(LN_a(x)) + mlp_b(LN_b(x)); grid over row tiles."""
    orig_shape = x.shape
    D = orig_shape[-1]
    H = pa["w1"].shape[1]

    xf = x.reshape(-1, D)
    M = xf.shape[0]
    Mp = _round_up(M, tm)
    if Mp != M:
        xf = jnp.pad(xf, ((0, Mp - M), (0, 0)))

    kernel = functools.partial(_mlp_kernel, approx_gelu=approx_gelu)
    cs = lambda shape: _const_spec(shape, single_buffer)

    out = pl.pallas_call(
        kernel,
        out_shape=jax.ShapeDtypeStruct((Mp, D), x.dtype),
        grid_spec=pltpu.PrefetchScalarGridSpec(
            num_scalar_prefetch=0,
            grid=(Mp // tm,),
            in_specs=[
                pl.BlockSpec((tm, D), lambda i: (i, 0)),        # x rows (also residual)
                cs((1, D)), cs((1, D)), cs((1, D)), cs((1, D)),  # branch a LN outer/inner
                cs((D, H)), cs((1, H)), cs((H, D)), cs((1, D)),  # branch a fc1/fc2
                cs((1, D)), cs((1, D)), cs((1, D)), cs((1, D)),  # branch b LN outer/inner
                cs((D, H)), cs((1, H)), cs((H, D)), cs((1, D)),  # branch b fc1/fc2
            ],
            out_specs=pl.BlockSpec((tm, D), lambda i: (i, 0)),
        ),
        compiler_params=pltpu.CompilerParams(
            dimension_semantics=("parallel",),
            vmem_limit_bytes=vmem_limit),
    )(xf,
      pa["go"], pa["bo"], pa["gi"], pa["bi"], pa["w1"], pa["b1"], pa["w2"], pa["b2"],
      pb["go"], pb["bo"], pb["gi"], pb["bi"], pb["w1"], pb["b1"], pb["w2"], pb["b2"])

    return out[:M].reshape(orig_shape)


# ---------------------------------------------------------------------------
# full PromptingBlock forward (jit-compiled)
# ---------------------------------------------------------------------------
def _forward_impl(x, prep, *, num_heads, approx_gelu, approx_recip, tm,
                  vmem_limit, single_buffer):
    # x = x + attn(norm1(x)) + attn1(norm11(x))
    x1 = _fused_attn(x, prep["attn_a"], prep["attn_b"],
                     num_heads=num_heads, approx_recip=approx_recip,
                     single_buffer=single_buffer, vmem_limit=vmem_limit)
    # x = x + mlp(norm2(x)) + mlp1(norm21(x))
    return _fused_mlp(x1, prep["mlp_a"], prep["mlp_b"],
                      approx_gelu=approx_gelu, tm=tm,
                      single_buffer=single_buffer, vmem_limit=vmem_limit)


_forward_jit = jax.jit(
    _forward_impl,
    static_argnames=("num_heads", "approx_gelu", "approx_recip", "tm",
                     "vmem_limit", "single_buffer"))


def prepare_params(params, *, num_heads, matmul_dtype=jnp.bfloat16):
    """One-time parameter prep: cast matmul weights to bf16, fold q*scale
    into the Q columns of Wqkv, reshape biases to (1, D) lane layout."""

    def prep_attn(ln_gb, attn_p):
        g, b = ln_gb
        wqkv, wproj, bproj = attn_p
        C = wproj.shape[0]
        hd = C // num_heads
        scale = float(hd) ** -0.5
        wqkv_s = jnp.concatenate([wqkv[:, :C] * scale, wqkv[:, C:]], axis=1)
        return dict(g=g.reshape(1, C).astype(jnp.float32),
                    b=b.reshape(1, C).astype(jnp.float32),
                    wqkv=wqkv_s.astype(matmul_dtype),
                    wproj=wproj.astype(matmul_dtype),
                    bproj=bproj.reshape(1, C).astype(jnp.float32))

    def prep_mlp(ln_gb, mlp_p):
        go, bo = ln_gb
        gi, bi, w1, b1, w2, b2 = mlp_p
        D, H = w1.shape
        return dict(go=go.reshape(1, D).astype(jnp.float32),
                    bo=bo.reshape(1, D).astype(jnp.float32),
                    gi=gi.reshape(1, D).astype(jnp.float32),
                    bi=bi.reshape(1, D).astype(jnp.float32),
                    w1=w1.astype(matmul_dtype),
                    b1=b1.reshape(1, H).astype(jnp.float32),
                    w2=w2.astype(matmul_dtype),
                    b2=b2.reshape(1, D).astype(jnp.float32))

    return dict(attn_a=prep_attn(params["norm1"], params["attn"]),
                attn_b=prep_attn(params["norm11"], params["attn1"]),
                mlp_a=prep_mlp(params["norm2"], params["mlp"]),
                mlp_b=prep_mlp(params["norm21"], params["mlp1"]))


def prompting_block_forward(x, prep, *, num_heads, approx_gelu=True,
                            approx_recip=True, tm=None):
    """x: (B, N, dim) -> (B, N, dim).  `prep` is the output of prepare_params."""
    vmem_limit = _vmem_limit_bytes()
    single_buffer = _single_buffer_ok()
    if tm is None:
        D = x.shape[-1]
        H = prep["mlp_a"]["w1"].shape[1]
        M = x.shape[0] * x.shape[1]
        w_itemsize = jnp.dtype(prep["mlp_a"]["w1"].dtype).itemsize
        tm = _pick_mlp_row_tile(M, D, H, w_itemsize, vmem_limit, single_buffer)
    return _forward_jit(x, prep, num_heads=num_heads, approx_gelu=approx_gelu,
                        approx_recip=approx_recip, tm=tm,
                        vmem_limit=vmem_limit, single_buffer=single_buffer)


# ---------------------------------------------------------------------------
# parameter init (mirrors the PyTorch module's shapes; values randomized)
# ---------------------------------------------------------------------------
def init_prompting_block_params(key, dim, num_heads, mlp_ratio=4.0):
    hidden = int(dim * mlp_ratio)
    keys = iter(jax.random.split(key, 32))

    def ln_params():
        g = 1.0 + 0.1 * jax.random.normal(next(keys), (dim,), jnp.float32)
        b = 0.1 * jax.random.normal(next(keys), (dim,), jnp.float32)
        return g, b

    def linear(fan_in, fan_out, xavier, bias):
        bound = math.sqrt(6.0 / (fan_in + fan_out)) if xavier else 1.0 / math.sqrt(fan_in)
        w = jax.random.uniform(next(keys), (fan_in, fan_out), jnp.float32,
                               -bound, bound)
        if not bias:
            return w
        bb = 1.0 / math.sqrt(fan_in)
        b = jax.random.uniform(next(keys), (fan_out,), jnp.float32, -bb, bb)
        return w, b

    def attn_params():
        wqkv = linear(dim, 3 * dim, xavier=False, bias=False)   # qkv_bias=False
        wproj, bproj = linear(dim, dim, xavier=False, bias=True)
        return wqkv, wproj, bproj

    def mlp_params():
        g, b = ln_params()                                      # Mlp.norm
        w1, b1 = linear(dim, hidden, xavier=True, bias=True)
        w2, b2 = linear(hidden, dim, xavier=True, bias=True)
        return g, b, w1, b1, w2, b2

    return dict(norm1=ln_params(), norm11=ln_params(),
                attn=attn_params(), attn1=attn_params(),
                norm2=ln_params(), norm21=ln_params(),
                mlp=mlp_params(), mlp1=mlp_params())


# ---------------------------------------------------------------------------
# pure-JAX reference (mirrors the PyTorch forward; matmul_dtype allows a
# bf16-mirrored variant of the kernel's precision choices)
# ---------------------------------------------------------------------------
def prompting_block_reference(x, params, *, num_heads,
                              matmul_dtype=jnp.float32, approx_gelu=False):
    hp = jax.lax.Precision.HIGHEST
    md = matmul_dtype

    def ln(t, g, b):
        mu = jnp.mean(t, axis=-1, keepdims=True)
        var = jnp.mean((t - mu) ** 2, axis=-1, keepdims=True)
        return (t - mu) * jax.lax.rsqrt(var + LN_EPS) * g + b

    def mm(a, w):
        return jnp.dot(a.astype(md), w.astype(md),
                       preferred_element_type=jnp.float32, precision=hp)

    def attn(t, p, gb):
        g, b = gb
        wqkv, wproj, bproj = p
        B, N, C = t.shape
        hd = C // num_heads
        scale = float(hd) ** -0.5
        # fold q*scale into the Q columns of Wqkv (same as the kernel prep;
        # mathematically identical to torch's q = q * scale)
        wqkv_s = jnp.concatenate([wqkv[:, :C] * scale, wqkv[:, C:]], axis=1)
        tn = ln(t, g, b)
        qkv = jnp.einsum("bnc,cd->bnd", tn.astype(md), wqkv_s.astype(md),
                         preferred_element_type=jnp.float32, precision=hp)
        qkv = qkv.reshape(B, N, 3, num_heads, hd).transpose(2, 0, 3, 1, 4)
        q, k, v = qkv[0], qkv[1], qkv[2]
        s = jnp.einsum("bhqd,bhkd->bhqk", q.astype(md), k.astype(md),
                       preferred_element_type=jnp.float32, precision=hp)
        a = jax.nn.softmax(s, axis=-1)
        o = jnp.einsum("bhqk,bhkd->bhqd", a.astype(md), v.astype(md),
                       preferred_element_type=jnp.float32, precision=hp)
        o = o.transpose(0, 2, 1, 3).reshape(B, N, C)
        return jnp.einsum("bnc,cd->bnd", o.astype(md), wproj.astype(md),
                          preferred_element_type=jnp.float32, precision=hp) + bproj

    def mlp(t, gb_out, p):
        go, bo = gb_out
        gi, bi, w1, b1, w2, b2 = p
        t = ln(t, go, bo)
        t = ln(t, gi, bi)
        h = mm(t, w1) + b1
        h = jax.nn.gelu(h, approximate=approx_gelu)
        return mm(h, w2) + b2

    x = x.astype(jnp.float32)
    x = x + attn(x, params["attn"], params["norm1"]) \
          + attn(x, params["attn1"], params["norm11"])
    x = x + mlp(x, params["norm2"], params["mlp"]) \
          + mlp(x, params["norm21"], params["mlp1"])
    return x


# ---------------------------------------------------------------------------
if __name__ == "__main__":
    key = jax.random.PRNGKey(0)
    kx, kp = jax.random.split(key)

    B, N, dim, heads = 2, 8, 32, 4      # small test shapes (mlp_ratio=4 -> H=128)
    x = jax.random.normal(kx, (B, N, dim), jnp.float32)
    params = init_prompting_block_params(kp, dim, heads, mlp_ratio=4.0)

    prep = prepare_params(params, num_heads=heads, matmul_dtype=jnp.bfloat16)
    y = prompting_block_forward(x, prep, num_heads=heads,
                                approx_gelu=True, approx_recip=True)
    y = jax.block_until_ready(y)
    assert y.shape == (B, N, dim)

    # (1) tight check vs a reference that mirrors the kernel's precision
    #     choices (bf16 matmul inputs + f32 accumulation, tanh GELU); the
    #     remaining delta is accumulation order + the approx reciprocal.
    y_mirror = prompting_block_reference(x, params, num_heads=heads,
                                         matmul_dtype=jnp.bfloat16,
                                         approx_gelu=True)
    assert jnp.allclose(y, y_mirror, atol=1e-2, rtol=1e-2), \
        "mismatch vs bf16-mirrored reference"

    # (2) semantic check vs the exact f32 PyTorch-equivalent forward (erf
    #     GELU, exact softmax divide); difference bounded by bf16
    #     quantization + tanh-vs-erf GELU.
    y_f32 = prompting_block_reference(x, params, num_heads=heads,
                                      matmul_dtype=jnp.float32,
                                      approx_gelu=False)
    assert jnp.allclose(y, y_f32, atol=1e-1, rtol=1e-1), \
        "mismatch vs exact f32 reference"

    print("KERNEL_OK")
</pallas_src>

<mosaic_0001>
module attributes {stable_mosaic.version = 11 : i64} {
  func.func @k(%arg0: i32, %arg1: memref<8x128xf32, #tpu.memory_space<vmem>>, %arg2: memref<8x128xf32, #tpu.memory_space<vmem>>) attributes {dimension_semantics = [#tpu.dimension_semantics<arbitrary>], iteration_bounds = array<i64: 2>, scalar_prefetch = 0 : i64, scratch_operands = 0 : i64, tpu.core_type = #tpu.core_type<tc>, window_params = [{pipeline_mode = #tpu.pipeline_mode<synchronous>, transform_indices = @transform_0, window_bounds = array<i64: 8, 128>}, {transform_indices = @transform_1, window_bounds = array<i64: 8, 128>}]} {
    %c0 = arith.constant 0 : index
    %c0_0 = arith.constant 0 : index
    %0 = vector.load %arg1[%c0, %c0_0] : memref<8x128xf32, #tpu.memory_space<vmem>>, vector<8x128xf32>
    %cst = arith.constant 2.000000e+00 : f32
    %1 = vector.broadcast %cst : f32 to vector<8x128xf32>
    %2 = arith.mulf %0, %1 : vector<8x128xf32>
    %c0_1 = arith.constant 0 : index
    %c0_2 = arith.constant 0 : index
    %3 = vector.load %arg2[%c0_1, %c0_2] : memref<8x128xf32, #tpu.memory_space<vmem>>, vector<8x128xf32>
    tpu.vector_store %arg2[%c0_1, %c0_2], %2 {strides = array<i32>} : memref<8x128xf32, #tpu.memory_space<vmem>>, vector<8x128xf32>,
    return
  }
  func.func @transform_0(%arg0: i32) -> (i32, i32) {
    %c0_i32 = arith.constant 0 : i32
    %c0_i32_0 = arith.constant 0 : i32
    %c0_i32_1 = arith.constant 0 : i32
    return %c0_i32, %c0_i32_0 : i32, i32
  }
  func.func @transform_1(%arg0: i32) -> (i32, i32) {
    %c0_i32 = arith.constant 0 : i32
    %c0_i32_0 = arith.constant 0 : i32
    return %arg0, %c0_i32 : i32, i32
  }
}

module attributes {stable_mosaic.version = 11 : i64} {
  func.func @_mlp_kernel(%arg0: i32, %arg1: memref<128x32xf32, #tpu.memory_space<vmem>>, %arg2: memref<1x32xf32, #tpu.memory_space<vmem>>, %arg3: memref<1x32xf32, #tpu.memory_space<vmem>>, %arg4: memref<1x32xf32, #tpu.memory_space<vmem>>, %arg5: memref<1x32xf32, #tpu.memory_space<vmem>>, %arg6: memref<32x128xbf16, #tpu.memory_space<vmem>>, %arg7: memref<1x128xf32, #tpu.memory_space<vmem>>, %arg8: memref<128x32xbf16, #tpu.memory_space<vmem>>, %arg9: memref<1x32xf32, #tpu.memory_space<vmem>>, %arg10: memref<1x32xf32, #tpu.memory_space<vmem>>, %arg11: memref<1x32xf32, #tpu.memory_space<vmem>>, %arg12: memref<1x32xf32, #tpu.memory_space<vmem>>, %arg13: memref<1x32xf32, #tpu.memory_space<vmem>>, %arg14: memref<32x128xbf16, #tpu.memory_space<vmem>>, %arg15: memref<1x128xf32, #tpu.memory_space<vmem>>, %arg16: memref<128x32xbf16, #tpu.memory_space<vmem>>, %arg17: memref<1x32xf32, #tpu.memory_space<vmem>>, %arg18: memref<128x32xf32, #tpu.memory_space<vmem>>) attributes {dimension_semantics = [#tpu.dimension_semantics<parallel>], iteration_bounds = array<i64: 1>, scalar_prefetch = 0 : i64, scratch_operands = 0 : i64, tpu.core_type = #tpu.core_type<tc>, window_params = [{transform_indices = @transform_0, window_bounds = array<i64: 128, 32>}, {pipeline_mode = #tpu.pipeline_mode<synchronous>, transform_indices = @transform_1, window_bounds = array<i64: 1, 32>}, {pipeline_mode = #tpu.pipeline_mode<synchronous>, transform_indices = @transform_2, window_bounds = array<i64: 1, 32>}, {pipeline_mode = #tpu.pipeline_mode<synchronous>, transform_indices = @transform_3, window_bounds = array<i64: 1, 32>}, {pipeline_mode = #tpu.pipeline_mode<synchronous>, transform_indices = @transform_4, window_bounds = array<i64: 1, 32>}, {pipeline_mode = #tpu.pipeline_mode<synchronous>, transform_indices = @transform_5, window_bounds = array<i64: 32, 128>}, {pipeline_mode = #tpu.pipeline_mode<synchronous>, transform_indices = @transform_6, window_bounds = array<i64: 1, 128>}, {pipeline_mode = #tpu.pipeline_mode<synchronous>, transform_indices = @transform_7, window_bounds = array<i64: 128, 32>}, {pipeline_mode = #tpu.pipeline_mode<synchronous>, transform_indices = @transform_8, window_bounds = array<i64: 1, 32>}, {pipeline_mode = #tpu.pipeline_mode<synchronous>, transform_indices = @transform_9, window_bounds = array<i64: 1, 32>}, {pipeline_mode = #tpu.pipeline_mode<synchronous>, transform_indices = @transform_10, window_bounds = array<i64: 1, 32>}, {pipeline_mode = #tpu.pipeline_mode<synchronous>, transform_indices = @transform_11, window_bounds = array<i64: 1, 32>}, {pipeline_mode = #tpu.pipeline_mode<synchronous>, transform_indices = @transform_12, window_bounds = array<i64: 1, 32>}, {pipeline_mode = #tpu.pipeline_mode<synchronous>, transform_indices = @transform_13, window_bounds = array<i64: 32, 128>}, {pipeline_mode = #tpu.pipeline_mode<synchronous>, transform_indices = @transform_14, window_bounds = array<i64: 1, 128>}, {pipeline_mode = #tpu.pipeline_mode<synchronous>, transform_indices = @transform_15, window_bounds = array<i64: 128, 32>}, {pipeline_mode = #tpu.pipeline_mode<synchronous>, transform_indices = @transform_16, window_bounds = array<i64: 1, 32>}, {transform_indices = @transform_17, window_bounds = array<i64: 128, 32>}]} {
    %c0 = arith.constant 0 : index
    %c0_0 = arith.constant 0 : index
    %0 = vector.load %arg1[%c0, %c0_0] : memref<128x32xf32, #tpu.memory_space<vmem>>, vector<128x32xf32>
    %c0_1 = arith.constant 0 : index
    %c0_2 = arith.constant 0 : index
    %1 = vector.load %arg2[%c0_1, %c0_2] : memref<1x32xf32, #tpu.memory_space<vmem>>, vector<1x32xf32>
    %c0_3 = arith.constant 0 : index
    %c0_4 = arith.constant 0 : index
    %2 = vector.load %arg3[%c0_3, %c0_4] : memref<1x32xf32, #tpu.memory_space<vmem>>, vector<1x32xf32>
    %cst = arith.constant dense<0.000000e+00> : vector<128xf32>
    %3 = vector.multi_reduction <add>, %0, %cst [1] : vector<128x32xf32> to vector<128xf32>
    %4 = vector.shape_cast %3 : vector<128xf32> to vector<128x1xf32>
    %cst_5 = arith.constant 3.200000e+01 : f32
    %5 = vector.broadcast %cst_5 : f32 to vector<128x1xf32>
    %6 = arith.divf %4, %5 : vector<128x1xf32>
    %7 = vector.broadcast %6 : vector<128x1xf32> to vector<128x32xf32>
    %8 = arith.subf %0, %7 : vector<128x32xf32>
    %9 = vector.broadcast %6 : vector<128x1xf32> to vector<128x32xf32>
    %10 = arith.subf %0, %9 : vector<128x32xf32>
    %11 = arith.mulf %8, %10 : vector<128x32xf32>
    %cst_6 = arith.constant dense<0.000000e+00> : vector<128xf32>
    %12 = vector.multi_reduction <add>, %11, %cst_6 [1] : vector<128x32xf32> to vector<128xf32>
    %13 = vector.shape_cast %12 : vector<128xf32> to vector<128x1xf32>
    %cst_7 = arith.constant 3.200000e+01 : f32
    %14 = vector.broadcast %cst_7 : f32 to vector<128x1xf32>
    %15 = arith.divf %13, %14 : vector<128x1xf32>
    %16 = vector.broadcast %6 : vector<128x1xf32> to vector<128x32xf32>
    %17 = arith.subf %0, %16 : vector<128x32xf32>
    %cst_8 = arith.constant 9.99999974E-6 : f32
    %18 = vector.broadcast %cst_8 : f32 to vector<128x1xf32>
    %19 = arith.addf %15, %18 : vector<128x1xf32>
    %20 = math.rsqrt %19 : vector<128x1xf32>
    %21 = vector.broadcast %20 : vector<128x1xf32> to vector<128x32xf32>
    %22 = arith.mulf %17, %21 : vector<128x32xf32>
    %23 = vector.broadcast %1 : vector<1x32xf32> to vector<128x32xf32>
    %24 = arith.mulf %22, %23 : vector<128x32xf32>
    %25 = vector.broadcast %2 : vector<1x32xf32> to vector<128x32xf32>
    %26 = arith.addf %24, %25 : vector<128x32xf32>
    %c0_9 = arith.constant 0 : index
    %c0_10 = arith.constant 0 : index
    %27 = vector.load %arg4[%c0_9, %c0_10] : memref<1x32xf32, #tpu.memory_space<vmem>>, vector<1x32xf32>
    %c0_11 = arith.constant 0 : index
    %c0_12 = arith.constant 0 : index
    %28 = vector.load %arg5[%c0_11, %c0_12] : memref<1x32xf32, #tpu.memory_space<vmem>>, vector<1x32xf32>
    %cst_13 = arith.constant dense<0.000000e+00> : vector<128xf32>
    %29 = vector.multi_reduction <add>, %26, %cst_13 [1] : vector<128x32xf32> to vector<128xf32>
    %30 = vector.shape_cast %29 : vector<128xf32> to vector<128x1xf32>
    %cst_14 = arith.constant 3.200000e+01 : f32
    %31 = vector.broadcast %cst_14 : f32 to vector<128x1xf32>
    %32 = arith.divf %30, %31 : vector<128x1xf32>
    %33 = vector.broadcast %32 : vector<128x1xf32> to vector<128x32xf32>
    %34 = arith.subf %26, %33 : vector<128x32xf32>
    %35 = vector.broadcast %32 : vector<128x1xf32> to vector<128x32xf32>
    %36 = arith.subf %26, %35 : vector<128x32xf32>
    %37 = arith.mulf %34, %36 : vector<128x32xf32>
    %cst_15 = arith.constant dense<0.000000e+00> : vector<128xf32>
    %38 = vector.multi_reduction <add>, %37, %cst_15 [1] : vector<128x32xf32> to vector<128xf32>
    %39 = vector.shape_cast %38 : vector<128xf32> to vector<128x1xf32>
    %cst_16 = arith.constant 3.200000e+01 : f32
    %40 = vector.broadcast %cst_16 : f32 to vector<128x1xf32>
    %41 = arith.divf %39, %40 : vector<128x1xf32>
    %42 = vector.broadcast %32 : vector<128x1xf32> to vector<128x32xf32>
    %43 = arith.subf %26, %42 : vector<128x32xf32>
    %cst_17 = arith.constant 9.99999974E-6 : f32
    %44 = vector.broadcast %cst_17 : f32 to vector<128x1xf32>
    %45 = arith.addf %41, %44 : vector<128x1xf32>
    %46 = math.rsqrt %45 : vector<128x1xf32>
    %47 = vector.broadcast %46 : vector<128x1xf32> to vector<128x32xf32>
    %48 = arith.mulf %43, %47 : vector<128x32xf32>
    %49 = vector.broadcast %27 : vector<1x32xf32> to vector<128x32xf32>
    %50 = arith.mulf %48, %49 : vector<128x32xf32>
    %51 = vector.broadcast %28 : vector<1x32xf32> to vector<128x32xf32>
    %52 = arith.addf %50, %51 : vector<128x32xf32>
    %53 = arith.truncf %52 : vector<128x32xf32> to vector<128x32xbf16>
    %c0_18 = arith.constant 0 : index
    %c0_19 = arith.constant 0 : index
    %54 = vector.load %arg6[%c0_18, %c0_19] : memref<32x128xbf16, #tpu.memory_space<vmem>>, vector<32x128xbf16>
    %cst_20 = arith.constant dense<0.000000e+00> : vector<128x128xf32>
    %55 = tpu.matmul %53, %54, %cst_20 {dimension_numbers = #tpu.dot_dimension_numbers<[1], [0], [0], [1], [0, 0, 1, 1], [], []>} : vector<128x32xbf16>, vector<32x128xbf16>, vector<128x128xf32> -> vector<128x128xf32>
    %c0_21 = arith.constant 0 : index
    %c0_22 = arith.constant 0 : index
    %56 = vector.load %arg7[%c0_21, %c0_22] : memref<1x128xf32, #tpu.memory_space<vmem>>, vector<1x128xf32>
    %57 = vector.broadcast %56 : vector<1x128xf32> to vector<128x128xf32>
    %58 = arith.addf %55, %57 : vector<128x128xf32>
    %59 = arith.mulf %58, %58 : vector<128x128xf32>
    %60 = arith.mulf %58, %59 : vector<128x128xf32>
    %cst_23 = arith.constant 4.471500e-02 : f32
    %61 = vector.broadcast %cst_23 : f32 to vector<128x128xf32>
    %62 = arith.mulf %61, %60 : vector<128x128xf32>
    %63 = arith.addf %58, %62 : vector<128x128xf32>
    %cst_24 = arith.constant 0.797884583 : f32
    %64 = vector.broadcast %cst_24 : f32 to vector<128x128xf32>
    %65 = arith.mulf %64, %63 : vector<128x128xf32>
    %66 = math.tanh %65 : vector<128x128xf32>
    %cst_25 = arith.constant 1.000000e+00 : f32
    %67 = vector.broadcast %cst_25 : f32 to vector<128x128xf32>
    %68 = arith.addf %67, %66 : vector<128x128xf32>
    %cst_26 = arith.constant 5.000000e-01 : f32
    %69 = vector.broadcast %cst_26 : f32 to vector<128x128xf32>
    %70 = arith.mulf %69, %68 : vector<128x128xf32>
    %71 = arith.mulf %58, %70 : vector<128x128xf32>
    %72 = arith.truncf %71 : vector<128x128xf32> to vector<128x128xbf16>
    %c0_27 = arith.constant 0 : index
    %c0_28 = arith.constant 0 : index
    %73 = vector.load %arg8[%c0_27, %c0_28] : memref<128x32xbf16, #tpu.memory_space<vmem>>, vector<128x32xbf16>
    %cst_29 = arith.constant dense<0.000000e+00> : vector<128x32xf32>
    %74 = tpu.matmul %72, %73, %cst_29 {dimension_numbers = #tpu.dot_dimension_numbers<[1], [0], [0], [1], [0, 0, 1, 1], [], []>} : vector<128x128xbf16>, vector<128x32xbf16>, vector<128x32xf32> -> vector<128x32xf32>
    %c0_30 = arith.constant 0 : index
    %c0_31 = arith.constant 0 : index
    %75 = vector.load %arg9[%c0_30, %c0_31] : memref<1x32xf32, #tpu.memory_space<vmem>>, vector<1x32xf32>
    %76 = vector.broadcast %75 : vector<1x32xf32> to vector<128x32xf32>
    %77 = arith.addf %74, %76 : vector<128x32xf32>
    %78 = arith.addf %0, %77 : vector<128x32xf32>
    %c0_32 = arith.constant 0 : index
    %c0_33 = arith.constant 0 : index
    %79 = vector.load %arg10[%c0_32, %c0_33] : memref<1x32xf32, #tpu.memory_space<vmem>>, vector<1x32xf32>
    %c0_34 = arith.constant 0 : index
    %c0_35 = arith.constant 0 : index
    %80 = vector.load %arg11[%c0_34, %c0_35] : memref<1x32xf32, #tpu.memory_space<vmem>>, vector<1x32xf32>
    %cst_36 = arith.constant dense<0.000000e+00> : vector<128xf32>
    %81 = vector.multi_reduction <add>, %0, %cst_36 [1] : vector<128x32xf32> to vector<128xf32>
    %82 = vector.shape_cast %81 : vector<128xf32> to vector<128x1xf32>
    %cst_37 = arith.constant 3.200000e+01 : f32
    %83 = vector.broadcast %cst_37 : f32 to vector<128x1xf32>
    %84 = arith.divf %82, %83 : vector<128x1xf32>
    %85 = vector.broadcast %84 : vector<128x1xf32> to vector<128x32xf32>
    %86 = arith.subf %0, %85 : vector<128x32xf32>
    %87 = vector.broadcast %84 : vector<128x1xf32> to vector<128x32xf32>
    %88 = arith.subf %0, %87 : vector<128x32xf32>
    %89 = arith.mulf %86, %88 : vector<128x32xf32>
    %cst_38 = arith.constant dense<0.000000e+00> : vector<128xf32>
    %90 = vector.multi_reduction <add>, %89, %cst_38 [1] : vector<128x32xf32> to vector<128xf32>
    %91 = vector.shape_cast %90 : vector<128xf32> to vector<128x1xf32>
    %cst_39 = arith.constant 3.200000e+01 : f32
    %92 = vector.broadcast %cst_39 : f32 to vector<128x1xf32>
    %93 = arith.divf %91, %92 : vector<128x1xf32>
    %94 = vector.broadcast %84 : vector<128x1xf32> to vector<128x32xf32>
    %95 = arith.subf %0, %94 : vector<128x32xf32>
    %cst_40 = arith.constant 9.99999974E-6 : f32
    %96 = vector.broadcast %cst_40 : f32 to vector<128x1xf32>
    %97 = arith.addf %93, %96 : vector<128x1xf32>
    %98 = math.rsqrt %97 : vector<128x1xf32>
    %99 = vector.broadcast %98 : vector<128x1xf32> to vector<128x32xf32>
    %100 = arith.mulf %95, %99 : vector<128x32xf32>
    %101 = vector.broadcast %79 : vector<1x32xf32> to vector<128x32xf32>
    %102 = arith.mulf %100, %101 : vector<128x32xf32>
    %103 = vector.broadcast %80 : vector<1x32xf32> to vector<128x32xf32>
    %104 = arith.addf %102, %103 : vector<128x32xf32>
    %c0_41 = arith.constant 0 : index
    %c0_42 = arith.constant 0 : index
    %105 = vector.load %arg12[%c0_41, %c0_42] : memref<1x32xf32, #tpu.memory_space<vmem>>, vector<1x32xf32>
    %c0_43 = arith.constant 0 : index
    %c0_44 = arith.constant 0 : index
    %106 = vector.load %arg13[%c0_43, %c0_44] : memref<1x32xf32, #tpu.memory_space<vmem>>, vector<1x32xf32>
    %cst_45 = arith.constant dense<0.000000e+00> : vector<128xf32>
    %107 = vector.multi_reduction <add>, %104, %cst_45 [1] : vector<128x32xf32> to vector<128xf32>
    %108 = vector.shape_cast %107 : vector<128xf32> to vector<128x1xf32>
    %cst_46 = arith.constant 3.200000e+01 : f32
    %109 = vector.broadcast %cst_46 : f32 to vector<128x1xf32>
    %110 = arith.divf %108, %109 : vector<128x1xf32>
    %111 = vector.broadcast %110 : vector<128x1xf32> to vector<128x32xf32>
    %112 = arith.subf %104, %111 : vector<128x32xf32>
    %113 = vector.broadcast %110 : vector<128x1xf32> to vector<128x32xf32>
    %114 = arith.subf %104, %113 : vector<128x32xf32>
    %115 = arith.mulf %112, %114 : vector<128x32xf32>
    %cst_47 = arith.constant dense<0.000000e+00> : vector<128xf32>
    %116 = vector.multi_reduction <add>, %115, %cst_47 [1] : vector<128x32xf32> to vector<128xf32>
    %117 = vector.shape_cast %116 : vector<128xf32> to vector<128x1xf32>
    %cst_48 = arith.constant 3.200000e+01 : f32
    %118 = vector.broadcast %cst_48 : f32 to vector<128x1xf32>
    %119 = arith.divf %117, %118 : vector<128x1xf32>
    %120 = vector.broadcast %110 : vector<128x1xf32> to vector<128x32xf32>
    %121 = arith.subf %104, %120 : vector<128x32xf32>
    %cst_49 = arith.constant 9.99999974E-6 : f32
    %122 = vector.broadcast %cst_49 : f32 to vector<128x1xf32>
    %123 = arith.addf %119, %122 : vector<128x1xf32>
    %124 = math.rsqrt %123 : vector<128x1xf32>
    %125 = vector.broadcast %124 : vector<128x1xf32> to vector<128x32xf32>
    %126 = arith.mulf %121, %125 : vector<128x32xf32>
    %127 = vector.broadcast %105 : vector<1x32xf32> to vector<128x32xf32>
    %128 = arith.mulf %126, %127 : vector<128x32xf32>
    %129 = vector.broadcast %106 : vector<1x32xf32> to vector<128x32xf32>
    %130 = arith.addf %128, %129 : vector<128x32xf32>
    %131 = arith.truncf %130 : vector<128x32xf32> to vector<128x32xbf16>
    %c0_50 = arith.constant 0 : index
    %c0_51 = arith.constant 0 : index
    %132 = vector.load %arg14[%c0_50, %c0_51] : memref<32x128xbf16, #tpu.memory_space<vmem>>, vector<32x128xbf16>
    %cst_52 = arith.constant dense<0.000000e+00> : vector<128x128xf32>
    %133 = tpu.matmul %131, %132, %cst_52 {dimension_numbers = #tpu.dot_dimension_numbers<[1], [0], [0], [1], [0, 0, 1, 1], [], []>} : vector<128x32xbf16>, vector<32x128xbf16>, vector<128x128xf32> -> vector<128x128xf32>
    %c0_53 = arith.constant 0 : index
    %c0_54 = arith.constant 0 : index
    %134 = vector.load %arg15[%c0_53, %c0_54] : memref<1x128xf32, #tpu.memory_space<vmem>>, vector<1x128xf32>
    %135 = vector.broadcast %134 : vector<1x128xf32> to vector<128x128xf32>
    %136 = arith.addf %133, %135 : vector<128x128xf32>
    %137 = arith.mulf %136, %136 : vector<128x128xf32>
    %138 = arith.mulf %136, %137 : vector<128x128xf32>
    %cst_55 = arith.constant 4.471500e-02 : f32
    %139 = vector.broadcast %cst_55 : f32 to vector<128x128xf32>
    %140 = arith.mulf %139, %138 : vector<128x128xf32>
    %141 = arith.addf %136, %140 : vector<128x128xf32>
    %cst_56 = arith.constant 0.797884583 : f32
    %142 = vector.broadcast %cst_56 : f32 to vector<128x128xf32>
    %143 = arith.mulf %142, %141 : vector<128x128xf32>
    %144 = math.tanh %143 : vector<128x128xf32>
    %cst_57 = arith.constant 1.000000e+00 : f32
    %145 = vector.broadcast %cst_57 : f32 to vector<128x128xf32>
    %146 = arith.addf %145, %144 : vector<128x128xf32>
    %cst_58 = arith.constant 5.000000e-01 : f32
    %147 = vector.broadcast %cst_58 : f32 to vector<128x128xf32>
    %148 = arith.mulf %147, %146 : vector<128x128xf32>
    %149 = arith.mulf %136, %148 : vector<128x128xf32>
    %150 = arith.truncf %149 : vector<128x128xf32> to vector<128x128xbf16>
    %c0_59 = arith.constant 0 : index
    %c0_60 = arith.constant 0 : index
    %151 = vector.load %arg16[%c0_59, %c0_60] : memref<128x32xbf16, #tpu.memory_space<vmem>>, vector<128x32xbf16>
    %cst_61 = arith.constant dense<0.000000e+00> : vector<128x32xf32>
    %152 = tpu.matmul %150, %151, %cst_61 {dimension_numbers = #tpu.dot_dimension_numbers<[1], [0], [0], [1], [0, 0, 1, 1], [], []>} : vector<128x128xbf16>, vector<128x32xbf16>, vector<128x32xf32> -> vector<128x32xf32>
    %c0_62 = arith.constant 0 : index
    %c0_63 = arith.constant 0 : index
    %153 = vector.load %arg17[%c0_62, %c0_63] : memref<1x32xf32, #tpu.memory_space<vmem>>, vector<1x32xf32>
    %154 = vector.broadcast %153 : vector<1x32xf32> to vector<128x32xf32>
    %155 = arith.addf %152, %154 : vector<128x32xf32>
    %156 = arith.addf %78, %155 : vector<128x32xf32>
    %c0_64 = arith.constant 0 : index
    %c0_65 = arith.constant 0 : index
    %157 = vector.load %arg18[%c0_64, %c0_65] : memref<128x32xf32, #tpu.memory_space<vmem>>, vector<128x32xf32>
    tpu.vector_store %arg18[%c0_64, %c0_65], %156 {strides = array<i32>} : memref<128x32xf32, #tpu.memory_space<vmem>>, vector<128x32xf32>,
    return
  }
  func.func @transform_0(%arg0: i32) -> (i32, i32) {
    %c0_i32 = arith.constant 0 : i32
    %c0_i32_0 = arith.constant 0 : i32
    return %arg0, %c0_i32 : i32, i32
  }
  func.func @transform_1(%arg0: i32) -> (i32, i32) {
    %c0_i32 = arith.constant 0 : i32
    %c0_i32_0 = arith.constant 0 : i32
    %c0_i32_1 = arith.constant 0 : i32
    return %c0_i32, %c0_i32_0 : i32, i32
  }
  func.func @transform_2(%arg0: i32) -> (i32, i32) {
    %c0_i32 = arith.constant 0 : i32
    %c0_i32_0 = arith.constant 0 : i32
    %c0_i32_1 = arith.constant 0 : i32
    return %c0_i32, %c0_i32_0 : i32, i32
  }
  func.func @transform_3(%arg0: i32) -> (i32, i32) {
    %c0_i32 = arith.constant 0 : i32
    %c0_i32_0 = arith.constant 0 : i32
    %c0_i32_1 = arith.constant 0 : i32
    return %c0_i32, %c0_i32_0 : i32, i32
  }
  func.func @transform_4(%arg0: i32) -> (i32, i32) {
    %c0_i32 = arith.constant 0 : i32
    %c0_i32_0 = arith.constant 0 : i32
    %c0_i32_1 = arith.constant 0 : i32
    return %c0_i32, %c0_i32_0 : i32, i32
  }
  func.func @transform_5(%arg0: i32) -> (i32, i32) {
    %c0_i32 = arith.constant 0 : i32
    %c0_i32_0 = arith.constant 0 : i32
    %c0_i32_1 = arith.constant 0 : i32
    return %c0_i32, %c0_i32_0 : i32, i32
  }
  func.func @transform_6(%arg0: i32) -> (i32, i32) {
    %c0_i32 = arith.constant 0 : i32
    %c0_i32_0 = arith.constant 0 : i32
    %c0_i32_1 = arith.constant 0 : i32
    return %c0_i32, %c0_i32_0 : i32, i32
  }
  func.func @transform_7(%arg0: i32) -> (i32, i32) {
    %c0_i32 = arith.constant 0 : i32
    %c0_i32_0 = arith.constant 0 : i32
    %c0_i32_1 = arith.constant 0 : i32
    return %c0_i32, %c0_i32_0 : i32, i32
  }
  func.func @transform_8(%arg0: i32) -> (i32, i32) {
    %c0_i32 = arith.constant 0 : i32
    %c0_i32_0 = arith.constant 0 : i32
    %c0_i32_1 = arith.constant 0 : i32
    return %c0_i32, %c0_i32_0 : i32, i32
  }
  func.func @transform_9(%arg0: i32) -> (i32, i32) {
    %c0_i32 = arith.constant 0 : i32
    %c0_i32_0 = arith.constant 0 : i32
    %c0_i32_1 = arith.constant 0 : i32
    return %c0_i32, %c0_i32_0 : i32, i32
  }
  func.func @transform_10(%arg0: i32) -> (i32, i32) {
    %c0_i32 = arith.constant 0 : i32
    %c0_i32_0 = arith.constant 0 : i32
    %c0_i32_1 = arith.constant 0 : i32
    return %c0_i32, %c0_i32_0 : i32, i32
  }
  func.func @transform_11(%arg0: i32) -> (i32, i32) {
    %c0_i32 = arith.constant 0 : i32
    %c0_i32_0 = arith.constant 0 : i32
    %c0_i32_1 = arith.constant 0 : i32
    return %c0_i32, %c0_i32_0 : i32, i32
  }
  func.func @transform_12(%arg0: i32) -> (i32, i32) {
    %c0_i32 = arith.constant 0 : i32
    %c0_i32_0 = arith.constant 0 : i32
    %c0_i32_1 = arith.constant 0 : i32
    return %c0_i32, %c0_i32_0 : i32, i32
  }
  func.func @transform_13(%arg0: i32) -> (i32, i32) {
    %c0_i32 = arith.constant 0 : i32
    %c0_i32_0 = arith.constant 0 : i32
    %c0_i32_1 = arith.constant 0 : i32
    return %c0_i32, %c0_i32_0 : i32, i32
  }
  func.func @transform_14(%arg0: i32) -> (i32, i32) {
    %c0_i32 = arith.constant 0 : i32
    %c0_i32_0 = arith.constant 0 : i32
    %c0_i32_1 = arith.constant 0 : i32
    return %c0_i32, %c0_i32_0 : i32, i32
  }
  func.func @transform_15(%arg0: i32) -> (i32, i32) {
    %c0_i32 = arith.constant 0 : i32
    %c0_i32_0 = arith.constant 0 : i32
    %c0_i32_1 = arith.constant 0 : i32
    return %c0_i32, %c0_i32_0 : i32, i32
  }
  func.func @transform_16(%arg0: i32) -> (i32, i32) {
    %c0_i32 = arith.constant 0 : i32
    %c0_i32_0 = arith.constant 0 : i32
    %c0_i32_1 = arith.constant 0 : i32
    return %c0_i32, %c0_i32_0 : i32, i32
  }
  func.func @transform_17(%arg0: i32) -> (i32, i32) {
    %c0_i32 = arith.constant 0 : i32
    %c0_i32_0 = arith.constant 0 : i32
    return %arg0, %c0_i32 : i32, i32
  }
}

module attributes {stable_mosaic.version = 11 : i64} {
  func.func @_attn_kernel(%arg0: i32, %arg1: memref<1x8x32xf32, #tpu.memory_space<vmem>>, %arg2: memref<1x32xf32, #tpu.memory_space<vmem>>, %arg3: memref<1x32xf32, #tpu.memory_space<vmem>>, %arg4: memref<32x96xbf16, #tpu.memory_space<vmem>>, %arg5: memref<32x32xbf16, #tpu.memory_space<vmem>>, %arg6: memref<1x32xf32, #tpu.memory_space<vmem>>, %arg7: memref<1x32xf32, #tpu.memory_space<vmem>>, %arg8: memref<1x32xf32, #tpu.memory_space<vmem>>, %arg9: memref<32x96xbf16, #tpu.memory_space<vmem>>, %arg10: memref<32x32xbf16, #tpu.memory_space<vmem>>, %arg11: memref<1x32xf32, #tpu.memory_space<vmem>>, %arg12: memref<1x8x32xf32, #tpu.memory_space<vmem>>) attributes {dimension_semantics = [#tpu.dimension_semantics<parallel>], iteration_bounds = array<i64: 2>, scalar_prefetch = 0 : i64, scratch_operands = 0 : i64, tpu.core_type = #tpu.core_type<tc>, window_params = [{transform_indices = @transform_0, window_bounds = array<i64: 1, 8, 32>}, {pipeline_mode = #tpu.pipeline_mode<synchronous>, transform_indices = @transform_1, window_bounds = array<i64: 1, 32>}, {pipeline_mode = #tpu.pipeline_mode<synchronous>, transform_indices = @transform_2, window_bounds = array<i64: 1, 32>}, {pipeline_mode = #tpu.pipeline_mode<synchronous>, transform_indices = @transform_3, window_bounds = array<i64: 32, 96>}, {pipeline_mode = #tpu.pipeline_mode<synchronous>, transform_indices = @transform_4, window_bounds = array<i64: 32, 32>}, {pipeline_mode = #tpu.pipeline_mode<synchronous>, transform_indices = @transform_5, window_bounds = array<i64: 1, 32>}, {pipeline_mode = #tpu.pipeline_mode<synchronous>, transform_indices = @transform_6, window_bounds = array<i64: 1, 32>}, {pipeline_mode = #tpu.pipeline_mode<synchronous>, transform_indices = @transform_7, window_bounds = array<i64: 1, 32>}, {pipeline_mode = #tpu.pipeline_mode<synchronous>, transform_indices = @transform_8, window_bounds = array<i64: 32, 96>}, {pipeline_mode = #tpu.pipeline_mode<synchronous>, transform_indices = @transform_9, window_bounds = array<i64: 32, 32>}, {pipeline_mode = #tpu.pipeline_mode<synchronous>, transform_indices = @transform_10, window_bounds = array<i64: 1, 32>}, {transform_indices = @transform_11, window_bounds = array<i64: 1, 8, 32>}]} {
    %c0 = arith.constant 0 : index
    %c0_0 = arith.constant 0 : index
    %c0_1 = arith.constant 0 : index
    %0 = vector.load %arg1[%c0, %c0_0, %c0_1] : memref<1x8x32xf32, #tpu.memory_space<vmem>>, vector<1x8x32xf32>
    %1 = vector.shape_cast %0 : vector<1x8x32xf32> to vector<8x32xf32>
    %c0_2 = arith.constant 0 : index
    %c0_3 = arith.constant 0 : index
    %2 = vector.load %arg2[%c0_2, %c0_3] : memref<1x32xf32, #tpu.memory_space<vmem>>, vector<1x32xf32>
    %c0_4 = arith.constant 0 : index
    %c0_5 = arith.constant 0 : index
    %3 = vector.load %arg3[%c0_4, %c0_5] : memref<1x32xf32, #tpu.memory_space<vmem>>, vector<1x32xf32>
    %cst = arith.constant dense<0.000000e+00> : vector<8xf32>
    %4 = vector.multi_reduction <add>, %1, %cst [1] : vector<8x32xf32> to vector<8xf32>
    %5 = vector.shape_cast %4 : vector<8xf32> to vector<8x1xf32>
    %cst_6 = arith.constant 3.200000e+01 : f32
    %6 = vector.broadcast %cst_6 : f32 to vector<8x1xf32>
    %7 = arith.divf %5, %6 : vector<8x1xf32>
    %8 = vector.broadcast %7 : vector<8x1xf32> to vector<8x32xf32>
    %9 = arith.subf %1, %8 : vector<8x32xf32>
    %10 = vector.broadcast %7 : vector<8x1xf32> to vector<8x32xf32>
    %11 = arith.subf %1, %10 : vector<8x32xf32>
    %12 = arith.mulf %9, %11 : vector<8x32xf32>
    %cst_7 = arith.constant dense<0.000000e+00> : vector<8xf32>
    %13 = vector.multi_reduction <add>, %12, %cst_7 [1] : vector<8x32xf32> to vector<8xf32>
    %14 = vector.shape_cast %13 : vector<8xf32> to vector<8x1xf32>
    %cst_8 = arith.constant 3.200000e+01 : f32
    %15 = vector.broadcast %cst_8 : f32 to vector<8x1xf32>
    %16 = arith.divf %14, %15 : vector<8x1xf32>
    %17 = vector.broadcast %7 : vector<8x1xf32> to vector<8x32xf32>
    %18 = arith.subf %1, %17 : vector<8x32xf32>
    %cst_9 = arith.constant 9.99999974E-6 : f32
    %19 = vector.broadcast %cst_9 : f32 to vector<8x1xf32>
    %20 = arith.addf %16, %19 : vector<8x1xf32>
    %21 = math.rsqrt %20 : vector<8x1xf32>
    %22 = vector.broadcast %21 : vector<8x1xf32> to vector<8x32xf32>
    %23 = arith.mulf %18, %22 : vector<8x32xf32>
    %24 = vector.broadcast %2 : vector<1x32xf32> to vector<8x32xf32>
    %25 = arith.mulf %23, %24 : vector<8x32xf32>
    %26 = vector.broadcast %3 : vector<1x32xf32> to vector<8x32xf32>
    %27 = arith.addf %25, %26 : vector<8x32xf32>
    %28 = arith.truncf %27 : vector<8x32xf32> to vector<8x32xbf16>
    %c0_10 = arith.constant 0 : index
    %c0_11 = arith.constant 0 : index
    %29 = vector.load %arg4[%c0_10, %c0_11] : memref<32x96xbf16, #tpu.memory_space<vmem>>, vector<32x96xbf16>
    %cst_12 = arith.constant dense<0.000000e+00> : vector<8x96xf32>
    %30 = tpu.matmul %28, %29, %cst_12 {dimension_numbers = #tpu.dot_dimension_numbers<[1], [0], [0], [1], [0, 0, 1, 1], [], []>} : vector<8x32xbf16>, vector<32x96xbf16>, vector<8x96xf32> -> vector<8x96xf32>
    %31 = vector.extract_strided_slice %30 {offsets = [0, 0], sizes = [8, 32], strides = [1, 1]} : vector<8x96xf32> to vector<8x32xf32>
    %32 = vector.shape_cast %31 : vector<8x32xf32> to vector<8x4x8xf32>
    %33 = tpu.transpose %32, [1, 0, 2] : vector<8x4x8xf32> -> vector<4x8x8xf32>
    %34 = vector.extract_strided_slice %30 {offsets = [0, 32], sizes = [8, 32], strides = [1, 1]} : vector<8x96xf32> to vector<8x32xf32>
    %35 = vector.shape_cast %34 : vector<8x32xf32> to vector<8x4x8xf32>
    %36 = tpu.transpose %35, [1, 0, 2] : vector<8x4x8xf32> -> vector<4x8x8xf32>
    %37 = vector.extract_strided_slice %30 {offsets = [0, 64], sizes = [8, 32], strides = [1, 1]} : vector<8x96xf32> to vector<8x32xf32>
    %38 = vector.shape_cast %37 : vector<8x32xf32> to vector<8x4x8xf32>
    %39 = tpu.transpose %38, [1, 0, 2] : vector<8x4x8xf32> -> vector<4x8x8xf32>
    %40 = arith.truncf %33 : vector<4x8x8xf32> to vector<4x8x8xbf16>
    %41 = arith.truncf %36 : vector<4x8x8xf32> to vector<4x8x8xbf16>
    "tpu.trace_start"() <{level = 10 : i32, message = "hqd,hkd->hqk"}> : () -> ()
    %cst_13 = arith.constant dense<0.000000e+00> : vector<4x8x8xf32>
    %42 = tpu.matmul %40, %41, %cst_13 {dimension_numbers = #tpu.dot_dimension_numbers<[2], [2], [1], [1], [0, 0, 0, 1, 1, 1], [0], [0]>} : vector<4x8x8xbf16>, vector<4x8x8xbf16>, vector<4x8x8xf32> -> vector<4x8x8xf32>
    "tpu.trace_stop"() : () -> ()
    %cst_14 = arith.constant dense<0xFF800000> : vector<4x8xf32>
    %43 = vector.multi_reduction <maximumf>, %42, %cst_14 [2] : vector<4x8x8xf32> to vector<4x8xf32>
    %44 = vector.shape_cast %43 : vector<4x8xf32> to vector<4x8x1xf32>
    %45 = vector.broadcast %44 : vector<4x8x1xf32> to vector<4x8x8xf32>
    %46 = arith.subf %42, %45 : vector<4x8x8xf32>
    %47 = math.exp %46 : vector<4x8x8xf32>
    %cst_15 = arith.constant dense<0.000000e+00> : vector<4x8xf32>
    %48 = vector.multi_reduction <add>, %47, %cst_15 [2] : vector<4x8x8xf32> to vector<4x8xf32>
    %49 = vector.shape_cast %48 : vector<4x8xf32> to vector<4x8x1xf32>
    %50 = tpu.reciprocal %49 {approx = true} : vector<4x8x1xf32> -> vector<4x8x1xf32>
    %51 = vector.broadcast %50 : vector<4x8x1xf32> to vector<4x8x8xf32>
    %52 = arith.mulf %47, %51 : vector<4x8x8xf32>
    %53 = arith.truncf %52 : vector<4x8x8xf32> to vector<4x8x8xbf16>
    %54 = arith.truncf %39 : vector<4x8x8xf32> to vector<4x8x8xbf16>
    "tpu.trace_start"() <{level = 10 : i32, message = "hqk,hkd->hqd"}> : () -> ()
    %cst_16 = arith.constant dense<0.000000e+00> : vector<4x8x8xf32>
    %55 = tpu.matmul %53, %54, %cst_16 {dimension_numbers = #tpu.dot_dimension_numbers<[2], [1], [1], [2], [0, 0, 0, 1, 1, 2], [0], [0]>} : vector<4x8x8xbf16>, vector<4x8x8xbf16>, vector<4x8x8xf32> -> vector<4x8x8xf32>
    "tpu.trace_stop"() : () -> ()
    %56 = tpu.transpose %55, [1, 0, 2] : vector<4x8x8xf32> -> vector<8x4x8xf32>
    %57 = vector.shape_cast %56 : vector<8x4x8xf32> to vector<8x32xf32>
    %58 = arith.truncf %57 : vector<8x32xf32> to vector<8x32xbf16>
    %c0_17 = arith.constant 0 : index
    %c0_18 = arith.constant 0 : index
    %59 = vector.load %arg5[%c0_17, %c0_18] : memref<32x32xbf16, #tpu.memory_space<vmem>>, vector<32x32xbf16>
    %cst_19 = arith.constant dense<0.000000e+00> : vector<8x32xf32>
    %60 = tpu.matmul %58, %59, %cst_19 {dimension_numbers = #tpu.dot_dimension_numbers<[1], [0], [0], [1], [0, 0, 1, 1], [], []>} : vector<8x32xbf16>, vector<32x32xbf16>, vector<8x32xf32> -> vector<8x32xf32>
    %c0_20 = arith.constant 0 : index
    %c0_21 = arith.constant 0 : index
    %61 = vector.load %arg6[%c0_20, %c0_21] : memref<1x32xf32, #tpu.memory_space<vmem>>, vector<1x32xf32>
    %62 = vector.broadcast %61 : vector<1x32xf32> to vector<8x32xf32>
    %63 = arith.addf %60, %62 : vector<8x32xf32>
    %64 = arith.addf %1, %63 : vector<8x32xf32>
    %c0_22 = arith.constant 0 : index
    %c0_23 = arith.constant 0 : index
    %65 = vector.load %arg7[%c0_22, %c0_23] : memref<1x32xf32, #tpu.memory_space<vmem>>, vector<1x32xf32>
    %c0_24 = arith.constant 0 : index
    %c0_25 = arith.constant 0 : index
    %66 = vector.load %arg8[%c0_24, %c0_25] : memref<1x32xf32, #tpu.memory_space<vmem>>, vector<1x32xf32>
    %cst_26 = arith.constant dense<0.000000e+00> : vector<8xf32>
    %67 = vector.multi_reduction <add>, %1, %cst_26 [1] : vector<8x32xf32> to vector<8xf32>
    %68 = vector.shape_cast %67 : vector<8xf32> to vector<8x1xf32>
    %cst_27 = arith.constant 3.200000e+01 : f32
    %69 = vector.broadcast %cst_27 : f32 to vector<8x1xf32>
    %70 = arith.divf %68, %69 : vector<8x1xf32>
    %71 = vector.broadcast %70 : vector<8x1xf32> to vector<8x32xf32>
    %72 = arith.subf %1, %71 : vector<8x32xf32>
    %73 = vector.broadcast %70 : vector<8x1xf32> to vector<8x32xf32>
    %74 = arith.subf %1, %73 : vector<8x32xf32>
    %75 = arith.mulf %72, %74 : vector<8x32xf32>
    %cst_28 = arith.constant dense<0.000000e+00> : vector<8xf32>
    %76 = vector.multi_reduction <add>, %75, %cst_28 [1] : vector<8x32xf32> to vector<8xf32>
    %77 = vector.shape_cast %76 : vector<8xf32> to vector<8x1xf32>
    %cst_29 = arith.constant 3.200000e+01 : f32
    %78 = vector.broadcast %cst_29 : f32 to vector<8x1xf32>
    %79 = arith.divf %77, %78 : vector<8x1xf32>
    %80 = vector.broadcast %70 : vector<8x1xf32> to vector<8x32xf32>
    %81 = arith.subf %1, %80 : vector<8x32xf32>
    %cst_30 = arith.constant 9.99999974E-6 : f32
    %82 = vector.broadcast %cst_30 : f32 to vector<8x1xf32>
    %83 = arith.addf %79, %82 : vector<8x1xf32>
    %84 = math.rsqrt %83 : vector<8x1xf32>
    %85 = vector.broadcast %84 : vector<8x1xf32> to vector<8x32xf32>
    %86 = arith.mulf %81, %85 : vector<8x32xf32>
    %87 = vector.broadcast %65 : vector<1x32xf32> to vector<8x32xf32>
    %88 = arith.mulf %86, %87 : vector<8x32xf32>
    %89 = vector.broadcast %66 : vector<1x32xf32> to vector<8x32xf32>
    %90 = arith.addf %88, %89 : vector<8x32xf32>
    %91 = arith.truncf %90 : vector<8x32xf32> to vector<8x32xbf16>
    %c0_31 = arith.constant 0 : index
    %c0_32 = arith.constant 0 : index
    %92 = vector.load %arg9[%c0_31, %c0_32] : memref<32x96xbf16, #tpu.memory_space<vmem>>, vector<32x96xbf16>
    %cst_33 = arith.constant dense<0.000000e+00> : vector<8x96xf32>
    %93 = tpu.matmul %91, %92, %cst_33 {dimension_numbers = #tpu.dot_dimension_numbers<[1], [0], [0], [1], [0, 0, 1, 1], [], []>} : vector<8x32xbf16>, vector<32x96xbf16>, vector<8x96xf32> -> vector<8x96xf32>
    %94 = vector.extract_strided_slice %93 {offsets = [0, 0], sizes = [8, 32], strides = [1, 1]} : vector<8x96xf32> to vector<8x32xf32>
    %95 = vector.shape_cast %94 : vector<8x32xf32> to vector<8x4x8xf32>
    %96 = tpu.transpose %95, [1, 0, 2] : vector<8x4x8xf32> -> vector<4x8x8xf32>
    %97 = vector.extract_strided_slice %93 {offsets = [0, 32], sizes = [8, 32], strides = [1, 1]} : vector<8x96xf32> to vector<8x32xf32>
    %98 = vector.shape_cast %97 : vector<8x32xf32> to vector<8x4x8xf32>
    %99 = tpu.transpose %98, [1, 0, 2] : vector<8x4x8xf32> -> vector<4x8x8xf32>
    %100 = vector.extract_strided_slice %93 {offsets = [0, 64], sizes = [8, 32], strides = [1, 1]} : vector<8x96xf32> to vector<8x32xf32>
    %101 = vector.shape_cast %100 : vector<8x32xf32> to vector<8x4x8xf32>
    %102 = tpu.transpose %101, [1, 0, 2] : vector<8x4x8xf32> -> vector<4x8x8xf32>
    %103 = arith.truncf %96 : vector<4x8x8xf32> to vector<4x8x8xbf16>
    %104 = arith.truncf %99 : vector<4x8x8xf32> to vector<4x8x8xbf16>
    "tpu.trace_start"() <{level = 10 : i32, message = "hqd,hkd->hqk"}> : () -> ()
    %cst_34 = arith.constant dense<0.000000e+00> : vector<4x8x8xf32>
    %105 = tpu.matmul %103, %104, %cst_34 {dimension_numbers = #tpu.dot_dimension_numbers<[2], [2], [1], [1], [0, 0, 0, 1, 1, 1], [0], [0]>} : vector<4x8x8xbf16>, vector<4x8x8xbf16>, vector<4x8x8xf32> -> vector<4x8x8xf32>
    "tpu.trace_stop"() : () -> ()
    %cst_35 = arith.constant dense<0xFF800000> : vector<4x8xf32>
    %106 = vector.multi_reduction <maximumf>, %105, %cst_35 [2] : vector<4x8x8xf32> to vector<4x8xf32>
    %107 = vector.shape_cast %106 : vector<4x8xf32> to vector<4x8x1xf32>
    %108 = vector.broadcast %107 : vector<4x8x1xf32> to vector<4x8x8xf32>
    %109 = arith.subf %105, %108 : vector<4x8x8xf32>
    %110 = math.exp %109 : vector<4x8x8xf32>
    %cst_36 = arith.constant dense<0.000000e+00> : vector<4x8xf32>
    %111 = vector.multi_reduction <add>, %110, %cst_36 [2] : vector<4x8x8xf32> to vector<4x8xf32>
    %112 = vector.shape_cast %111 : vector<4x8xf32> to vector<4x8x1xf32>
    %113 = tpu.reciprocal %112 {approx = true} : vector<4x8x1xf32> -> vector<4x8x1xf32>
    %114 = vector.broadcast %113 : vector<4x8x1xf32> to vector<4x8x8xf32>
    %115 = arith.mulf %110, %114 : vector<4x8x8xf32>
    %116 = arith.truncf %115 : vector<4x8x8xf32> to vector<4x8x8xbf16>
    %117 = arith.truncf %102 : vector<4x8x8xf32> to vector<4x8x8xbf16>
    "tpu.trace_start"() <{level = 10 : i32, message = "hqk,hkd->hqd"}> : () -> ()
    %cst_37 = arith.constant dense<0.000000e+00> : vector<4x8x8xf32>
    %118 = tpu.matmul %116, %117, %cst_37 {dimension_numbers = #tpu.dot_dimension_numbers<[2], [1], [1], [2], [0, 0, 0, 1, 1, 2], [0], [0]>} : vector<4x8x8xbf16>, vector<4x8x8xbf16>, vector<4x8x8xf32> -> vector<4x8x8xf32>
    "tpu.trace_stop"() : () -> ()
    %119 = tpu.transpose %118, [1, 0, 2] : vector<4x8x8xf32> -> vector<8x4x8xf32>
    %120 = vector.shape_cast %119 : vector<8x4x8xf32> to vector<8x32xf32>
    %121 = arith.truncf %120 : vector<8x32xf32> to vector<8x32xbf16>
    %c0_38 = arith.constant 0 : index
    %c0_39 = arith.constant 0 : index
    %122 = vector.load %arg10[%c0_38, %c0_39] : memref<32x32xbf16, #tpu.memory_space<vmem>>, vector<32x32xbf16>
    %cst_40 = arith.constant dense<0.000000e+00> : vector<8x32xf32>
    %123 = tpu.matmul %121, %122, %cst_40 {dimension_numbers = #tpu.dot_dimension_numbers<[1], [0], [0], [1], [0, 0, 1, 1], [], []>} : vector<8x32xbf16>, vector<32x32xbf16>, vector<8x32xf32> -> vector<8x32xf32>
    %c0_41 = arith.constant 0 : index
    %c0_42 = arith.constant 0 : index
    %124 = vector.load %arg11[%c0_41, %c0_42] : memref<1x32xf32, #tpu.memory_space<vmem>>, vector<1x32xf32>
    %125 = vector.broadcast %124 : vector<1x32xf32> to vector<8x32xf32>
    %126 = arith.addf %123, %125 : vector<8x32xf32>
    %127 = arith.addf %64, %126 : vector<8x32xf32>
    %c0_43 = arith.constant 0 : index
    %c0_44 = arith.constant 0 : index
    %c0_45 = arith.constant 0 : index
    %128 = vector.load %arg12[%c0_43, %c0_44, %c0_45] : memref<1x8x32xf32, #tpu.memory_space<vmem>>, vector<1x8x32xf32>
    %129 = vector.shape_cast %128 : vector<1x8x32xf32> to vector<8x32xf32>
    %130 = vector.shape_cast %127 : vector<8x32xf32> to vector<1x8x32xf32>
    tpu.vector_store %arg12[%c0_43, %c0_44, %c0_45], %130 {strides = array<i32>} : memref<1x8x32xf32, #tpu.memory_space<vmem>>, vector<1x8x32xf32>,
    return
  }
  func.func @transform_0(%arg0: i32) -> (i32, i32, i32) {
    %c0_i32 = arith.constant 0 : i32
    %c0_i32_0 = arith.constant 0 : i32
    %c0_i32_1 = arith.constant 0 : i32
    return %arg0, %c0_i32, %c0_i32_0 : i32, i32, i32
  }
  func.func @transform_1(%arg0: i32) -> (i32, i32) {
    %c0_i32 = arith.constant 0 : i32
    %c0_i32_0 = arith.constant 0 : i32
    %c0_i32_1 = arith.constant 0 : i32
    return %c0_i32, %c0_i32_0 : i32, i32
  }
  func.func @transform_2(%arg0: i32) -> (i32, i32) {
    %c0_i32 = arith.constant 0 : i32
    %c0_i32_0 = arith.constant 0 : i32
    %c0_i32_1 = arith.constant 0 : i32
    return %c0_i32, %c0_i32_0 : i32, i32
  }
  func.func @transform_3(%arg0: i32) -> (i32, i32) {
    %c0_i32 = arith.constant 0 : i32
    %c0_i32_0 = arith.constant 0 : i32
    %c0_i32_1 = arith.constant 0 : i32
    return %c0_i32, %c0_i32_0 : i32, i32
  }
  func.func @transform_4(%arg0: i32) -> (i32, i32) {
    %c0_i32 = arith.constant 0 : i32
    %c0_i32_0 = arith.constant 0 : i32
    %c0_i32_1 = arith.constant 0 : i32
    return %c0_i32, %c0_i32_0 : i32, i32
  }
  func.func @transform_5(%arg0: i32) -> (i32, i32) {
    %c0_i32 = arith.constant 0 : i32
    %c0_i32_0 = arith.constant 0 : i32
    %c0_i32_1 = arith.constant 0 : i32
    return %c0_i32, %c0_i32_0 : i32, i32
  }
  func.func @transform_6(%arg0: i32) -> (i32, i32) {
    %c0_i32 = arith.constant 0 : i32
    %c0_i32_0 = arith.constant 0 : i32
    %c0_i32_1 = arith.constant 0 : i32
    return %c0_i32, %c0_i32_0 : i32, i32
  }
  func.func @transform_7(%arg0: i32) -> (i32, i32) {
    %c0_i32 = arith.constant 0 : i32
    %c0_i32_0 = arith.constant 0 : i32
    %c0_i32_1 = arith.constant 0 : i32
    return %c0_i32, %c0_i32_0 : i32, i32
  }
  func.func @transform_8(%arg0: i32) -> (i32, i32) {
    %c0_i32 = arith.constant 0 : i32
    %c0_i32_0 = arith.constant 0 : i32
    %c0_i32_1 = arith.constant 0 : i32
    return %c0_i32, %c0_i32_0 : i32, i32
  }
  func.func @transform_9(%arg0: i32) -> (i32, i32) {
    %c0_i32 = arith.constant 0 : i32
    %c0_i32_0 = arith.constant 0 : i32
    %c0_i32_1 = arith.constant 0 : i32
    return %c0_i32, %c0_i32_0 : i32, i32
  }
  func.func @transform_10(%arg0: i32) -> (i32, i32) {
    %c0_i32 = arith.constant 0 : i32
    %c0_i32_0 = arith.constant 0 : i32
    %c0_i32_1 = arith.constant 0 : i32
    return %c0_i32, %c0_i32_0 : i32, i32
  }
  func.func @transform_11(%arg0: i32) -> (i32, i32, i32) {
    %c0_i32 = arith.constant 0 : i32
    %c0_i32_0 = arith.constant 0 : i32
    %c0_i32_1 = arith.constant 0 : i32
    return %arg0, %c0_i32, %c0_i32_0 : i32, i32, i32
  }
}

</mosaic_0001>

<bundles_post_ra>
// kernel: tpu_custom_call.1
= control target key start
LH: loop header
LB: loop body
LE: loop exit
PB: predicated region body
PF: predicated region fallthrough
CT: control target
= control target key end

     0   :  { %6 = vsyncpa [#allocation3], 0  ;;  %s448_s0 = inlined_call_operand.hbm [shape: f32[8,128], index: 0, kind: input, shape index: {}]   ;;  %s449_s1 = inlined_call_operand.hbm [shape: f32[16,128], index: 1, kind: output, shape index: {}]  }
   0x1   :  { %7 = vsyncpa [#allocation4], 0 }
   0x2   :  { %9 = vsyncpa [#allocation4 + $0x1], 0  ;;  %s348_s6 = smov 0   ;;  %s350_s7 = smov 0  }
   0x3   :  { %s352_s8 = smov 0   ;;  %s354_s9 = smov 0  }
   0x4 LB: > { %s369_s10 = sadd.s32 4294967295, %s334_s9   ;;  %s184_s11 = sadd.s32 4294967294, %s334_s9   ;;  %s334_s9 = sphi %s354_s9, %s457_s9   ;;  %s330_s8 = sphi %s352_s8, %s456_s8   ;;  %s326_s7 = sphi %s350_s7, %s455_s7   ;;  %s322_s6 = sphi %s348_s6, %s454_s6  }
   0x5   : > { %s373_s12 = sadd.s32 1, %s334_s9   ;;  %s43_s13 = sadd.s32 1, %s330_s8 }
   0x6   : > { %s40_s14 = ssub.s32 %s334_s9, %s373_s12  ;;  %p53_p0 = scmp.ne.s32.totalorder %s330_s8, %s326_s7 }
   0x7   : > { %p41_p1 = scmp.eq.s32.totalorder %s40_s14, 0  ;;  %p54_p2 = scmp.eq.s32.totalorder %s369_s10, 1 }
   0x8   : > { %p59_p3 = scmp.ne.s32.totalorder %s326_s7, %s322_s6  ;;  %p60_p4 = scmp.eq.s32.totalorder %s184_s11, 1 }
   0x9   : > { %s384_s15 = scalar_select %p41_p1, %s330_s8, %s43_s13  }
   0xa   : > { %p386_p5 = por %p54_p2, %p53_p0  ;;  %p390_p6 = por %p60_p4, %p59_p3 }
   0xb   : > { %p185_p7 = scmp.ge.s32.totalorder %s334_s9, 1  ;;  %p67_p8 = scmp.lt.s32.totalorder %s334_s9, 3 }
   0xc   : > { %s451_s17 = scalar_select %p390_p6, 1, 0 }
   0xd   : > { %p208_p9 = scmp.eq.s32.totalorder %s369_s10, 0  ;;  %p397_p10 = pnand %p185_p7, %p67_p8 }
   0xe   : > { %s336_s19 = smov [#allocation2]  }
   0xf   : > { %s80_s20 = sshll.u32 %s336_s19, 4  ;;  %p200_p11 = pneg %p397_p10  ;;  %s81_s20 = int_to_ptr.vmem [resolvable:$true] %s80_s20 }
  0x10   : > { %s255_s21 = scalar_lea.vmem %s81_s20, 128  ;;  %p263_p3 = scmp.lt.s32.totalorder %s81_s20, %s81_s20 }
  0x11   : > { %p201_p12 = pnand %p208_p9, %p200_p11  ;;  %p256_p0 = scmp.ne.s32.totalorder %s81_s20, %s255_s21 }
  0x12   : > { %p264_p4 = scmp.lt.s32.totalorder %s255_s21, %s255_s21 }
  0x13   : > { %p246_p13 = pneg %p201_p12 }
  0x14   : > { %p265_p6 = por %p264_p4, %p263_p3 }
  0x15   : > { %p258_p1 = pnand %p256_p0, %p246_p13 }
  0x17   : > { %p259_p2 = pneg %p258_p1 }
  0x19   : > { %p266_p7 = pnand %p265_p6, %p259_p2 }
  0x1b   : > { %269 = shalt.err (!%p266_p7)
}
  0x1c   : > { %203 = dma.hbm_to_vmem [thread:$0]  (!%p201_p12), %s448_s0, 128, %s81_s20, [#allocation3]  }
  0x1d   : > { %93 = sbr.rel (%p397_p10) target bundleno = 60 (0x3c), region = 24 }
  0x22   : > { %313 = dma.done.wait (%p208_p9), [#allocation3], 128  }
  0x23   : > { %315 = vsyncadd (%p208_p9), [#allocation3], 4294967168  ;;  %s105_s24 = sand.u32 1, %s326_s7   ;;  %s191_s28 = sshll.u32 %s369_s10, 7  ;;  %v108_v0 = vld [vmem:[#allocation2] sm:$0xff] }
  0x24   : > { %s189_s25 = sshll.u32 %s105_s24, 3  ;;  %v109_v1 = vmul.f32 2.0, %v108_v0  ;;  %s123_s2 = scalar_lea.hbm %s449_s1, %s191_s28 }
  0x25   : > { %s107_s26 = scalar_lea.vmem [#allocation5], %s189_s25  ;;  %s112_s3 = scalar_lea.sflag [#allocation4], %s105_s24 }
  0x26   : > { %s125_s27 = sshll.u32 %s107_s26, 4  ;;  %110 = vst [vmem:[%s107_s26] sm:$0xff] %v109_v1  ;;  %s337_s5 = smov [#allocation5]   ;;  %s126_s27 = int_to_ptr.vmem [resolvable:$true] %s125_s27 }
  0x27   : > { %s270_s4 = scalar_lea.vmem %s126_s27, 128  ;;  %s274_s11 = sshll.u32 %s337_s5, 4  ;;  %s275_s11 = int_to_ptr.vmem [resolvable:$false] %s274_s11 }
  0x28   : > { %p271_p6 = scmp.ne.s32.totalorder %s126_s27, %s270_s4  ;;  %s276_s13 = scalar_lea.vmem %s275_s11, 256 }
  0x29   : > { %p277_p10 = scmp.lt.s32.totalorder %s126_s27, %s275_s11  ;;  %p278_p11 = scmp.lt.s32.totalorder %s276_s13, %s270_s4 }
  0x2a   : > { %p272_p8 = pnand %p271_p6, %p386_p5 }
  0x2b   : > { %p279_p12 = por %p278_p11, %p277_p10 }
  0x2c   : > { %p273_p9 = pneg %p272_p8 }
  0x2e   : > { %p280_p13 = pnand %p279_p12, %p273_p9 }
  0x30   : > { %283 = shalt.err (!%p280_p13)
}
  0x31   : > { %s284_s10 = scalar_lea.hbm %s123_s2, 128  ;;  %s288_s19 = scalar_lea.hbm %s449_s1, 256 }
  0x32   : > { %p285_p0 = scmp.ne.s32.totalorder %s123_s2, %s284_s10  ;;  %p289_p3 = scmp.lt.s32.totalorder %s123_s2, %s449_s1 }
  0x33   : > { %p290_p4 = scmp.lt.s32.totalorder %s288_s19, %s284_s10 }
  0x34   : > { %p286_p1 = pnand %p285_p0, %p386_p5 }
  0x35   : > { %p291_p7 = por %p290_p4, %p289_p3 }
  0x36   : > { %p287_p2 = pneg %p286_p1 }
  0x38   : > { %p292_p6 = pnand %p291_p7, %p287_p2 }
  0x3a   : > { %295 = shalt.err (!%p292_p6)
}
  0x3b   : > { %198 = dma.vmem_to_hbm [thread:$0]  (%p386_p5), %s126_s27, 128, %s123_s2, %s112_s3  }
  0x3c PF: > { %p210_p8 = scmp.ge.s32.totalorder %s334_s9, 2  ;;  %s137_s22 = sand.u32 1, %s322_s6  }
  0x3d   : > { %p453_p9 = scmp.ne.s32.totalorder %s451_s17, 0  ;;  %s138_s23 = scalar_lea.sflag [#allocation4], %s137_s22 }
  0x3f   : > { %p205_p10 = pnand %p210_p8, %p453_p9 }
  0x41   : > { %p206_p11 = pneg %p205_p10 }
  0x43   : > { %317 = dma.done.wait (%p206_p11), %s138_s23, 128  }
  0x44   : > { %319 = vsyncadd (%p206_p11), %s138_s23, 4294967168  ;;  %p12_p12 = scmp.ge.s32.totalorder %s373_s12, 4   ;;  %s454_s6 = smov %s326_s7 }
  0x45   : > { %s455_s7 = smov %s330_s8  ;;  %s456_s8 = smov %s384_s15 }
  0x46   : > { %s457_s9 = smov %s373_s12  ;;  %14 = sbr.rel (!%p12_p12) target bundleno = 4 (0x4), region = 61 }
  0x4b   :  { %143 = vsyncpa [#allocation3], 1 }
  0x4c   :  { %145 = vsyncpa [#allocation3 + $0x1], 1 }
  0x4d   :  { %146 = vsyncpa [#allocation4], 1 }
  0x4e   :  { %148 = vsyncpa [#allocation4 + $0x1], 1 }

// kernel: _forward_impl.3
= control target key start
LH: loop header
LB: loop body
LE: loop exit
PB: predicated region body
PF: predicated region fallthrough
CT: control target
= control target key end

     0   :  { %vm75_vm0 = vcmask 261120   ;;  %s3774_s0 = inlined_call_operand.vmem [shape: f32[128,32], index: 0, kind: input, shape index: {}]   ;;  %s3775_s1 = inlined_call_operand.vmem [shape: f32[1,32], index: 1, kind: input, shape index: {}]   ;;  %s3776_s2 = inlined_call_operand.vmem [shape: f32[1,32], index: 2, kind: input, shape index: {}]   ;;  %s3777_s9 = inlined_call_operand.vmem [shape: f32[1,32], index: 9, kind: input, shape index: {}]   ;;  %s3778_s10 = inlined_call_operand.vmem [shape: f32[1,32], index: 10, kind: input, shape index: {}]   ;;  %s3779_s5 = inlined_call_operand.vmem [shape: bf16[32,128], index: 5, kind: input, shape index: {}]   ;;  %s3780_s13 = inlined_call_operand.vmem [shape: bf16[32,128], index: 13, kind: input, shape index: {}]   ;;  %s3781_s3 = inlined_call_operand.vmem [shape: f32[1,32], index: 3, kind: input, shape index: {}]   ;;  %s3782_s4 = inlined_call_operand.vmem [shape: f32[1,32], index: 4, kind: input, shape index: {}]   ;;  %s3783_s11 = inlined_call_operand.vmem [shape: f32[1,32], index: 11, kind: input, shape index: {}]   ;;  %s3784_s12 = inlined_call_operand.vmem [shape: f32[1,32], index: 12, kind: input, shape index: {}]   ;;  %s3785_s7 = inlined_call_operand.vmem [shape: bf16[128,32], index: 7, kind: input, shape index: {}]   ;;  %s3786_s15 = inlined_call_operand.vmem [shape: bf16[128,32], index: 15, kind: input, shape index: {}]   ;;  %s3787_s6 = inlined_call_operand.vmem [shape: f32[1,128], index: 6, kind: input, shape index: {}]   ;;  %s3788_s14 = inlined_call_operand.vmem [shape: f32[1,128], index: 14, kind: input, shape index: {}]   ;;  %s3789_s8 = inlined_call_operand.vmem [shape: f32[1,32], index: 8, kind: input, shape index: {}]   ;;  %s3790_s16 = inlined_call_operand.vmem [shape: f32[1,32], index: 16, kind: input, shape index: {}]   ;;  %s3791_s17 = inlined_call_operand.vmem [shape: f32[128,32], index: 17, kind: output, shape index: {}]  }
   0x1   :  { %3793 = sst [smem:[#allocation2_spill]] %s3774_s0 }
   0x2   :  { %3794 = sst [smem:[#allocation3_spill]] %s3775_s1 }
   0x3   :  { %s3795_s26 = sld [smem:[#allocation2_spill]] }
   0x4   :  { %s3796_s30 = sld [smem:[#allocation3_spill]] }
   0x9   :  { %v57_v0 = vld [vmem:[%s3795_s26] sm:$0xff]  ;;  %v59_v1 = vld [vmem:[%s3795_s26 + $0x10] sm:$0xff]  ;;  %v58_v2 = vld [vmem:[%s3795_s26 + $0x8] sm:$0xff] }
   0xa   :  { %v76_v3 = vsel %vm75_vm0, %v57_v0, 0.0  ;;  %v82_v4 = vsel %vm75_vm0, %v59_v1, 0.0  ;;  %v60_v5 = vld [vmem:[%s3795_s26 + $0x18] sm:$0xff]  ;;  %v79_v6 = vsel %vm75_vm0, %v58_v2, 0.0  ;;  %v61_v8 = vld [vmem:[%s3795_s26 + $0x20] sm:$0xff]  ;;  %v62_v9 = vld [vmem:[%s3795_s26 + $0x28] sm:$0xff] }
   0xb   :  { %77 = vadd.xlane.f32.xlu0 %v76_v3  ;;  %83 = vadd.xlane.f32.xlu1 %v82_v4  ;;  %v85_v7 = vsel %vm75_vm0, %v60_v5, 0.0  ;;  %v88_v10 = vsel %vm75_vm0, %v61_v8, 0.0  ;;  %v91_v11 = vsel %vm75_vm0, %v62_v9, 0.0  ;;  %v2412_v12 = vld [vmem:[%s3795_s26 + $0x30] sm:$0xff]  ;;  %v2417_v13 = vld [vmem:[%s3795_s26 + $0x38] sm:$0xff]  ;;  %v2426_v16 = vld [vmem:[%s3795_s26 + $0x40] sm:$0xff] }
   0xc   :  { %v94_v14 = vsel %vm75_vm0, %v2412_v12, 0.0  ;;  %v97_v15 = vsel %vm75_vm0, %v2417_v13, 0.0  ;;  %v2431_v17 = vld [vmem:[%s3795_s26 + $0x48] sm:$0xff]  ;;  %v100_v18 = vsel %vm75_vm0, %v2426_v16, 0.0  ;;  %v2440_v20 = vld [vmem:[%s3795_s26 + $0x50] sm:$0xff]  ;;  %v2445_v21 = vld [vmem:[%s3795_s26 + $0x58] sm:$0xff] }
   0xd   :  { %v103_v19 = vsel %vm75_vm0, %v2431_v17, 0.0  ;;  %v106_v22 = vsel %vm75_vm0, %v2440_v20, 0.0  ;;  %v109_v23 = vsel %vm75_vm0, %v2445_v21, 0.0  ;;  %v2454_v24 = vld [vmem:[%s3795_s26 + $0x60] sm:$0xff]  ;;  %v2459_v25 = vld [vmem:[%s3795_s26 + $0x68] sm:$0xff]  ;;  %v2468_v28 = vld [vmem:[%s3795_s26 + $0x70] sm:$0xff] }
   0xe   :  { %v112_v26 = vsel %vm75_vm0, %v2454_v24, 0.0  ;;  %v115_v27 = vsel %vm75_vm0, %v2459_v25, 0.0  ;;  %v2473_v29 = vld [vmem:[%s3795_s26 + $0x78] sm:$0xff]  ;;  %v118_v30 = vsel %vm75_vm0, %v2468_v28, 0.0 }
   0xf   :  { %80 = vadd.xlane.f32.xlu0 %v79_v6  ;;  %86 = vadd.xlane.f32.xlu1 %v85_v7  ;;  %v121_v31 = vsel %vm75_vm0, %v2473_v29, 0.0 }
  0x13   :  { %89 = vadd.xlane.f32.xlu0 %v88_v10  ;;  %92 = vadd.xlane.f32.xlu1 %v91_v11 }
  0x17   :  { %95 = vadd.xlane.f32.xlu0 %v94_v14  ;;  %98 = vadd.xlane.f32.xlu1 %v97_v15 }
  0x1b   :  { %101 = vadd.xlane.f32.xlu0 %v100_v18  ;;  %104 = vadd.xlane.f32.xlu1 %v103_v19 }
  0x1f   :  { %107 = vadd.xlane.f32.xlu0 %v106_v22  ;;  %110 = vadd.xlane.f32.xlu1 %v109_v23 }
  0x23   :  { %113 = vadd.xlane.f32.xlu0 %v112_v26  ;;  %116 = vadd.xlane.f32.xlu1 %v115_v27 }
  0x27   :  { %119 = vadd.xlane.f32.xlu0 %v118_v30  ;;  %122 = vadd.xlane.f32.xlu1 %v121_v31 }
  0x94   :  { %v78_v32 = vpop.xlane.xlu0 %77  ;;  %v84_v33 = vpop.xlane.xlu1 %83 }
  0x95   :  { %v125_v34 = vmul.f32 0.03125, %v78_v32  ;;  %v127_v35 = vmul.f32 0.03125, %v84_v33 }
  0x97   :  { %v2479_v36 = vsub.f32 %v57_v0, %v125_v34  ;;  %v2481_v37 = vsub.f32 %v59_v1, %v127_v35 }
  0x98   :  { %v81_v38 = vpop.xlane.xlu0 %80  ;;  %v87_v39 = vpop.xlane.xlu1 %86 }
  0x99   :  { %v126_v40 = vmul.f32 0.03125, %v81_v38  ;;  %v128_v41 = vmul.f32 0.03125, %v87_v39  ;;  %v157_v42 = vmul.f32 %v2479_v36, %v2479_v36  ;;  %v159_v43 = vmul.f32 %v2481_v37, %v2481_v37 }
  0x9b   :  { %v2487_v44 = vsub.f32 %v58_v2, %v126_v40  ;;  %v2489_v45 = vsub.f32 %v60_v5, %v128_v41  ;;  %v173_v46 = vsel %vm75_vm0, %v157_v42, 0.0  ;;  %v179_v49 = vsel %vm75_vm0, %v159_v43, 0.0 }
  0x9c   :  { %174 = vadd.xlane.f32.xlu0 %v173_v46  ;;  %v90_v47 = vpop.xlane.xlu0 %89  ;;  %v93_v48 = vpop.xlane.xlu1 %92 }
  0x9d   :  { %v129_v50 = vmul.f32 0.03125, %v90_v47  ;;  %v130_v51 = vmul.f32 0.03125, %v93_v48  ;;  %v158_v52 = vmul.f32 %v2487_v44, %v2487_v44  ;;  %v160_v53 = vmul.f32 %v2489_v45, %v2489_v45 }
  0x9f   :  { %v2497_v54 = vsub.f32 %v61_v8, %v129_v50  ;;  %v2499_v55 = vsub.f32 %v62_v9, %v130_v51  ;;  %v176_v56 = vsel %vm75_vm0, %v158_v52, 0.0  ;;  %v182_v59 = vsel %vm75_vm0, %v160_v53, 0.0 }
  0xa0   :  { %180 = vadd.xlane.f32.xlu0 %v179_v49  ;;  %177 = vadd.xlane.f32.xlu1 %v176_v56  ;;  %v96_v57 = vpop.xlane.xlu0 %95  ;;  %v99_v58 = vpop.xlane.xlu1 %98 }
  0xa1   :  { %v131_v60 = vmul.f32 0.03125, %v96_v57  ;;  %v132_v61 = vmul.f32 0.03125, %v99_v58  ;;  %v161_v62 = vmul.f32 %v2497_v54, %v2497_v54  ;;  %v162_v63 = vmul.f32 %v2499_v55, %v2499_v55 }
  0xa3   :  { %v2508_v0 = vsub.f32 %v2412_v12, %v131_v60  ;;  %v2511_v1 = vsub.f32 %v2417_v13, %v132_v61  ;;  %v185_v2 = vsel %vm75_vm0, %v161_v62, 0.0  ;;  %v188_v5 = vsel %vm75_vm0, %v162_v63, 0.0 }
  0xa4   :  { %183 = vadd.xlane.f32.xlu1 %v182_v59  ;;  %186 = vadd.xlane.f32.xlu0 %v185_v2  ;;  %v102_v3 = vpop.xlane.xlu0 %101  ;;  %v105_v4 = vpop.xlane.xlu1 %104 }
  0xa5   :  { %v133_v6 = vmul.f32 0.03125, %v102_v3  ;;  %v134_v7 = vmul.f32 0.03125, %v105_v4  ;;  %v163_v8 = vmul.f32 %v2508_v0, %v2508_v0  ;;  %v164_v9 = vmul.f32 %v2511_v1, %v2511_v1 }
  0xa7   :  { %v2520_v10 = vsub.f32 %v2426_v16, %v133_v6  ;;  %v2523_v11 = vsub.f32 %v2431_v17, %v134_v7  ;;  %v191_v12 = vsel %vm75_vm0, %v163_v8, 0.0  ;;  %v194_v15 = vsel %vm75_vm0, %v164_v9, 0.0 }
  0xa8   :  { %189 = vadd.xlane.f32.xlu1 %v188_v5  ;;  %192 = vadd.xlane.f32.xlu0 %v191_v12  ;;  %v108_v13 = vpop.xlane.xlu0 %107  ;;  %v111_v14 = vpop.xlane.xlu1 %110 }
  0xa9   :  { %v135_v18 = vmul.f32 0.03125, %v108_v13  ;;  %v136_v19 = vmul.f32 0.03125, %v111_v14  ;;  %v165_v22 = vmul.f32 %v2520_v10, %v2520_v10  ;;  %v166_v16 = vmul.f32 %v2523_v11, %v2523_v11 }
  0xab   :  { %v2532_v23 = vsub.f32 %v2440_v20, %v135_v18  ;;  %v2535_v17 = vsub.f32 %v2445_v21, %v136_v19  ;;  %v197_v26 = vsel %vm75_vm0, %v165_v22, 0.0  ;;  %v200_v31 = vsel %vm75_vm0, %v166_v16, 0.0 }
  0xac   :  { %195 = vadd.xlane.f32.xlu1 %v194_v15  ;;  %198 = vadd.xlane.f32.xlu0 %v197_v26  ;;  %v114_v27 = vpop.xlane.xlu0 %113  ;;  %v117_v30 = vpop.xlane.xlu1 %116  ;;  %v2572_v26 = vld [vmem:[%s3796_s30] ss:$0 sm:$0xff] }
  0xad   :  { %v137_v32 = vmul.f32 0.03125, %v114_v27  ;;  %v138_v33 = vmul.f32 0.03125, %v117_v30  ;;  %v167_v34 = vmul.f32 %v2532_v23, %v2532_v23  ;;  %v168_v20 = vmul.f32 %v2535_v17, %v2535_v17 }
  0xaf   :  { %v2544_v35 = vsub.f32 %v2454_v24, %v137_v32  ;;  %v2547_v21 = vsub.f32 %v2459_v25, %v138_v33  ;;  %v203_v38 = vsel %vm75_vm0, %v167_v34, 0.0  ;;  %v206_v41 = vsel %vm75_vm0, %v168_v20, 0.0  ;;  %v2580_v34 = vld [vmem:[%s3776_s2] ss:$0 sm:$0xff] }
  0xb0   :  { %201 = vadd.xlane.f32.xlu1 %v200_v31  ;;  %204 = vadd.xlane.f32.xlu0 %v203_v38  ;;  %v120_v39 = vpop.xlane.xlu0 %119  ;;  %v123_v40 = vpop.xlane.xlu1 %122 }
  0xb1   :  { %v139_v42 = vmul.f32 0.03125, %v120_v39  ;;  %v140_v43 = vmul.f32 0.03125, %v123_v40  ;;  %v169_v46 = vmul.f32 %v2544_v35, %v2544_v35  ;;  %v170_v24 = vmul.f32 %v2547_v21, %v2547_v21 }
  0xb3   :  { %v2556_v47 = vsub.f32 %v2468_v28, %v139_v42  ;;  %v2559_v25 = vsub.f32 %v2473_v29, %v140_v43  ;;  %v209_v48 = vsel %vm75_vm0, %v169_v46, 0.0  ;;  %v212_v49 = vsel %vm75_vm0, %v170_v24, 0.0 }
  0xb4   :  { %207 = vadd.xlane.f32.xlu1 %v206_v41  ;;  %210 = vadd.xlane.f32.xlu0 %v209_v48 }
  0xb5   :  { %v171_v50 = vmul.f32 %v2556_v47, %v2556_v47  ;;  %v172_v51 = vmul.f32 %v2559_v25, %v2559_v25 }
  0xb7   :  { %v215_v52 = vsel %vm75_vm0, %v171_v50, 0.0  ;;  %v218_v28 = vsel %vm75_vm0, %v172_v51, 0.0 }
  0xb8   :  { %213 = vadd.xlane.f32.xlu1 %v212_v49  ;;  %216 = vadd.xlane.f32.xlu0 %v215_v52 }
  0xbc   :  { %219 = vadd.xlane.f32.xlu1 %v218_v28 }
 0x125   :  { %v175_v29 = vpop.xlane.xlu0 %174 }
 0x126   :  { %v221_v53 = vmul.f32 0.03125, %v175_v29 }
 0x128   :  { %v237_v56 = vadd.f32 1e-05, %v221_v53 }
 0x129   :  { %v178_v57 = vpop.xlane.xlu1 %177  ;;  %v181_v58 = vpop.xlane.xlu0 %180 }
 0x12a   :  { %2119 = vrsqrt.f32 %v237_v56  ;;  %v222_v59 = vmul.f32 0.03125, %v178_v57  ;;  %v223_v60 = vmul.f32 0.03125, %v181_v58 }
 0x12c   :  { %v238_v61 = vadd.f32 1e-05, %v222_v59  ;;  %v239_v62 = vadd.f32 1e-05, %v223_v60 }
 0x12d   :  { %v184_v63 = vpop.xlane.xlu1 %183  ;;  %v187_v2 = vpop.xlane.xlu0 %186 }
 0x12e   :  { %2121 = vrsqrt.f32 %v238_v61  ;;  %v224_v3 = vmul.f32 0.03125, %v184_v63  ;;  %v225_v4 = vmul.f32 0.03125, %v187_v2 }
 0x12f   :  { %2123 = vrsqrt.f32 %v239_v62 }
 0x130   :  { %v240_v5 = vadd.f32 1e-05, %v224_v3  ;;  %v241_v6 = vadd.f32 1e-05, %v225_v4 }
 0x131   :  { %v190_v7 = vpop.xlane.xlu1 %189  ;;  %v193_v8 = vpop.xlane.xlu0 %192 }
 0x132   :  { %2125 = vrsqrt.f32 %v240_v5  ;;  %v226_v9 = vmul.f32 0.03125, %v190_v7  ;;  %v227_v12 = vmul.f32 0.03125, %v193_v8 }
 0x133   :  { %2127 = vrsqrt.f32 %v241_v6 }
 0x134   :  { %v242_v13 = vadd.f32 1e-05, %v226_v9  ;;  %v243_v14 = vadd.f32 1e-05, %v227_v12 }
 0x135   :  { %v196_v15 = vpop.xlane.xlu1 %195  ;;  %v199_v18 = vpop.xlane.xlu0 %198 }
 0x136   :  { %2129 = vrsqrt.f32 %v242_v13  ;;  %v228_v19 = vmul.f32 0.03125, %v196_v15  ;;  %v229_v22 = vmul.f32 0.03125, %v199_v18 }
 0x137   :  { %v2120_v16 = vpop.eup %2119  ;;  %2131 = vrsqrt.f32 %v243_v14 }
 0x138   :  { %v244_v27 = vadd.f32 1e-05, %v228_v19  ;;  %v245_v30 = vadd.f32 1e-05, %v229_v22  ;;  %v2575_v31 = vmul.f32 %v2120_v16, %v2479_v36 }
 0x139   :  { %v202_v32 = vpop.xlane.xlu1 %201  ;;  %v205_v33 = vpop.xlane.xlu0 %204 }
 0x13a   :  { %2133 = vrsqrt.f32 %v244_v27  ;;  %v230_v20 = vmul.f32 0.03125, %v202_v32  ;;  %v231_v38 = vmul.f32 0.03125, %v205_v33  ;;  %v291_v39 = vmul.f32 %v2572_v26, %v2575_v31 }
 0x13b   :  { %v2122_v40 = vpop.eup %2121  ;;  %2135 = vrsqrt.f32 %v245_v30 }
 0x13c   :  { %v2124_v41 = vpop.eup %2123  ;;  %v246_v42 = vadd.f32 1e-05, %v230_v20  ;;  %v247_v43 = vadd.f32 1e-05, %v231_v38  ;;  %v2585_v36 = vadd.f32 %v2580_v34, %v291_v39  ;;  %v2588_v46 = vmul.f32 %v2122_v40, %v2487_v44 }
 0x13d   :  { %v208_v24 = vpop.xlane.xlu1 %207  ;;  %v211_v48 = vpop.xlane.xlu0 %210  ;;  %v2591_v49 = vmul.f32 %v2124_v41, %v2481_v37 }
 0x13e   :  { %2137 = vrsqrt.f32 %v246_v42  ;;  %v232_v50 = vmul.f32 0.03125, %v208_v24  ;;  %v233_v51 = vmul.f32 0.03125, %v211_v48  ;;  %v331_v52 = vsel %vm75_vm0, %v2585_v36, 0.0 }
 0x13f   :  { %v2126_v28 = vpop.eup %2125  ;;  %2139 = vrsqrt.f32 %v247_v43  ;;  %332 = vadd.xlane.f32.xlu0 %v331_v52  ;;  %v292_v29 = vmul.f32 %v2572_v26, %v2588_v46  ;;  %v293_v44 = vmul.f32 %v2572_v26, %v2591_v49 }
 0x140   :  { %v2128_v53 = vpop.eup %2127  ;;  %v248_v56 = vadd.f32 1e-05, %v232_v50  ;;  %v249_v57 = vadd.f32 1e-05, %v233_v51  ;;  %v2600_v37 = vmul.f32 %v2126_v28, %v2489_v45 }
 0x141   :  { %v214_v58 = vpop.xlane.xlu1 %213  ;;  %v217_v59 = vpop.xlane.xlu0 %216  ;;  %v2603_v60 = vadd.f32 %v2580_v34, %v292_v29  ;;  %v2606_v61 = vadd.f32 %v2580_v34, %v293_v44  ;;  %v2609_v62 = vmul.f32 %v2128_v53, %v2497_v54 }
 0x142   :  { %2141 = vrsqrt.f32 %v248_v56  ;;  %v234_v63 = vmul.f32 0.03125, %v214_v58  ;;  %v235_v2 = vmul.f32 0.03125, %v217_v59  ;;  %v294_v3 = vmul.f32 %v2572_v26, %v2600_v37 }
 0x143   :  { %v2130_v4 = vpop.eup %2129  ;;  %2143 = vrsqrt.f32 %v249_v57  ;;  %v334_v45 = vsel %vm75_vm0, %v2603_v60, 0.0  ;;  %v337_v5 = vsel %vm75_vm0, %v2606_v61, 0.0  ;;  %v295_v6 = vmul.f32 %v2572_v26, %v2609_v62 }
 0x144   :  { %v2132_v7 = vpop.eup %2131  ;;  %v250_v54 = vadd.f32 1e-05, %v234_v63  ;;  %v251_v8 = vadd.f32 1e-05, %v235_v2  ;;  %335 = vadd.xlane.f32.xlu1 %v334_v45  ;;  %338 = vadd.xlane.f32.xlu0 %v337_v5  ;;  %v2620_v9 = vadd.f32 %v2580_v34, %v294_v3  ;;  %v2623_v12 = vmul.f32 %v2130_v4, %v2499_v55  ;;  %v2708_v45 = vld [vmem:[%s3777_s9] ss:$0 sm:$0xff] }
 0x145   :  { %v220_v13 = vpop.xlane.xlu1 %219  ;;  %v2626_v14 = vadd.f32 %v2580_v34, %v295_v6  ;;  %v2629_v15 = vmul.f32 %v2132_v7, %v2508_v0 }
 0x146   :  { %2145 = vrsqrt.f32 %v250_v54  ;;  %v236_v18 = vmul.f32 0.03125, %v220_v13  ;;  %v340_v19 = vsel %vm75_vm0, %v2620_v9, 0.0  ;;  %v296_v22 = vmul.f32 %v2572_v26, %v2623_v12 }
 0x147   :  { %v2134_v16 = vpop.eup %2133  ;;  %2147 = vrsqrt.f32 %v251_v8  ;;  %v343_v55 = vsel %vm75_vm0, %v2626_v14, 0.0  ;;  %v297_v27 = vmul.f32 %v2572_v26, %v2629_v15 }
 0x148   :  { %v2136_v30 = vpop.eup %2135  ;;  %v252_v32 = vadd.f32 1e-05, %v236_v18  ;;  %341 = vadd.xlane.f32.xlu1 %v340_v19  ;;  %344 = vadd.xlane.f32.xlu0 %v343_v55  ;;  %v2640_v0 = vadd.f32 %v2580_v34, %v296_v22  ;;  %v2643_v33 = vmul.f32 %v2134_v16, %v2511_v1  ;;  %v1079_v18 = vmul.f32 %v2708_v45, %v2575_v31  ;;  %v2735_v22 = vld [vmem:[%s3778_s10] ss:$0 sm:$0xff] }
 0x149   :  { %v2646_v20 = vadd.f32 %v2580_v34, %v297_v27  ;;  %v2649_v38 = vmul.f32 %v2136_v30, %v2520_v10  ;;  %v1080_v30 = vmul.f32 %v2708_v45, %v2588_v46 }
 0x14a   :  { %2149 = vrsqrt.f32 %v252_v32  ;;  %v346_v39 = vsel %vm75_vm0, %v2640_v0, 0.0  ;;  %v298_v40 = vmul.f32 %v2572_v26, %v2643_v33  ;;  %v1081_v32 = vmul.f32 %v2708_v45, %v2591_v49 }
 0x14b   :  { %v2138_v41 = vpop.eup %2137  ;;  %v349_v42 = vsel %vm75_vm0, %v2646_v20, 0.0  ;;  %v299_v1 = vmul.f32 %v2572_v26, %v2649_v38  ;;  %v1083_v49 = vmul.f32 %v2708_v45, %v2609_v62  ;;  %v1085_v62 = vmul.f32 %v2708_v45, %v2629_v15 }
 0x14c   :  { %v2140_v43 = vpop.eup %2139  ;;  %347 = vadd.xlane.f32.xlu1 %v346_v39  ;;  %350 = vadd.xlane.f32.xlu0 %v349_v42  ;;  %v2660_v10 = vadd.f32 %v2580_v34, %v298_v40  ;;  %v2663_v24 = vmul.f32 %v2138_v41, %v2523_v11  ;;  %v1082_v40 = vmul.f32 %v2708_v45, %v2600_v37 }
 0x14d   :  { %v2666_v48 = vadd.f32 %v2580_v34, %v299_v1  ;;  %v2669_v50 = vmul.f32 %v2140_v43, %v2532_v23  ;;  %v2763_v42 = vadd.f32 %v2735_v22, %v1080_v30  ;;  %v2766_v46 = vadd.f32 %v2735_v22, %v1081_v32 }
 0x14e   :  { %v352_v51 = vsel %vm75_vm0, %v2660_v10, 0.0  ;;  %v300_v52 = vmul.f32 %v2572_v26, %v2663_v24  ;;  %v1084_v37 = vmul.f32 %v2708_v45, %v2623_v12  ;;  %v1087_v15 = vmul.f32 %v2708_v45, %v2649_v38 }
 0x14f   :  { %v2142_v28 = vpop.eup %2141  ;;  %v355_v29 = vsel %vm75_vm0, %v2666_v48, 0.0  ;;  %v301_v11 = vmul.f32 %v2572_v26, %v2669_v50  ;;  %v1122_v1 = vsel %vm75_vm0, %v2763_v42, 0.0  ;;  %v1125_v43 = vsel %vm75_vm0, %v2766_v46, 0.0 }
 0x150   :  { %v2144_v44 = vpop.eup %2143  ;;  %353 = vadd.xlane.f32.xlu1 %v352_v51  ;;  %356 = vadd.xlane.f32.xlu0 %v355_v29  ;;  %v2680_v53 = vadd.f32 %v2580_v34, %v300_v52  ;;  %v2683_v23 = vmul.f32 %v2142_v28, %v2535_v17  ;;  %v2780_v51 = vadd.f32 %v2735_v22, %v1083_v49 }
 0x151   :  { %v2686_v56 = vadd.f32 %v2580_v34, %v301_v11  ;;  %v2689_v57 = vmul.f32 %v2144_v44, %v2544_v35  ;;  %v2787_v28 = vadd.f32 %v2735_v22, %v1084_v37  ;;  %v2792_v29 = vadd.f32 %v2735_v22, %v1085_v62 }
 0x152   :  { %v358_v58 = vsel %vm75_vm0, %v2680_v53, 0.0  ;;  %v302_v59 = vmul.f32 %v2572_v26, %v2683_v23  ;;  %v1131_v12 = vsel %vm75_vm0, %v2780_v51, 0.0  ;;  %v1086_v11 = vmul.f32 %v2708_v45, %v2643_v33 }
 0x153   :  { %v2146_v63 = vpop.eup %2145  ;;  %v361_v2 = vsel %vm75_vm0, %v2686_v56, 0.0  ;;  %v303_v17 = vmul.f32 %v2572_v26, %v2689_v57  ;;  %v1134_v44 = vsel %vm75_vm0, %v2787_v28, 0.0  ;;  %v1089_v33 = vmul.f32 %v2708_v45, %v2669_v50 }
 0x154   :  { %v2148_v3 = vpop.eup %2147  ;;  %359 = vadd.xlane.f32.xlu1 %v358_v58  ;;  %362 = vadd.xlane.f32.xlu0 %v361_v2  ;;  %v2700_v4 = vadd.f32 %v2580_v34, %v302_v59  ;;  %v2703_v35 = vmul.f32 %v2146_v63, %v2547_v21  ;;  %v1088_v58 = vmul.f32 %v2708_v45, %v2663_v24  ;;  %v1137_v59 = vsel %vm75_vm0, %v2792_v29, 0.0 }
 0x155   :  { %v2711_v5 = vadd.f32 %v2580_v34, %v303_v17  ;;  %v2714_v6 = vmul.f32 %v2148_v3, %v2556_v47  ;;  %v2805_v63 = vadd.f32 %v2735_v22, %v1086_v11  ;;  %v2808_v2 = vadd.f32 %v2735_v22, %v1087_v15 }
 0x156   :  { %v364_v7 = vsel %vm75_vm0, %v2700_v4, 0.0  ;;  %v304_v54 = vmul.f32 %v2572_v26, %v2703_v35  ;;  %v2813_v38 = vadd.f32 %v2735_v22, %v1088_v58  ;;  %v1090_v24 = vmul.f32 %v2708_v45, %v2683_v23 }
 0x157   :  { %v2150_v8 = vpop.eup %2149  ;;  %v367_v21 = vsel %vm75_vm0, %v2711_v5, 0.0  ;;  %v305_v13 = vmul.f32 %v2572_v26, %v2714_v6  ;;  %v1140_v17 = vsel %vm75_vm0, %v2805_v63, 0.0  ;;  %v1143_v3 = vsel %vm75_vm0, %v2808_v2, 0.0 }
 0x158   :  { %365 = vadd.xlane.f32.xlu1 %v364_v7  ;;  %368 = vadd.xlane.f32.xlu0 %v367_v21  ;;  %v2727_v47 = vadd.f32 %v2580_v34, %v304_v54  ;;  %v2730_v19 = vmul.f32 %v2150_v8, %v2559_v25  ;;  %v2747_v25 = vadd.f32 %v2735_v22, %v1079_v18  ;;  %v1146_v54 = vsel %vm75_vm0, %v2813_v38, 0.0 }
 0x159   :  { %v2738_v16 = vadd.f32 %v2580_v34, %v305_v13  ;;  %v2822_v7 = vadd.f32 %v2735_v22, %v1089_v33  ;;  %v1091_v50 = vmul.f32 %v2708_v45, %v2689_v57  ;;  %v2829_v8 = vadd.f32 %v2735_v22, %v1090_v24 }
 0x15a   :  { %v370_v55 = vsel %vm75_vm0, %v2727_v47, 0.0  ;;  %v306_v31 = vmul.f32 %v2572_v26, %v2730_v19  ;;  %v1119_v41 = vsel %vm75_vm0, %v2747_v25, 0.0  ;;  %v1092_v13 = vmul.f32 %v2708_v45, %v2703_v35 }
 0x15b   :  { %v373_v27 = vsel %vm75_vm0, %v2738_v16, 0.0  ;;  %v1149_v23 = vsel %vm75_vm0, %v2822_v7, 0.0  ;;  %v2834_v21 = vadd.f32 %v2735_v22, %v1091_v50  ;;  %v1093_v57 = vmul.f32 %v2708_v45, %v2714_v6 }
 0x15c   :  { %371 = vadd.xlane.f32.xlu1 %v370_v55  ;;  %374 = vadd.xlane.f32.xlu0 %v373_v27  ;;  %v2754_v39 = vadd.f32 %v2580_v34, %v306_v31  ;;  %v2771_v34 = vadd.f32 %v2735_v22, %v1082_v40  ;;  %v1152_v18 = vsel %vm75_vm0, %v2829_v8, 0.0  ;;  %v2845_v31 = vadd.f32 %v2735_v22, %v1092_v13 }
 0x15d   :  { %v1155_v55 = vsel %vm75_vm0, %v2834_v21, 0.0  ;;  %v2848_v27 = vadd.f32 %v2735_v22, %v1093_v57  ;;  %v1094_v35 = vmul.f32 %v2708_v45, %v2730_v19 }
 0x15e   :  { %v376_v26 = vsel %vm75_vm0, %v2754_v39, 0.0  ;;  %v1128_v52 = vsel %vm75_vm0, %v2771_v34, 0.0  ;;  %v1158_v6 = vsel %vm75_vm0, %v2845_v31, 0.0 }
 0x15f   :  { %v1161_v30 = vsel %vm75_vm0, %v2848_v27, 0.0  ;;  %v2857_v32 = vadd.f32 %v2735_v22, %v1094_v35 }
 0x160   :  { %377 = vadd.xlane.f32.xlu1 %v376_v26  ;;  %1120 = vadd.xlane.f32.xlu0 %v1119_v41 }
 0x161   :  { %v1164_v26 = vsel %vm75_vm0, %v2857_v32, 0.0 }
 0x164   :  { %1123 = vadd.xlane.f32.xlu1 %v1122_v1  ;;  %1126 = vadd.xlane.f32.xlu0 %v1125_v43 }
 0x168   :  { %1129 = vadd.xlane.f32.xlu1 %v1128_v52  ;;  %1132 = vadd.xlane.f32.xlu0 %v1131_v12 }
 0x16c   :  { %1135 = vadd.xlane.f32.xlu1 %v1134_v44  ;;  %1138 = vadd.xlane.f32.xlu0 %v1137_v59 }
 0x170   :  { %1141 = vadd.xlane.f32.xlu1 %v1140_v17  ;;  %1144 = vadd.xlane.f32.xlu0 %v1143_v3 }
 0x174   :  { %1147 = vadd.xlane.f32.xlu1 %v1146_v54  ;;  %1150 = vadd.xlane.f32.xlu0 %v1149_v23 }
 0x178   :  { %1153 = vadd.xlane.f32.xlu1 %v1152_v18  ;;  %1156 = vadd.xlane.f32.xlu0 %v1155_v55 }
 0x17c   :  { %1159 = vadd.xlane.f32.xlu1 %v1158_v6  ;;  %1162 = vadd.xlane.f32.xlu0 %v1161_v30 }
 0x180   :  { %1165 = vadd.xlane.f32.xlu1 %v1164_v26 }
 0x1c8   :  { %v333_v40 = vpop.xlane.xlu0 %332 }
 0x1c9   :  { %v379_v41 = vmul.f32 0.03125, %v333_v40 }
 0x1cb   :  { %v2862_v45 = vsub.f32 %v2585_v36, %v379_v41 }
 0x1cd   :  { %v336_v19 = vpop.xlane.xlu1 %335  ;;  %v339_v49 = vpop.xlane.xlu0 %338  ;;  %v411_v37 = vmul.f32 %v2862_v45, %v2862_v45 }
 0x1ce   :  { %v380_v1 = vmul.f32 0.03125, %v336_v19  ;;  %v381_v43 = vmul.f32 0.03125, %v339_v49 }
 0x1cf   :  { %v427_v22 = vsel %vm75_vm0, %v411_v37, 0.0 }
 0x1d0   :  { %v2868_v62 = vsub.f32 %v2603_v60, %v380_v1  ;;  %v2871_v52 = vsub.f32 %v2606_v61, %v381_v43  ;;  %428 = vadd.xlane.f32.xlu0 %v427_v22 }
 0x1d1   :  { %v342_v12 = vpop.xlane.xlu1 %341  ;;  %v345_v11 = vpop.xlane.xlu0 %344 }
 0x1d2   :  { %v382_v36 = vmul.f32 0.03125, %v342_v12  ;;  %v383_v15 = vmul.f32 0.03125, %v345_v11  ;;  %v412_v44 = vmul.f32 %v2868_v62, %v2868_v62  ;;  %v413_v58 = vmul.f32 %v2871_v52, %v2871_v52 }
 0x1d4   :  { %v2878_v59 = vsub.f32 %v2620_v9, %v382_v36  ;;  %v2881_v60 = vsub.f32 %v2626_v14, %v383_v15  ;;  %v430_v61 = vsel %vm75_vm0, %v412_v44, 0.0  ;;  %v433_v33 = vsel %vm75_vm0, %v413_v58, 0.0 }
 0x1d5   :  { %431 = vadd.xlane.f32.xlu1 %v430_v61  ;;  %v348_v24 = vpop.xlane.xlu1 %347  ;;  %434 = vadd.xlane.f32.xlu0 %v433_v33  ;;  %v351_v17 = vpop.xlane.xlu0 %350 }
 0x1d6   :  { %v384_v3 = vmul.f32 0.03125, %v348_v24  ;;  %v385_v50 = vmul.f32 0.03125, %v351_v17  ;;  %v414_v54 = vmul.f32 %v2878_v59, %v2878_v59  ;;  %v415_v9 = vmul.f32 %v2881_v60, %v2881_v60 }
 0x1d8   :  { %v2890_v23 = vsub.f32 %v2640_v0, %v384_v3  ;;  %v2893_v14 = vsub.f32 %v2646_v20, %v385_v50  ;;  %v436_v13 = vsel %vm75_vm0, %v414_v54, 0.0  ;;  %v439_v57 = vsel %vm75_vm0, %v415_v9, 0.0 }
 0x1d9   :  { %437 = vadd.xlane.f32.xlu1 %v436_v13  ;;  %v354_v18 = vpop.xlane.xlu1 %353  ;;  %440 = vadd.xlane.f32.xlu0 %v439_v57  ;;  %v357_v55 = vpop.xlane.xlu0 %356 }
 0x1da   :  { %v386_v35 = vmul.f32 0.03125, %v354_v18  ;;  %v387_v6 = vmul.f32 0.03125, %v357_v55  ;;  %v416_v30 = vmul.f32 %v2890_v23, %v2890_v23  ;;  %v417_v0 = vmul.f32 %v2893_v14, %v2893_v14 }
 0x1dc   :  { %v2902_v26 = vsub.f32 %v2660_v10, %v386_v35  ;;  %v2905_v20 = vsub.f32 %v2666_v48, %v387_v6  ;;  %v442_v40 = vsel %vm75_vm0, %v416_v30, 0.0  ;;  %v445_v41 = vsel %vm75_vm0, %v417_v0, 0.0 }
 0x1dd   :  { %443 = vadd.xlane.f32.xlu1 %v442_v40  ;;  %v360_v19 = vpop.xlane.xlu1 %359  ;;  %446 = vadd.xlane.f32.xlu0 %v445_v41  ;;  %v363_v49 = vpop.xlane.xlu0 %362 }
 0x1de   :  { %v388_v37 = vmul.f32 0.03125, %v360_v19  ;;  %v389_v1 = vmul.f32 0.03125, %v363_v49  ;;  %v418_v43 = vmul.f32 %v2902_v26, %v2902_v26  ;;  %v419_v10 = vmul.f32 %v2905_v20, %v2905_v20 }
 0x1e0   :  { %v2914_v22 = vsub.f32 %v2680_v53, %v388_v37  ;;  %v2917_v48 = vsub.f32 %v2686_v56, %v389_v1  ;;  %v448_v12 = vsel %vm75_vm0, %v418_v43, 0.0  ;;  %v451_v11 = vsel %vm75_vm0, %v419_v10, 0.0 }
 0x1e1   :  { %449 = vadd.xlane.f32.xlu1 %v448_v12  ;;  %v366_v36 = vpop.xlane.xlu1 %365  ;;  %452 = vadd.xlane.f32.xlu0 %v451_v11  ;;  %v369_v15 = vpop.xlane.xlu0 %368 }
 0x1e2   :  { %v390_v44 = vmul.f32 0.03125, %v366_v36  ;;  %v391_v58 = vmul.f32 0.03125, %v369_v15  ;;  %v420_v61 = vmul.f32 %v2914_v22, %v2914_v22  ;;  %v421_v53 = vmul.f32 %v2917_v48, %v2917_v48 }
 0x1e4   :  { %v2926_v33 = vsub.f32 %v2700_v4, %v390_v44  ;;  %v2929_v56 = vsub.f32 %v2711_v5, %v391_v58  ;;  %v454_v24 = vsel %vm75_vm0, %v420_v61, 0.0  ;;  %v457_v17 = vsel %vm75_vm0, %v421_v53, 0.0 }
 0x1e5   :  { %455 = vadd.xlane.f32.xlu1 %v454_v24  ;;  %v372_v3 = vpop.xlane.xlu1 %371  ;;  %458 = vadd.xlane.f32.xlu0 %v457_v17  ;;  %v375_v50 = vpop.xlane.xlu0 %374 }
 0x1e6   :  { %v392_v54 = vmul.f32 0.03125, %v372_v3  ;;  %v393_v9 = vmul.f32 0.03125, %v375_v50  ;;  %v422_v13 = vmul.f32 %v2926_v33, %v2926_v33  ;;  %v423_v4 = vmul.f32 %v2929_v56, %v2929_v56 }
 0x1e8   :  { %v2938_v57 = vsub.f32 %v2727_v47, %v392_v54  ;;  %v2941_v5 = vsub.f32 %v2738_v16, %v393_v9  ;;  %v460_v18 = vsel %vm75_vm0, %v422_v13, 0.0  ;;  %v463_v55 = vsel %vm75_vm0, %v423_v4, 0.0 }
 0x1e9   :  { %461 = vadd.xlane.f32.xlu1 %v460_v18  ;;  %v378_v35 = vpop.xlane.xlu1 %377  ;;  %464 = vadd.xlane.f32.xlu0 %v463_v55  ;;  %v1121_v6 = vpop.xlane.xlu0 %1120 }
 0x1ea   :  { %v394_v30 = vmul.f32 0.03125, %v378_v35  ;;  %v1167_v0 = vmul.f32 0.03125, %v1121_v6  ;;  %v424_v40 = vmul.f32 %v2938_v57, %v2938_v57  ;;  %v425_v47 = vmul.f32 %v2941_v5, %v2941_v5 }
 0x1ec   :  { %v2950_v41 = vsub.f32 %v2754_v39, %v394_v30  ;;  %v2953_v16 = vsub.f32 %v2747_v25, %v1167_v0  ;;  %v466_v19 = vsel %vm75_vm0, %v424_v40, 0.0  ;;  %v469_v49 = vsel %vm75_vm0, %v425_v47, 0.0  ;;  %v2099_v40 = vld [vmem:[%s3779_s5 + $0x8] sm:$0xff]  }
 0x1ed   :  { %467 = vadd.xlane.f32.xlu1 %v466_v19  ;;  %v1124_v37 = vpop.xlane.xlu1 %1123  ;;  %470 = vadd.xlane.f32.xlu0 %v469_v49  ;;  %v1127_v1 = vpop.xlane.xlu0 %1126 }
 0x1ee   :  { %v1168_v43 = vmul.f32 0.03125, %v1124_v37  ;;  %v1169_v10 = vmul.f32 0.03125, %v1127_v1  ;;  %v426_v12 = vmul.f32 %v2950_v41, %v2950_v41  ;;  %v1199_v39 = vmul.f32 %v2953_v16, %v2953_v16  ;;  %1979 = vmatprep.subr.bf16.mxu0 %v2099_v40 }
 0x1ef   :  { %1980 = vmatpush3.bf16.msra.mxu0 %v2099_v40 }
 0x1f0   :  { %v2962_v11 = vsub.f32 %v2763_v42, %v1168_v43  ;;  %v2965_v25 = vsub.f32 %v2766_v46, %v1169_v10  ;;  %v472_v36 = vsel %vm75_vm0, %v426_v12, 0.0  ;;  %v1215_v15 = vsel %vm75_vm0, %v1199_v39, 0.0  ;;  %v2100_v10 = vld [vmem:[%s3779_s5] sm:$0xff]  }
 0x1f1   :  { %473 = vadd.xlane.f32.xlu1 %v472_v36  ;;  %v1130_v44 = vpop.xlane.xlu1 %1129  ;;  %1216 = vadd.xlane.f32.xlu0 %v1215_v15  ;;  %v1133_v58 = vpop.xlane.xlu0 %1132 }
 0x1f2   :  { %v1170_v61 = vmul.f32 0.03125, %v1130_v44  ;;  %v1171_v53 = vmul.f32 0.03125, %v1133_v58  ;;  %v1200_v24 = vmul.f32 %v2962_v11, %v2962_v11  ;;  %v1201_v42 = vmul.f32 %v2965_v25, %v2965_v25  ;;  %1981 = vmatprep.subr.bf16.mxu0 %v2100_v10 }
 0x1f3   :  { %1982 = vmatpush3.bf16.msra.mxu0 %v2100_v10 }
 0x1f4   :  { %v2974_v17 = vsub.f32 %v2771_v34, %v1170_v61  ;;  %v2977_v46 = vsub.f32 %v2780_v51, %v1171_v53  ;;  %v1218_v3 = vsel %vm75_vm0, %v1200_v24, 0.0  ;;  %v1221_v50 = vsel %vm75_vm0, %v1201_v42, 0.0 }
 0x1f5   :  { %1219 = vadd.xlane.f32.xlu1 %v1218_v3  ;;  %v1136_v54 = vpop.xlane.xlu1 %1135  ;;  %1222 = vadd.xlane.f32.xlu0 %v1221_v50  ;;  %v1139_v9 = vpop.xlane.xlu0 %1138  ;;  %v3026_v3 = vld [vmem:[%s3780_s13 + $0x8] sm:$0xff]  }
 0x1f6   :  { %v1172_v13 = vmul.f32 0.03125, %v1136_v54  ;;  %v1173_v4 = vmul.f32 0.03125, %v1139_v9  ;;  %v1202_v18 = vmul.f32 %v2974_v17, %v2974_v17  ;;  %v1203_v34 = vmul.f32 %v2977_v46, %v2977_v46  ;;  %2031 = vmatprep.subr.bf16.mxu0 %v3026_v3 }
 0x1f8   :  { %v2986_v55 = vsub.f32 %v2787_v28, %v1172_v13  ;;  %v2989_v51 = vsub.f32 %v2792_v29, %v1173_v4  ;;  %v1224_v35 = vsel %vm75_vm0, %v1202_v18, 0.0  ;;  %v1227_v6 = vsel %vm75_vm0, %v1203_v34, 0.0 }
 0x1f9   :  { %1225 = vadd.xlane.f32.xlu1 %v1224_v35  ;;  %v1142_v30 = vpop.xlane.xlu1 %1141  ;;  %1228 = vadd.xlane.f32.xlu0 %v1227_v6  ;;  %v1145_v0 = vpop.xlane.xlu0 %1144 }
 0x1fa   :  { %v1174_v47 = vmul.f32 0.03125, %v1142_v30  ;;  %v1175_v19 = vmul.f32 0.03125, %v1145_v0  ;;  %v1204_v28 = vmul.f32 %v2986_v55, %v2986_v55  ;;  %v1205_v29 = vmul.f32 %v2989_v51, %v2989_v51 }
 0x1fc   :  { %v3001_v49 = vsub.f32 %v2805_v63, %v1174_v47  ;;  %v3004_v37 = vsub.f32 %v2808_v2, %v1175_v19  ;;  %v1230_v1 = vsel %vm75_vm0, %v1204_v28, 0.0  ;;  %v1233_v43 = vsel %vm75_vm0, %v1205_v29, 0.0 }
 0x1fd   :  { %1231 = vadd.xlane.f32.xlu1 %v1230_v1  ;;  %v1148_v12 = vpop.xlane.xlu1 %1147  ;;  %1234 = vadd.xlane.f32.xlu0 %v1233_v43  ;;  %v1151_v39 = vpop.xlane.xlu0 %1150 }
 0x1fe   :  { %v1176_v36 = vmul.f32 0.03125, %v1148_v12  ;;  %v1177_v15 = vmul.f32 0.03125, %v1151_v39  ;;  %v1206_v63 = vmul.f32 %v3001_v49, %v3001_v49  ;;  %v1207_v2 = vmul.f32 %v3004_v37, %v3004_v37 }
 0x200   :  { %v3016_v44 = vsub.f32 %v2813_v38, %v1176_v36  ;;  %v3019_v58 = vsub.f32 %v2822_v7, %v1177_v15  ;;  %v1236_v61 = vsel %vm75_vm0, %v1206_v63, 0.0  ;;  %v1239_v53 = vsel %vm75_vm0, %v1207_v2, 0.0 }
 0x201   :  { %1237 = vadd.xlane.f32.xlu1 %v1236_v61  ;;  %v1154_v24 = vpop.xlane.xlu1 %1153  ;;  %1240 = vadd.xlane.f32.xlu0 %v1239_v53  ;;  %v1157_v42 = vpop.xlane.xlu0 %1156 }
 0x202   :  { %v1178_v50 = vmul.f32 0.03125, %v1154_v24  ;;  %v1179_v38 = vmul.f32 0.03125, %v1157_v42  ;;  %v1208_v7 = vmul.f32 %v3016_v44, %v3016_v44  ;;  %v1209_v54 = vmul.f32 %v3019_v58, %v3019_v58 }
 0x204   :  { %v3034_v9 = vsub.f32 %v2829_v8, %v1178_v50  ;;  %v3037_v13 = vsub.f32 %v2834_v21, %v1179_v38  ;;  %v1242_v4 = vsel %vm75_vm0, %v1208_v7, 0.0  ;;  %v1245_v18 = vsel %vm75_vm0, %v1209_v54, 0.0 }
 0x205   :  { %1243 = vadd.xlane.f32.xlu1 %v1242_v4  ;;  %v1160_v34 = vpop.xlane.xlu1 %1159  ;;  %1246 = vadd.xlane.f32.xlu0 %v1245_v18  ;;  %v1163_v35 = vpop.xlane.xlu0 %1162 }
 0x206   :  { %v1180_v6 = vmul.f32 0.03125, %v1160_v34  ;;  %v1181_v30 = vmul.f32 0.03125, %v1163_v35  ;;  %v1210_v0 = vmul.f32 %v3034_v9, %v3034_v9  ;;  %v1211_v8 = vmul.f32 %v3037_v13, %v3037_v13 }
 0x208   :  { %v3046_v40 = vsub.f32 %v2845_v31, %v1180_v6  ;;  %v3049_v21 = vsub.f32 %v2848_v27, %v1181_v30  ;;  %v1248_v47 = vsel %vm75_vm0, %v1210_v0, 0.0  ;;  %v1251_v19 = vsel %vm75_vm0, %v1211_v8, 0.0 }
 0x209   :  { %1249 = vadd.xlane.f32.xlu1 %v1248_v47  ;;  %v1166_v28 = vpop.xlane.xlu1 %1165  ;;  %1252 = vadd.xlane.f32.xlu0 %v1251_v19 }
 0x20a   :  { %v1182_v29 = vmul.f32 0.03125, %v1166_v28  ;;  %v1212_v1 = vmul.f32 %v3046_v40, %v3046_v40  ;;  %v1213_v43 = vmul.f32 %v3049_v21, %v3049_v21 }
 0x20c   :  { %v3058_v31 = vsub.f32 %v2857_v32, %v1182_v29  ;;  %v1254_v27 = vsel %vm75_vm0, %v1212_v1, 0.0  ;;  %v1257_v10 = vsel %vm75_vm0, %v1213_v43, 0.0 }
 0x20d   :  { %1255 = vadd.xlane.f32.xlu1 %v1254_v27  ;;  %1258 = vadd.xlane.f32.xlu0 %v1257_v10 }
 0x20e   :  { %v1214_v12 = vmul.f32 %v3058_v31, %v3058_v31 }
 0x210   :  { %v1260_v39 = vsel %vm75_vm0, %v1214_v12, 0.0  ;;  %v3069_v12 = vld [vmem:[%s3781_s3] ss:$0 sm:$0xff] }
 0x211   :  { %1261 = vadd.xlane.f32.xlu1 %v1260_v39 }
 0x259   :  { %v429_v36 = vpop.xlane.xlu0 %428 }
 0x25a   :  { %v475_v15 = vmul.f32 0.03125, %v429_v36 }
 0x25c   :  { %v491_v63 = vadd.f32 1e-05, %v475_v15 }
 0x25e   :  { %2151 = vrsqrt.f32 %v491_v63  ;;  %v432_v2 = vpop.xlane.xlu1 %431  ;;  %v435_v61 = vpop.xlane.xlu0 %434 }
 0x25f   :  { %v476_v32 = vmul.f32 0.03125, %v432_v2  ;;  %v477_v53 = vmul.f32 0.03125, %v435_v61 }
 0x261   :  { %v492_v24 = vadd.f32 1e-05, %v476_v32  ;;  %v493_v42 = vadd.f32 1e-05, %v477_v53 }
 0x262   :  { %v438_v50 = vpop.xlane.xlu1 %437  ;;  %v441_v38 = vpop.xlane.xlu0 %440 }
 0x263   :  { %2153 = vrsqrt.f32 %v492_v24  ;;  %v478_v7 = vmul.f32 0.03125, %v438_v50  ;;  %v479_v54 = vmul.f32 0.03125, %v441_v38 }
 0x264   :  { %2155 = vrsqrt.f32 %v493_v42 }
 0x265   :  { %v494_v4 = vadd.f32 1e-05, %v478_v7  ;;  %v495_v18 = vadd.f32 1e-05, %v479_v54 }
 0x266   :  { %v444_v34 = vpop.xlane.xlu1 %443  ;;  %v447_v35 = vpop.xlane.xlu0 %446 }
 0x267   :  { %2157 = vrsqrt.f32 %v494_v4  ;;  %v480_v6 = vmul.f32 0.03125, %v444_v34  ;;  %v481_v30 = vmul.f32 0.03125, %v447_v35 }
 0x268   :  { %2159 = vrsqrt.f32 %v495_v18 }
 0x269   :  { %v496_v0 = vadd.f32 1e-05, %v480_v6  ;;  %v497_v8 = vadd.f32 1e-05, %v481_v30 }
 0x26a   :  { %v450_v47 = vpop.xlane.xlu1 %449  ;;  %v453_v19 = vpop.xlane.xlu0 %452 }
 0x26b   :  { %v2152_v28 = vpop.eup %2151  ;;  %2161 = vrsqrt.f32 %v496_v0  ;;  %v482_v29 = vmul.f32 0.03125, %v450_v47  ;;  %v483_v1 = vmul.f32 0.03125, %v453_v19 }
 0x26c   :  { %2163 = vrsqrt.f32 %v497_v8  ;;  %v523_v43 = vmul.f32 %v2152_v28, %v2862_v45  ;;  %v3075_v45 = vld [vmem:[%s3782_s4] ss:$0 sm:$0xff] }
 0x26d   :  { %v498_v27 = vadd.f32 1e-05, %v482_v29  ;;  %v499_v10 = vadd.f32 1e-05, %v483_v1 }
 0x26e   :  { %v456_v39 = vpop.xlane.xlu1 %455  ;;  %v459_v36 = vpop.xlane.xlu0 %458  ;;  %v545_v61 = vmul.f32 %v3069_v12, %v523_v43 }
 0x26f   :  { %2165 = vrsqrt.f32 %v498_v27  ;;  %v484_v15 = vmul.f32 0.03125, %v456_v39  ;;  %v485_v63 = vmul.f32 0.03125, %v459_v36 }
 0x270   :  { %v2154_v2 = vpop.eup %2153  ;;  %2167 = vrsqrt.f32 %v499_v10  ;;  %v567_v35 = vadd.f32 %v3075_v45, %v545_v61 }
 0x271   :  { %v2156_v32 = vpop.eup %2155  ;;  %v500_v53 = vadd.f32 1e-05, %v484_v15  ;;  %v501_v24 = vadd.f32 1e-05, %v485_v63  ;;  %v524_v42 = vmul.f32 %v2154_v2, %v2868_v62 }
 0x272   :  { %v462_v50 = vpop.xlane.xlu1 %461  ;;  %v465_v38 = vpop.xlane.xlu0 %464  ;;  %v525_v7 = vmul.f32 %v2156_v32, %v2871_v52 }
 0x273   :  { %2169 = vrsqrt.f32 %v500_v53  ;;  %v486_v54 = vmul.f32 0.03125, %v462_v50  ;;  %v487_v4 = vmul.f32 0.03125, %v465_v38  ;;  %v546_v18 = vmul.f32 %v3069_v12, %v524_v42 }
 0x274   :  { %v2158_v34 = vpop.eup %2157  ;;  %2171 = vrsqrt.f32 %v501_v24  ;;  %v547_v52 = vmul.f32 %v3069_v12, %v525_v7 }
 0x275   :  { %v2160_v6 = vpop.eup %2159  ;;  %v502_v30 = vadd.f32 1e-05, %v486_v54  ;;  %v503_v0 = vadd.f32 1e-05, %v487_v4  ;;  %v568_v8 = vadd.f32 %v3075_v45, %v546_v18  ;;  %v526_v62 = vmul.f32 %v2158_v34, %v2878_v59 }
 0x276   :  { %v468_v47 = vpop.xlane.xlu1 %467  ;;  %v471_v19 = vpop.xlane.xlu0 %470  ;;  %v527_v28 = vmul.f32 %v2160_v6, %v2881_v60  ;;  %v569_v60 = vadd.f32 %v3075_v45, %v547_v52 }
 0x277   :  { %2173 = vrsqrt.f32 %v502_v30  ;;  %v488_v29 = vmul.f32 0.03125, %v468_v47  ;;  %v489_v1 = vmul.f32 0.03125, %v471_v19  ;;  %v583_v43 = vpack.c.bf16 %v568_v8, %v567_v35 }
 0x278   :  { %v2162_v27 = vpop.eup %2161  ;;  %2175 = vrsqrt.f32 %v503_v0  ;;  %v548_v10 = vmul.f32 %v3069_v12, %v526_v62  ;;  %v549_v39 = vmul.f32 %v3069_v12, %v527_v28 }
 0x279   :  { %v2164_v36 = vpop.eup %2163  ;;  %v504_v15 = vadd.f32 1e-05, %v488_v29  ;;  %v505_v63 = vadd.f32 1e-05, %v489_v1  ;;  %1983 = vmatprep.mubr.msk.bf16.mxu0 %vm75_vm0, %v583_v43  ;;  %v528_v59 = vmul.f32 %v2162_v27, %v2890_v23  ;;  %v2102_v23 = vld [vmem:[%s3780_s13] sm:$0xff]  }
 0x27a   :  { %v474_v2 = vpop.xlane.xlu1 %473  ;;  %v1217_v61 = vpop.xlane.xlu0 %1216  ;;  %v570_v32 = vadd.f32 %v3075_v45, %v548_v10  ;;  %v529_v53 = vmul.f32 %v2164_v36, %v2893_v14  ;;  %v571_v54 = vadd.f32 %v3075_v45, %v549_v39 }
 0x27b   :  { %2177 = vrsqrt.f32 %v504_v15  ;;  %v490_v24 = vmul.f32 0.03125, %v474_v2  ;;  %v1263_v42 = vmul.f32 0.03125, %v1217_v61  ;;  %v550_v50 = vmul.f32 %v3069_v12, %v528_v59 }
 0x27c   :  { %v2166_v38 = vpop.eup %2165  ;;  %2179 = vrsqrt.f32 %v505_v63  ;;  %v584_v7 = vpack.c.bf16 %v570_v32, %v569_v60  ;;  %v551_v0 = vmul.f32 %v3069_v12, %v529_v53 }
 0x27d   :  { %v2168_v4 = vpop.eup %2167  ;;  %v506_v18 = vadd.f32 1e-05, %v490_v24  ;;  %v1279_v34 = vadd.f32 1e-05, %v1263_v42  ;;  %v572_v35 = vadd.f32 %v3075_v45, %v550_v50  ;;  %v530_v14 = vmul.f32 %v2166_v38, %v2902_v26 }
 0x27e   :  { %1984 = vmatmul.mubr.msk.bf16.vlgmr.msra.gmra.mxu0 %vm75_vm0, %v584_v7  ;;  %v1220_v6 = vpop.xlane.xlu1 %1219  ;;  %v1223_v30 = vpop.xlane.xlu0 %1222  ;;  %v531_v8 = vmul.f32 %v2168_v4, %v2905_v20 }
 0x27f   :  { %2181 = vrsqrt.f32 %v506_v18  ;;  %2032 = vmatpush3.bf16.msra.mxu0 %v3026_v3  ;;  %v1264_v62 = vmul.f32 0.03125, %v1220_v6  ;;  %v1265_v47 = vmul.f32 0.03125, %v1223_v30  ;;  %v585_v19 = vpack.c.bf16 %v572_v35, %v571_v54 }
 0x280   :  { %v2170_v52 = vpop.eup %2169  ;;  %2183 = vrsqrt.f32 %v1279_v34  ;;  %v552_v28 = vmul.f32 %v3069_v12, %v530_v14  ;;  %v553_v26 = vmul.f32 %v3069_v12, %v531_v8  ;;  %2033 = vmatprep.subr.bf16.mxu0 %v2102_v23  ;;  %v573_v3 = vadd.f32 %v3075_v45, %v551_v0 }
 0x281   :  { %v2172_v29 = vpop.eup %2171  ;;  %v1280_v1 = vadd.f32 1e-05, %v1264_v62  ;;  %v1281_v43 = vadd.f32 1e-05, %v1265_v47  ;;  %1987 = vmatprep.mubr.msk.bf16.mxu0 %vm75_vm0, %v585_v19  ;;  %v532_v20 = vmul.f32 %v2170_v52, %v2914_v22 }
 0x282   :  { %v1226_v27 = vpop.xlane.xlu1 %1225  ;;  %v1229_v10 = vpop.xlane.xlu0 %1228  ;;  %v574_v39 = vadd.f32 %v3075_v45, %v552_v28  ;;  %v533_v36 = vmul.f32 %v2172_v29, %v2917_v48  ;;  %v575_v60 = vadd.f32 %v3075_v45, %v553_v26 }
 0x283   :  { %2185 = vrsqrt.f32 %v1280_v1  ;;  %v1266_v15 = vmul.f32 0.03125, %v1226_v27  ;;  %v1267_v63 = vmul.f32 0.03125, %v1229_v10  ;;  %v554_v59 = vmul.f32 %v3069_v12, %v532_v20  ;;  %2034 = vmatpush3.bf16.msra.mxu0 %v2102_v23 }
 0x284   :  { %v2174_v2 = vpop.eup %2173  ;;  %2187 = vrsqrt.f32 %v1281_v43  ;;  %v586_v61 = vpack.c.bf16 %v574_v39, %v573_v3  ;;  %v555_v38 = vmul.f32 %v3069_v12, %v533_v36 }
 0x285   :  { %v2176_v22 = vpop.eup %2175  ;;  %v1282_v32 = vadd.f32 1e-05, %v1266_v15  ;;  %v1283_v53 = vadd.f32 1e-05, %v1267_v63  ;;  %v576_v24 = vadd.f32 %v3075_v45, %v554_v59  ;;  %v534_v42 = vmul.f32 %v2174_v2, %v2926_v33  ;;  %v3134_v15 = vld [vmem:[%s3783_s11] ss:$0 sm:$0xff] }
 0x286   :  { %1988 = vmatmul.mubr.msk.bf16.gmra.mxu0 %vm75_vm0, %v586_v61  ;;  %v1232_v48 = vpop.xlane.xlu1 %1231  ;;  %v1235_v50 = vpop.xlane.xlu0 %1234  ;;  %v535_v7 = vmul.f32 %v2176_v22, %v2929_v56  ;;  %v577_v56 = vadd.f32 %v3075_v45, %v555_v38 }
 0x287   :  { %2189 = vrsqrt.f32 %v1282_v32  ;;  %v1268_v54 = vmul.f32 0.03125, %v1232_v48  ;;  %v1269_v23 = vmul.f32 0.03125, %v1235_v50  ;;  %v587_v4 = vpack.c.bf16 %v576_v24, %v575_v60 }
 0x288   :  { %v2178_v18 = vpop.eup %2177  ;;  %2191 = vrsqrt.f32 %v1283_v53  ;;  %v556_v34 = vmul.f32 %v3069_v12, %v534_v42  ;;  %v557_v35 = vmul.f32 %v3069_v12, %v535_v7 }
 0x289   :  { %v2180_v14 = vpop.eup %2179  ;;  %v1284_v33 = vadd.f32 1e-05, %v1268_v54  ;;  %v1285_v6 = vadd.f32 1e-05, %v1269_v23  ;;  %1991 = vmatprep.mubr.msk.bf16.mxu0 %vm75_vm0, %v587_v4  ;;  %v536_v30 = vmul.f32 %v2178_v18, %v2938_v57  ;;  %v3146_v54 = vld [vmem:[%s3784_s12] ss:$0 sm:$0xff] }
 0x28a   :  { %v1238_v0 = vpop.xlane.xlu1 %1237  ;;  %v1241_v8 = vpop.xlane.xlu0 %1240  ;;  %v578_v62 = vadd.f32 %v3075_v45, %v556_v34  ;;  %v537_v47 = vmul.f32 %v2180_v14, %v2941_v5  ;;  %v579_v1 = vadd.f32 %v3075_v45, %v557_v35 }
 0x28b   :  { %2193 = vrsqrt.f32 %v1284_v33  ;;  %v1270_v19 = vmul.f32 0.03125, %v1238_v0  ;;  %v1271_v52 = vmul.f32 0.03125, %v1241_v8  ;;  %v558_v28 = vmul.f32 %v3069_v12, %v536_v30 }
 0x28c   :  { %v2182_v26 = vpop.eup %2181  ;;  %2195 = vrsqrt.f32 %v1285_v6  ;;  %v588_v29 = vpack.c.bf16 %v578_v62, %v577_v56  ;;  %v559_v39 = vmul.f32 %v3069_v12, %v537_v47 }
 0x28d   :  { %v2184_v43 = vpop.eup %2183  ;;  %v1286_v57 = vadd.f32 1e-05, %v1270_v19  ;;  %v1287_v20 = vadd.f32 1e-05, %v1271_v52  ;;  %v580_v27 = vadd.f32 %v3075_v45, %v558_v28  ;;  %v538_v10 = vmul.f32 %v2182_v26, %v2950_v41 }
 0x28e   :  { %1992 = vmatmul.mubr.msk.bf16.gmra.mxu0 %vm75_vm0, %v588_v29  ;;  %v1244_v5 = vpop.xlane.xlu1 %1243  ;;  %v1247_v3 = vpop.xlane.xlu0 %1246  ;;  %v1311_v36 = vmul.f32 %v2184_v43, %v2953_v16  ;;  %v581_v48 = vadd.f32 %v3075_v45, %v559_v39 }
 0x28f   :  { %2197 = vrsqrt.f32 %v1286_v57  ;;  %v1272_v63 = vmul.f32 0.03125, %v1244_v5  ;;  %v1273_v59 = vmul.f32 0.03125, %v1247_v3  ;;  %v589_v2 = vpack.c.bf16 %v580_v27, %v579_v1 }
 0x290   :  { %v2186_v61 = vpop.eup %2185  ;;  %2199 = vrsqrt.f32 %v1287_v20  ;;  %v560_v41 = vmul.f32 %v3069_v12, %v538_v10  ;;  %v1333_v38 = vmul.f32 %v3134_v15, %v1311_v36 }
 0x291   :  { %v2188_v60 = vpop.eup %2187  ;;  %v1288_v22 = vadd.f32 1e-05, %v1272_v63  ;;  %v1289_v32 = vadd.f32 1e-05, %v1273_v59  ;;  %1995 = vmatprep.mubr.msk.bf16.mxu0 %vm75_vm0, %v589_v2  ;;  %v1312_v16 = vmul.f32 %v2186_v61, %v2962_v11 }
 0x292   :  { %v1313_v53 = vmul.f32 %v2188_v60, %v2965_v25  ;;  %v1250_v24 = vpop.xlane.xlu1 %1249  ;;  %v1253_v42 = vpop.xlane.xlu0 %1252  ;;  %v582_v50 = vadd.f32 %v3075_v45, %v560_v41  ;;  %v1355_v30 = vadd.f32 %v3146_v54, %v1333_v38 }
 0x293   :  { %2201 = vrsqrt.f32 %v1288_v22  ;;  %v1274_v7 = vmul.f32 0.03125, %v1250_v24  ;;  %v1275_v12 = vmul.f32 0.03125, %v1253_v42  ;;  %v1334_v11 = vmul.f32 %v3134_v15, %v1312_v16 }
 0x294   :  { %v2190_v23 = vpop.eup %2189  ;;  %v1335_v25 = vmul.f32 %v3134_v15, %v1313_v53  ;;  %2203 = vrsqrt.f32 %v1289_v32  ;;  %v590_v4 = vpack.c.bf16 %v582_v50, %v581_v48 }
 0x295   :  { %v2192_v18 = vpop.eup %2191  ;;  %v1314_v45 = vmul.f32 %v2190_v23, %v2974_v17  ;;  %v1290_v34 = vadd.f32 1e-05, %v1274_v7  ;;  %v1291_v35 = vadd.f32 1e-05, %v1275_v12  ;;  %v1356_v14 = vadd.f32 %v3146_v54, %v1334_v11 }
 0x296   :  { %1996 = vmatmul.mubr.msk.bf16.gmra.mxu0 %vm75_vm0, %v590_v4  ;;  %v1256_v33 = vpop.xlane.xlu1 %1255  ;;  %v1259_v6 = vpop.xlane.xlu0 %1258  ;;  %v1315_v0 = vmul.f32 %v2192_v18, %v2977_v46  ;;  %v1357_v19 = vadd.f32 %v3146_v54, %v1335_v25 }
 0x297   :  { %v1336_v8 = vmul.f32 %v3134_v15, %v1314_v45  ;;  %2205 = vrsqrt.f32 %v1290_v34  ;;  %v1276_v56 = vmul.f32 0.03125, %v1256_v33  ;;  %v1277_v62 = vmul.f32 0.03125, %v1259_v6 }
 0x298   :  { %v2194_v47 = vpop.eup %2193  ;;  %2207 = vrsqrt.f32 %v1291_v35  ;;  %v1371_v17 = vpack.c.bf16 %v1356_v14, %v1355_v30  ;;  %v1337_v52 = vmul.f32 %v3134_v15, %v1315_v0 }
 0x299   :  { %v2196_v28 = vpop.eup %2195  ;;  %v1292_v26 = vadd.f32 1e-05, %v1276_v56  ;;  %v1293_v29 = vadd.f32 1e-05, %v1277_v62  ;;  %v1358_v1 = vadd.f32 %v3146_v54, %v1336_v8  ;;  %v1316_v43 = vmul.f32 %v2194_v47, %v2986_v55  ;;  %v2104_v47 = vld [vmem:[%s3785_s7 + $0x30] sm:$0xff]  }
 0x29a   :  { %2035 = vmatprep.mubr.msk.bf16.mxu0 %vm75_vm0, %v1371_v17  ;;  %v1262_v46 = vpop.xlane.xlu1 %1261  ;;  %v1317_v57 = vmul.f32 %v2196_v28, %v2989_v51  ;;  %v1359_v3 = vadd.f32 %v3146_v54, %v1337_v52  ;;  %v2107_v17 = vld [vmem:[%s3785_s7 + $0x18] sm:$0xff]   ;;  %v2109_v52 = vld [vmem:[%s3785_s7 + $0x8] sm:$0xff]   ;;  %v2110_v28 = vld [vmem:[%s3785_s7] sm:$0xff]  }
 0x29b   :  { %2209 = vrsqrt.f32 %v1292_v26  ;;  %v1278_v20 = vmul.f32 0.03125, %v1262_v46  ;;  %v1372_v27 = vpack.c.bf16 %v1358_v1, %v1357_v19  ;;  %v1338_v10 = vmul.f32 %v3134_v15, %v1316_v43  ;;  %v2108_v19 = vld [vmem:[%s3785_s7 + $0x10] sm:$0xff]   ;;  %v3228_v26 = vld [vmem:[%s3786_s15 + $0x38] sm:$0xff]   ;;  %v3243_v1 = vld [vmem:[%s3786_s15 + $0x28] sm:$0xff]  }
 0x29c   :  { %v2198_v5 = vpop.eup %2197  ;;  %2211 = vrsqrt.f32 %v1293_v29  ;;  %v1339_v59 = vmul.f32 %v3134_v15, %v1317_v57  ;;  %2051 = vmatprep.subr.bf16.mxu0 %v3228_v26  ;;  %v3236_v29 = vld [vmem:[%s3786_s15 + $0x30] sm:$0xff]   ;;  %v3250_v43 = vld [vmem:[%s3786_s15 + $0x20] sm:$0xff]   ;;  %v3257_v46 = vld [vmem:[%s3786_s15 + $0x18] sm:$0xff]  }
 0x29d   :  { %v2200_v39 = vpop.eup %2199  ;;  %v1294_v36 = vadd.f32 1e-05, %v1278_v20  ;;  %v1360_v63 = vadd.f32 %v3146_v54, %v1338_v10  ;;  %v1318_v55 = vmul.f32 %v2198_v5, %v3001_v49  ;;  %v3264_v57 = vld [vmem:[%s3786_s15 + $0x10] sm:$0xff]   ;;  %v3269_v20 = vld [vmem:[%s3786_s15 + $0x8] sm:$0xff]   ;;  %v3285_v10 = vld [vmem:[%s3787_s6] ss:$0 sm:$0xff] }
 0x29e   :  { %2036 = vmatmul.mubr.msk.bf16.vlgmr.msra.gmra.mxu0 %vm75_vm0, %v1372_v27  ;;  %v1319_v51 = vmul.f32 %v2200_v39, %v3004_v37  ;;  %v1361_v22 = vadd.f32 %v3146_v54, %v1339_v59  ;;  %v3277_v27 = vld [vmem:[%s3786_s15] sm:$0xff]  }
 0x29f   :  { %2213 = vrsqrt.f32 %v1294_v36  ;;  %v1373_v2 = vpack.c.bf16 %v1360_v63, %v1359_v3  ;;  %v1340_v61 = vmul.f32 %v3134_v15, %v1318_v55  ;;  %2052 = vmatpush3.bf16.msra.mxu0 %v3228_v26 }
 0x2a0   :  { %v2202_v41 = vpop.eup %2201  ;;  %v1341_v16 = vmul.f32 %v3134_v15, %v1319_v51  ;;  %2053 = vmatprep.subr.bf16.mxu0 %v3236_v29 }
 0x2a1   :  { %v2204_v60 = vpop.eup %2203  ;;  %2039 = vmatprep.mubr.msk.bf16.mxu0 %vm75_vm0, %v1373_v2  ;;  %v1362_v32 = vadd.f32 %v3146_v54, %v1340_v61  ;;  %v1320_v49 = vmul.f32 %v2202_v41, %v3016_v44 }
 0x2a2   :  { %v1321_v53 = vmul.f32 %v2204_v60, %v3019_v58  ;;  %v1363_v50 = vadd.f32 %v3146_v54, %v1341_v16 }
 0x2a3   :  { %v1374_v24 = vpack.c.bf16 %v1362_v32, %v1361_v22  ;;  %v1342_v37 = vmul.f32 %v3134_v15, %v1320_v49  ;;  %2054 = vmatpush3.bf16.msra.mxu0 %v3236_v29 }
 0x2a4   :  { %v2206_v42 = vpop.eup %2205  ;;  %v1343_v12 = vmul.f32 %v3134_v15, %v1321_v53  ;;  %2055 = vmatprep.subr.bf16.mxu0 %v3243_v1 }
 0x2a5   :  { %v2208_v48 = vpop.eup %2207  ;;  %v1364_v38 = vadd.f32 %v3146_v54, %v1342_v37  ;;  %v1322_v7 = vmul.f32 %v2206_v42, %v3034_v9 }
 0x2a6   :  { %2040 = vmatmul.mubr.msk.bf16.gmra.mxu0 %vm75_vm0, %v1374_v24  ;;  %v1323_v44 = vmul.f32 %v2208_v48, %v3037_v13  ;;  %v1365_v4 = vadd.f32 %v3146_v54, %v1343_v12 }
 0x2a7   :  { %v1375_v11 = vpack.c.bf16 %v1364_v38, %v1363_v50  ;;  %v1344_v58 = vmul.f32 %v3134_v15, %v1322_v7  ;;  %2056 = vmatpush3.bf16.msra.mxu0 %v3243_v1 }
 0x2a8   :  { %v2210_v23 = vpop.eup %2209  ;;  %v1345_v9 = vmul.f32 %v3134_v15, %v1323_v44  ;;  %2057 = vmatprep.subr.bf16.mxu0 %v3250_v43 }
 0x2a9   :  { %v2212_v25 = vpop.eup %2211  ;;  %2043 = vmatprep.mubr.msk.bf16.mxu0 %vm75_vm0, %v1375_v11  ;;  %v1366_v18 = vadd.f32 %v3146_v54, %v1344_v58  ;;  %v1324_v45 = vmul.f32 %v2210_v23, %v3046_v40 }
 0x2aa   :  { %v1325_v34 = vmul.f32 %v2212_v25, %v3049_v21  ;;  %v1367_v33 = vadd.f32 %v3146_v54, %v1345_v9 }
 0x2ab   :  { %v1376_v35 = vpack.c.bf16 %v1366_v18, %v1365_v4  ;;  %v1346_v13 = vmul.f32 %v3134_v15, %v1324_v45  ;;  %2058 = vmatpush3.bf16.msra.mxu0 %v3250_v43 }
 0x2ac   :  { %v2214_v14 = vpop.eup %2213  ;;  %v1347_v0 = vmul.f32 %v3134_v15, %v1325_v34  ;;  %2059 = vmatprep.subr.bf16.mxu0 %v3257_v46 }
 0x2ad   :  { %v1368_v6 = vadd.f32 %v3146_v54, %v1346_v13  ;;  %v1326_v30 = vmul.f32 %v2214_v14, %v3058_v31  ;;  %v2103_v31 = vld [vmem:[%s3785_s7 + $0x38] sm:$0xff]  }
 0x2ae   :  { %2044 = vmatmul.mubr.msk.bf16.gmra.mxu0 %vm75_vm0, %v1376_v35  ;;  %v1369_v21 = vadd.f32 %v3146_v54, %v1347_v0  ;;  %1999 = vmatprep.subr.bf16.mxu1 %v2103_v31 }
 0x2af   :  { %v1377_v8 = vpack.c.bf16 %v1368_v6, %v1367_v33  ;;  %v1348_v40 = vmul.f32 %v3134_v15, %v1326_v30  ;;  %2000 = vmatpush3.bf16.msra.mxu1 %v2103_v31  ;;  %v2105_v15 = vld [vmem:[%s3785_s7 + $0x28] sm:$0xff]   ;;  %2060 = vmatpush3.bf16.msra.mxu0 %v3257_v46 }
 0x2b0   :  { %2001 = vmatprep.subr.bf16.mxu1 %v2104_v47  ;;  %2061 = vmatprep.subr.bf16.mxu0 %v3264_v57 }
 0x2b1   :  { %2047 = vmatprep.mubr.msk.bf16.mxu0 %vm75_vm0, %v1377_v8  ;;  %v1370_v56 = vadd.f32 %v3146_v54, %v1348_v40  ;;  %v2106_v54 = vld [vmem:[%s3785_s7 + $0x20] sm:$0xff]  }
 0x2b3   :  { %v1378_v62 = vpack.c.bf16 %v1370_v56, %v1369_v21  ;;  %2002 = vmatpush3.bf16.msra.mxu1 %v2104_v47  ;;  %2062 = vmatpush3.bf16.msra.mxu0 %v3264_v57 }
 0x2b4   :  { %2003 = vmatprep.subr.bf16.mxu1 %v2105_v15  ;;  %2063 = vmatprep.subr.bf16.mxu0 %v3269_v20 }
 0x2b6   :  { %2048 = vmatmul.mubr.msk.bf16.gmra.mxu0 %vm75_vm0, %v1378_v62 }
 0x2b7   :  { %2004 = vmatpush3.bf16.msra.mxu1 %v2105_v15  ;;  %2064 = vmatpush3.bf16.msra.mxu0 %v3269_v20 }
 0x2b8   :  { %2005 = vmatprep.subr.bf16.mxu1 %v2106_v54  ;;  %2065 = vmatprep.subr.bf16.mxu0 %v3277_v27 }
 0x2bb   :  { %2006 = vmatpush3.bf16.msra.mxu1 %v2106_v54  ;;  %2066 = vmatpush3.bf16.msra.mxu0 %v3277_v27 }
 0x2bc   :  { %2007 = vmatprep.subr.bf16.mxu1 %v2107_v17 }
 0x2bf   :  { %2008 = vmatpush3.bf16.msra.mxu1 %v2107_v17 }
 0x2c0   :  { %2009 = vmatprep.subr.bf16.mxu1 %v2108_v19 }
 0x2c3   :  { %2010 = vmatpush3.bf16.msra.mxu1 %v2108_v19 }
 0x2c4   :  { %2011 = vmatprep.subr.bf16.mxu1 %v2109_v52 }
 0x2c7   :  { %2012 = vmatpush3.bf16.msra.mxu1 %v2109_v52 }
 0x2c8   :  { %2013 = vmatprep.subr.bf16.mxu1 %v2110_v28 }
 0x2cb   :  { %2014 = vmatpush3.bf16.msra.mxu1 %v2110_v28 }
 0x2cc   :  { %2083 = vmatprep.subr.bf16.mxu1 %v3228_v26 }
 0x33e   :  { %v1985_v5 = vpop.f32.mrf.mxu0 }
 0x33f   :  { %v3288_v3 = vadd.f32 %v1985_v5, %v3285_v10 }
 0x340   :  { %v672_v39 = vpop.f32.mrf.mxu0 }
 0x341   :  { %v737_v36 = vmul.f32 %v3288_v3, %v3288_v3  ;;  %v3293_v63 = vadd.f32 %v3285_v10, %v672_v39 }
 0x342   :  { %v1986_v55 = vpop.f32.mrf.mxu0 }
 0x343   :  { %v753_v59 = vmul.f32 %v737_v36, %v3288_v3  ;;  %v735_v51 = vmul.f32 %v3293_v63, %v3293_v63  ;;  %v3299_v2 = vadd.f32 %v1986_v55, %v3285_v10 }
 0x344   :  { %v675_v61 = vpop.f32.mrf.mxu0 }
 0x345   :  { %v769_v41 = vmul.f32 0.044715, %v753_v59  ;;  %v751_v60 = vmul.f32 %v735_v51, %v3293_v63  ;;  %v738_v22 = vmul.f32 %v3299_v2, %v3299_v2  ;;  %v3305_v32 = vadd.f32 %v3285_v10, %v675_v61 }
 0x346   :  { %v1989_v49 = vpop.f32.mrf.mxu0 }
 0x347   :  { %v767_v16 = vmul.f32 0.044715, %v751_v60  ;;  %v754_v53 = vmul.f32 %v738_v22, %v3299_v2  ;;  %v736_v24 = vmul.f32 %v3305_v32, %v3305_v32  ;;  %v785_v37 = vadd.f32 %v769_v41, %v3288_v3 }
 0x348   :  { %v3312_v42 = vadd.f32 %v1989_v49, %v3285_v10  ;;  %v688_v48 = vpop.f32.mrf.mxu0 }
 0x349   :  { %v783_v50 = vadd.f32 %v767_v16, %v3293_v63  ;;  %v752_v38 = vmul.f32 %v736_v24, %v3305_v32  ;;  %v770_v7 = vmul.f32 0.044715, %v754_v53  ;;  %v3319_v44 = vadd.f32 %v3285_v10, %v688_v48 }
 0x34a   :  { %v741_v12 = vmul.f32 %v3312_v42, %v3312_v42  ;;  %v1990_v11 = vpop.f32.mrf.mxu0  ;;  %v801_v25 = vmul.f32 0.7978846, %v785_v37 }
 0x34b   :  { %v768_v58 = vmul.f32 0.044715, %v752_v38  ;;  %v3322_v23 = vadd.f32 %v1990_v11, %v3285_v10  ;;  %v739_v18 = vmul.f32 %v3319_v44, %v3319_v44  ;;  %v799_v9 = vmul.f32 0.7978846, %v783_v50 }
 0x34c   :  { %v757_v4 = vmul.f32 %v741_v12, %v3312_v42  ;;  %v691_v45 = vpop.f32.mrf.mxu0  ;;  %v786_v14 = vadd.f32 %v770_v7, %v3299_v2 }
 0x34d   :  { %v784_v34 = vadd.f32 %v768_v58, %v3305_v32  ;;  %v742_v35 = vmul.f32 %v3322_v23, %v3322_v23  ;;  %v3331_v13 = vadd.f32 %v3285_v10, %v691_v45  ;;  %v755_v6 = vmul.f32 %v739_v18, %v3319_v44 }
 0x34e   :  { %v773_v33 = vmul.f32 0.044715, %v757_v4  ;;  %v1993_v30 = vpop.f32.mrf.mxu0  ;;  %2215 = vtanh.f32 %v799_v9  ;;  %v802_v19 = vmul.f32 0.7978846, %v786_v14 }
 0x34f   :  { %v758_v0 = vmul.f32 %v742_v35, %v3322_v23  ;;  %v740_v8 = vmul.f32 %v3331_v13, %v3331_v13  ;;  %v3339_v40 = vadd.f32 %v1993_v30, %v3285_v10  ;;  %2217 = vtanh.f32 %v801_v25 }
 0x350   :  { %v789_v21 = vadd.f32 %v773_v33, %v3312_v42  ;;  %v771_v56 = vmul.f32 0.044715, %v755_v6  ;;  %v704_v62 = vpop.f32.mrf.mxu0  ;;  %v800_v31 = vmul.f32 0.7978846, %v784_v34 }
 0x351   :  { %v774_v47 = vmul.f32 0.044715, %v758_v0  ;;  %v756_v15 = vmul.f32 %v740_v8, %v3331_v13  ;;  %v745_v54 = vmul.f32 %v3339_v40, %v3339_v40  ;;  %v3346_v17 = vadd.f32 %v3285_v10, %v704_v62 }
 0x352   :  { %v805_v52 = vmul.f32 0.7978846, %v789_v21  ;;  %v787_v28 = vadd.f32 %v771_v56, %v3319_v44  ;;  %v1994_v5 = vpop.f32.mrf.mxu0  ;;  %2219 = vtanh.f32 %v800_v31  ;;  %v3387_v21 = vld [vmem:[%s3788_s14] ss:$0 sm:$0xff] }
 0x353   :  { %v790_v39 = vadd.f32 %v774_v47, %v3322_v23  ;;  %v772_v36 = vmul.f32 0.044715, %v756_v15  ;;  %v761_v55 = vmul.f32 %v745_v54, %v3339_v40  ;;  %v743_v59 = vmul.f32 %v3346_v17, %v3346_v17 }
 0x354   :  { %v803_v51 = vmul.f32 0.7978846, %v787_v28  ;;  %v3354_v61 = vadd.f32 %v1994_v5, %v3285_v10  ;;  %v707_v41 = vpop.f32.mrf.mxu0  ;;  %2221 = vtanh.f32 %v802_v19 }
 0x355   :  { %v806_v60 = vmul.f32 0.7978846, %v790_v39  ;;  %v788_v22 = vadd.f32 %v772_v36, %v3331_v13  ;;  %v777_v49 = vmul.f32 0.044715, %v761_v55  ;;  %v759_v16 = vmul.f32 %v743_v59, %v3346_v17 }
 0x356   :  { %v746_v53 = vmul.f32 %v3354_v61, %v3354_v61  ;;  %v3361_v24 = vadd.f32 %v3285_v10, %v707_v41  ;;  %v1997_v37 = vpop.f32.mrf.mxu0  ;;  %2223 = vtanh.f32 %v805_v52 }
 0x357   :  { %v804_v48 = vmul.f32 0.7978846, %v788_v22  ;;  %v775_v50 = vmul.f32 0.044715, %v759_v16  ;;  %2225 = vtanh.f32 %v803_v51  ;;  %v3367_v12 = vadd.f32 %v1997_v37, %v3285_v10 }
 0x358   :  { %v762_v38 = vmul.f32 %v746_v53, %v3354_v61  ;;  %v744_v7 = vmul.f32 %v3361_v24, %v3361_v24  ;;  %v720_v11 = vpop.f32.mrf.mxu0  ;;  %2227 = vtanh.f32 %v806_v60  ;;  %v793_v58 = vadd.f32 %v777_v49, %v3339_v40 }
 0x359   :  { %v3371_v25 = vadd.f32 %v3285_v10, %v720_v11  ;;  %v791_v4 = vadd.f32 %v775_v50, %v3346_v17  ;;  %v749_v9 = vmul.f32 %v3367_v12, %v3367_v12  ;;  %2229 = vtanh.f32 %v804_v48 }
 0x35a   :  { %v778_v18 = vmul.f32 0.044715, %v762_v38  ;;  %v760_v45 = vmul.f32 %v744_v7, %v3361_v24  ;;  %v1998_v34 = vpop.f32.mrf.mxu0  ;;  %v809_v31 = vmul.f32 0.7978846, %v793_v58 }
 0x35b   :  { %v2216_v35 = vpop.eup %2215  ;;  %v747_v14 = vmul.f32 %v3371_v25, %v3371_v25  ;;  %v3380_v33 = vadd.f32 %v1998_v34, %v3285_v10  ;;  %v765_v0 = vmul.f32 %v749_v9, %v3367_v12  ;;  %v807_v19 = vmul.f32 0.7978846, %v791_v4 }
 0x35c   :  { %v794_v6 = vadd.f32 %v778_v18, %v3354_v61  ;;  %v776_v30 = vmul.f32 0.044715, %v760_v45  ;;  %v723_v8 = vpop.f32.mrf.mxu0  ;;  %v831_v56 = vadd.f32 1.0, %v2216_v35  ;;  %v2218_v62 = vpop.eup %2217  ;;  %2231 = vtanh.f32 %v809_v31 }
 0x35d   :  { %v763_v47 = vmul.f32 %v747_v14, %v3371_v25  ;;  %v750_v15 = vmul.f32 %v3380_v33, %v3380_v33  ;;  %v3393_v54 = vadd.f32 %v3285_v10, %v723_v8  ;;  %v781_v5 = vmul.f32 0.044715, %v765_v0 }
 0x35e   :  { %v810_v52 = vmul.f32 0.7978846, %v794_v6  ;;  %v792_v28 = vadd.f32 %v776_v30, %v3361_v24  ;;  %v2037_v39 = vpop.f32.mrf.mxu0  ;;  %v847_v16 = vmul.f32 0.5, %v831_v56  ;;  %v833_v58 = vadd.f32 1.0, %v2218_v62 }
 0x35f   :  { %v2220_v36 = vpop.eup %2219  ;;  %v779_v55 = vmul.f32 0.044715, %v763_v47  ;;  %v766_v59 = vmul.f32 %v750_v15, %v3380_v33  ;;  %v748_v51 = vmul.f32 %v3393_v54, %v3393_v54  ;;  %v3400_v41 = vadd.f32 %v2037_v39, %v3387_v21 }
 0x360   :  { %v808_v60 = vmul.f32 0.7978846, %v792_v28  ;;  %v797_v10 = vadd.f32 %v781_v5, %v3367_v12  ;;  %v1460_v22 = vpop.f32.mrf.mxu0  ;;  %v832_v49 = vadd.f32 1.0, %v2220_v36  ;;  %2233 = vtanh.f32 %v807_v19 }
 0x361   :  { %v795_v53 = vadd.f32 %v779_v55, %v3371_v25  ;;  %v782_v37 = vmul.f32 0.044715, %v766_v59  ;;  %v764_v48 = vmul.f32 %v748_v51, %v3393_v54  ;;  %v1525_v50 = vmul.f32 %v3400_v41, %v3400_v41  ;;  %v2222_v4 = vpop.eup %2221 }
 0x362   :  { %v3408_v38 = vadd.f32 %v3387_v21, %v1460_v22  ;;  %v2038_v7 = vpop.f32.mrf.mxu0  ;;  %v848_v11 = vmul.f32 0.5, %v832_v49  ;;  %v813_v18 = vmul.f32 0.7978846, %v797_v10  ;;  %2235 = vtanh.f32 %v810_v52 }
 0x363   :  { %v798_v45 = vadd.f32 %v782_v37, %v3380_v33  ;;  %v1541_v9 = vmul.f32 %v1525_v50, %v3400_v41  ;;  %v3412_v34 = vpop.eup %2223  ;;  %v811_v35 = vmul.f32 0.7978846, %v795_v53  ;;  %v3417_v6 = vadd.f32 %v2038_v7, %v3387_v21 }
 0x364   :  { %v1523_v14 = vmul.f32 %v3408_v38, %v3408_v38  ;;  %v1463_v30 = vpop.f32.mrf.mxu0  ;;  %v3419_v0 = vpop.eup %2225  ;;  %2237 = vtanh.f32 %v808_v60  ;;  %v780_v8 = vmul.f32 0.044715, %v764_v48  ;;  %v863_v62 = vmul.f32 %v847_v16, %v3293_v63 }
 0x365   :  { %v1557_v56 = vmul.f32 0.044715, %v1541_v9  ;;  %v3422_v31 = vpop.eup %2227  ;;  %v1526_v15 = vmul.f32 %v3417_v6, %v3417_v6  ;;  %v3428_v19 = vadd.f32 %v3387_v21, %v1463_v30  ;;  %v864_v28 = vmul.f32 %v848_v11, %v3305_v32 }
 0x366   :  { %v1539_v47 = vmul.f32 %v1523_v14, %v3408_v38  ;;  %v2041_v52 = vpop.f32.mrf.mxu0  ;;  %2239 = vtanh.f32 %v813_v18  ;;  %v814_v5 = vmul.f32 0.7978846, %v798_v45  ;;  %v2230_v63 = vpop.eup %2229  ;;  %v796_v10 = vadd.f32 %v780_v8, %v3393_v54 }
 0x367   :  { %v1573_v39 = vadd.f32 %v1557_v56, %v3400_v41  ;;  %v3433_v36 = vadd.f32 %v2041_v52, %v3387_v21  ;;  %2241 = vtanh.f32 %v811_v35  ;;  %v1542_v55 = vmul.f32 %v1526_v15, %v3417_v6 }
 0x368   :  { %v1524_v59 = vmul.f32 %v3428_v19, %v3428_v19  ;;  %v879_v51 = vpack.c.bf16 %v864_v28, %v863_v62  ;;  %v1476_v60 = vpop.f32.mrf.mxu0  ;;  %v834_v49 = vadd.f32 1.0, %v2222_v4  ;;  %v1555_v16 = vmul.f32 0.044715, %v1539_v47 }
 0x369   :  { %v1589_v22 = vmul.f32 0.7978846, %v1573_v39  ;;  %v1529_v32 = vmul.f32 %v3433_v36, %v3433_v36  ;;  %v1558_v53 = vmul.f32 0.044715, %v1542_v55  ;;  %v849_v48 = vmul.f32 0.5, %v833_v58  ;;  %v3458_v28 = vpop.eup %2231 }
 0x36a   :  { %v1540_v37 = vmul.f32 %v1524_v59, %v3428_v19  ;;  %2015 = vmatprep.mubr.bf16.mxu1 %v879_v51  ;;  %v2042_v50 = vpop.f32.mrf.mxu0  ;;  %2243 = vtanh.f32 %v814_v5  ;;  %v850_v11 = vmul.f32 0.5, %v834_v49  ;;  %v3444_v18 = vadd.f32 %v3387_v21, %v1476_v60 }
 0x36b   :  { %v1545_v7 = vmul.f32 %v1529_v32, %v3433_v36  ;;  %2245 = vtanh.f32 %v1589_v22  ;;  %v1574_v45 = vadd.f32 %v1558_v53, %v3417_v6  ;;  %v865_v4 = vmul.f32 %v849_v48, %v3288_v3 }
 0x36c   :  { %v1556_v9 = vmul.f32 0.044715, %v1540_v37  ;;  %v1479_v35 = vpop.f32.mrf.mxu0  ;;  %v866_v30 = vmul.f32 %v850_v11, %v3299_v2  ;;  %v1527_v58 = vmul.f32 %v3444_v18, %v3444_v18  ;;  %v3452_v8 = vadd.f32 %v2042_v50, %v3387_v21 }
 0x36d   :  { %v1561_v14 = vmul.f32 0.044715, %v1545_v7  ;;  %v812_v56 = vmul.f32 0.7978846, %v796_v10  ;;  %v1571_v62 = vadd.f32 %v1555_v16, %v3408_v38  ;;  %v1590_v47 = vmul.f32 0.7978846, %v1574_v45  ;;  %v3464_v55 = vpop.eup %2233 }
 0x36e   :  { %v3456_v15 = vadd.f32 %v3387_v21, %v1479_v35  ;;  %v2045_v52 = vpop.f32.mrf.mxu0  ;;  %v880_v5 = vpack.c.bf16 %v866_v30, %v865_v4  ;;  %v1543_v2 = vmul.f32 %v1527_v58, %v3444_v18  ;;  %v1530_v39 = vmul.f32 %v3452_v8, %v3452_v8 }
 0x36f   :  { %v1577_v3 = vadd.f32 %v1561_v14, %v3433_v36  ;;  %2247 = vtanh.f32 %v1590_v47  ;;  %v1572_v59 = vadd.f32 %v1556_v9, %v3428_v19  ;;  %v3470_v60 = vadd.f32 %v2045_v52, %v3387_v21  ;;  %v3472_v22 = vpop.eup %2235 }
 0x370   :  { %v1528_v51 = vmul.f32 %v3456_v15, %v3456_v15  ;;  %v1492_v10 = vpop.f32.mrf.mxu0  ;;  %2016 = vmatmul.mubr.bf16.vlgmr.msra.gmra.mxu1 %v880_v5  ;;  %v1559_v49 = vmul.f32 0.044715, %v1543_v2  ;;  %v1546_v16 = vmul.f32 %v1530_v39, %v3452_v8  ;;  %v835_v53 = vadd.f32 1.0, %v3419_v0 }
 0x371   :  { %v1593_v32 = vmul.f32 0.7978846, %v1577_v3  ;;  %v3476_v37 = vpop.eup %2237  ;;  %2249 = vtanh.f32 %v812_v56  ;;  %v1533_v50 = vmul.f32 %v3470_v60, %v3470_v60  ;;  %v836_v7 = vadd.f32 1.0, %v2230_v63  ;;  %2091 = vmatpush3.bf16.msra.mxu1 %v3228_v26 }
 0x372   :  { %v1544_v48 = vmul.f32 %v1528_v51, %v3456_v15  ;;  %v2046_v11 = vpop.f32.mrf.mxu0  ;;  %v1587_v45 = vmul.f32 0.7978846, %v1571_v62  ;;  %v1575_v9 = vadd.f32 %v1559_v49, %v3444_v18  ;;  %v1562_v4 = vmul.f32 0.044715, %v1546_v16  ;;  %2084 = vmatprep.subr.bf16.mxu1 %v3236_v29 }
 0x373   :  { %v851_v35 = vmul.f32 0.5, %v835_v53  ;;  %v3484_v0 = vpop.eup %2239  ;;  %v1549_v30 = vmul.f32 %v1533_v50, %v3470_v60  ;;  %v852_v58 = vmul.f32 0.5, %v836_v7  ;;  %v837_v56 = vadd.f32 1.0, %v3412_v34 }
 0x374   :  { %v1560_v14 = vmul.f32 0.044715, %v1544_v48  ;;  %v1495_v47 = vpop.f32.mrf.mxu0  ;;  %v3488_v63 = vpop.eup %2241  ;;  %v1588_v26 = vmul.f32 0.7978846, %v1572_v59  ;;  %2251 = vtanh.f32 %v1593_v32  ;;  %v1578_v62 = vadd.f32 %v1562_v4, %v3452_v8 }
 0x375   :  { %v838_v52 = vadd.f32 1.0, %v3422_v31  ;;  %v867_v5 = vmul.f32 %v851_v35, %v3319_v44  ;;  %v868_v2 = vmul.f32 %v852_v58, %v3331_v13  ;;  %v853_v39 = vmul.f32 0.5, %v837_v56  ;;  %2092 = vmatpush3.bf16.msra.mxu1 %v3236_v29 }
 0x376   :  { %v1576_v3 = vadd.f32 %v1560_v14, %v3456_v15  ;;  %v1594_v51 = vmul.f32 0.7978846, %v1578_v62  ;;  %v1565_v34 = vmul.f32 0.044715, %v1549_v30  ;;  %v3497_v16 = vadd.f32 %v3387_v21, %v1492_v10  ;;  %v2049_v59 = vpop.f32.mrf.mxu0  ;;  %2085 = vmatprep.subr.bf16.mxu1 %v3243_v1 }
 0x377   :  { %v854_v49 = vmul.f32 0.5, %v838_v52  ;;  %v3500_v32 = vpop.eup %2243  ;;  %2253 = vtanh.f32 %v1587_v45  ;;  %v1591_v31 = vmul.f32 0.7978846, %v1575_v9  ;;  %v881_v53 = vpack.c.bf16 %v868_v2, %v867_v5 }
 0x378   :  { %v2246_v44 = vpop.eup %2245  ;;  %2255 = vtanh.f32 %v1594_v51  ;;  %v869_v13 = vmul.f32 %v853_v39, %v3312_v42  ;;  %v1531_v48 = vmul.f32 %v3497_v16, %v3497_v16  ;;  %v1592_v10 = vmul.f32 0.7978846, %v1576_v3  ;;  %v1508_v4 = vpop.f32.mrf.mxu0 }
 0x379   :  { %v870_v29 = vmul.f32 %v854_v49, %v3322_v23  ;;  %2257 = vtanh.f32 %v1588_v26  ;;  %2019 = vmatprep.mubr.bf16.mxu1 %v881_v53  ;;  %v3507_v50 = vadd.f32 %v2046_v11, %v3387_v21  ;;  %v3510_v7 = vadd.f32 %v3387_v21, %v1495_v47  ;;  %2093 = vmatpush3.bf16.msra.mxu1 %v3243_v1 }
 0x37a   :  { %v1581_v45 = vadd.f32 %v1565_v34, %v3470_v60  ;;  %v1547_v42 = vmul.f32 %v1531_v48, %v3497_v16  ;;  %v3516_v23 = vadd.f32 %v2049_v59, %v3387_v21  ;;  %2086 = vmatprep.subr.bf16.mxu1 %v3250_v43  ;;  %2259 = vtanh.f32 %v1591_v31  ;;  %v2050_v51 = vpop.f32.mrf.mxu0 }
 0x37b   :  { %v882_v9 = vpack.c.bf16 %v870_v29, %v869_v13  ;;  %v1534_v11 = vmul.f32 %v3507_v50, %v3507_v50  ;;  %v1532_v35 = vmul.f32 %v3510_v7, %v3510_v7  ;;  %v839_v1 = vadd.f32 1.0, %v3464_v55 }
 0x37c   :  { %v2248_v14 = vpop.eup %2247  ;;  %v1621_v30 = vadd.f32 1.0, %v2246_v44  ;;  %v1563_v58 = vmul.f32 0.044715, %v1547_v42  ;;  %v1537_v56 = vmul.f32 %v3516_v23, %v3516_v23  ;;  %v840_v47 = vadd.f32 1.0, %v3476_v37  ;;  %v1511_v42 = vpop.f32.mrf.mxu0 }
 0x37d   :  { %2020 = vmatmul.mubr.bf16.gmra.mxu1 %v882_v9  ;;  %2261 = vtanh.f32 %v1592_v10  ;;  %v1550_v26 = vmul.f32 %v1534_v11, %v3507_v50  ;;  %v1548_v62 = vmul.f32 %v1532_v35, %v3510_v7  ;;  %v855_v52 = vmul.f32 0.5, %v839_v1 }
 0x37e   :  { %2094 = vmatpush3.bf16.msra.mxu1 %v3250_v43  ;;  %v2250_v3 = vpop.eup %2249  ;;  %v1597_v5 = vmul.f32 0.7978846, %v1581_v45  ;;  %v1579_v55 = vadd.f32 %v1563_v58, %v3497_v16  ;;  %v1553_v2 = vmul.f32 %v1537_v56, %v3516_v23  ;;  %v856_v39 = vmul.f32 0.5, %v840_v47 }
 0x37f   :  { %2087 = vmatprep.subr.bf16.mxu1 %v3257_v46  ;;  %v1622_v34 = vadd.f32 1.0, %v2248_v14  ;;  %v1566_v37 = vmul.f32 0.044715, %v1550_v26  ;;  %v1564_v49 = vmul.f32 0.044715, %v1548_v62  ;;  %v841_v59 = vadd.f32 1.0, %v3458_v28 }
 0x380   :  { %v1595_v31 = vmul.f32 0.7978846, %v1579_v55  ;;  %v1569_v53 = vmul.f32 0.044715, %v1553_v2  ;;  %v871_v44 = vmul.f32 %v855_v52, %v3346_v17  ;;  %v872_v43 = vmul.f32 %v856_v39, %v3361_v24 }
 0x381   :  { %v2252_v13 = vpop.eup %2251  ;;  %v1582_v29 = vadd.f32 %v1566_v37, %v3507_v50  ;;  %v1580_v48 = vadd.f32 %v1564_v49, %v3510_v7  ;;  %v842_v10 = vadd.f32 1.0, %v3472_v22  ;;  %v3540_v45 = vmul.f32 0.5, %v1621_v30 }
 0x382   :  { %2095 = vmatpush3.bf16.msra.mxu1 %v3257_v46  ;;  %2263 = vtanh.f32 %v1595_v31  ;;  %v1585_v28 = vadd.f32 %v1569_v53, %v3516_v23  ;;  %v883_v9 = vpack.c.bf16 %v872_v43, %v871_v44  ;;  %v857_v11 = vmul.f32 0.5, %v841_v59 }
 0x383   :  { %2088 = vmatprep.subr.bf16.mxu1 %v3264_v57  ;;  %2265 = vtanh.f32 %v1597_v5  ;;  %v1598_v17 = vmul.f32 0.7978846, %v1582_v29  ;;  %v1596_v24 = vmul.f32 0.7978846, %v1580_v48  ;;  %v1638_v1 = vmul.f32 0.5, %v1622_v34 }
 0x384   :  { %v2254_v35 = vpop.eup %2253  ;;  %v3544_v14 = vadd.f32 1.0, %v2252_v13  ;;  %2023 = vmatprep.mubr.bf16.mxu1 %v883_v9  ;;  %v858_v22 = vmul.f32 0.5, %v842_v10  ;;  %v3547_v46 = vadd.f32 %v3387_v21, %v1508_v4  ;;  %v1601_v58 = vmul.f32 0.7978846, %v1585_v28 }
 0x385   :  { %v2256_v30 = vpop.eup %2255  ;;  %2267 = vtanh.f32 %v1598_v17  ;;  %v3550_v56 = vadd.f32 %v2050_v51, %v3387_v21  ;;  %v3553_v47 = vadd.f32 %v3387_v21, %v1511_v42  ;;  %v873_v62 = vmul.f32 %v857_v11, %v3339_v40 }
 0x386   :  { %2096 = vmatpush3.bf16.msra.mxu1 %v3264_v57  ;;  %v2258_v26 = vpop.eup %2257  ;;  %2269 = vtanh.f32 %v1596_v24  ;;  %v874_v52 = vmul.f32 %v858_v22, %v3354_v61  ;;  %v1535_v4 = vmul.f32 %v3547_v46, %v3547_v46  ;;  %v1626_v5 = vadd.f32 1.0, %v2256_v30 }
 0x387   :  { %2089 = vmatprep.subr.bf16.mxu1 %v3269_v20  ;;  %v1538_v55 = vmul.f32 %v3550_v56, %v3550_v56  ;;  %v1536_v21 = vmul.f32 %v3553_v47, %v3553_v47  ;;  %v843_v57 = vadd.f32 1.0, %v3488_v63  ;;  %v2260_v2 = vpop.eup %2259  ;;  %v3567_v39 = vmul.f32 %v1638_v1, %v3417_v6 }
 0x388   :  { %v884_v40 = vpack.c.bf16 %v874_v52, %v873_v62  ;;  %v1551_v61 = vmul.f32 %v1535_v4, %v3547_v46  ;;  %v844_v51 = vadd.f32 1.0, %v2250_v3  ;;  %v845_v59 = vadd.f32 1.0, %v3484_v0 }
 0x389   :  { %v1554_v34 = vmul.f32 %v1538_v55, %v3550_v56  ;;  %v1552_v37 = vmul.f32 %v1536_v21, %v3553_v47  ;;  %v859_v49 = vmul.f32 0.5, %v843_v57  ;;  %2271 = vtanh.f32 %v1601_v58 }
 0x38a   :  { %2097 = vmatpush3.bf16.msra.mxu1 %v3269_v20  ;;  %v2262_v31 = vpop.eup %2261  ;;  %v1567_v63 = vmul.f32 0.044715, %v1551_v61  ;;  %v860_v53 = vmul.f32 0.5, %v844_v51  ;;  %v846_v6 = vadd.f32 1.0, %v3500_v32  ;;  %v1642_v44 = vmul.f32 0.5, %v1626_v5 }
 0x38b   :  { %2024 = vmatmul.mubr.bf16.gmra.mxu1 %v884_v40  ;;  %2090 = vmatprep.subr.bf16.mxu1 %v3277_v27  ;;  %v1570_v3 = vmul.f32 0.044715, %v1554_v34  ;;  %v1568_v43 = vmul.f32 0.044715, %v1552_v37  ;;  %v861_v13 = vmul.f32 0.5, %v845_v59  ;;  %v875_v48 = vmul.f32 %v859_v49, %v3371_v25 }
 0x38c   :  { %v1583_v29 = vadd.f32 %v1567_v63, %v3547_v46  ;;  %v876_v0 = vmul.f32 %v860_v53, %v3393_v54  ;;  %v862_v20 = vmul.f32 0.5, %v846_v6  ;;  %v1619_v32 = vadd.f32 1.0, %v2254_v35 }
 0x38d   :  { %v1586_v10 = vadd.f32 %v1570_v3, %v3550_v56  ;;  %v1584_v28 = vadd.f32 %v1568_v43, %v3553_v47  ;;  %v877_v9 = vmul.f32 %v861_v13, %v3367_v12  ;;  %v1620_v11 = vadd.f32 1.0, %v2258_v26 }
 0x38e   :  { %2098 = vmatpush3.bf16.msra.mxu1 %v3277_v27  ;;  %v1599_v42 = vmul.f32 0.7978846, %v1583_v29  ;;  %v885_v17 = vpack.c.bf16 %v876_v0, %v875_v48  ;;  %v878_v24 = vmul.f32 %v862_v20, %v3380_v33  ;;  %v1635_v30 = vmul.f32 0.5, %v1619_v32 }
 0x38f   :  { %v2264_v1 = vpop.eup %2263  ;;  %v1602_v22 = vmul.f32 0.7978846, %v1586_v10  ;;  %v1600_v25 = vmul.f32 0.7978846, %v1584_v28  ;;  %v1623_v54 = vadd.f32 1.0, %v2260_v2  ;;  %v1636_v52 = vmul.f32 0.5, %v1620_v11 }
 0x390   :  { %v2266_v58 = vpop.eup %2265  ;;  %2273 = vtanh.f32 %v1599_v42  ;;  %2027 = vmatprep.mubr.bf16.mxu1 %v885_v17  ;;  %v886_v62 = vpack.c.bf16 %v878_v24, %v877_v9  ;;  %v1624_v4 = vadd.f32 1.0, %v2262_v31  ;;  %v1641_v12 = vmul.f32 0.5, %v3544_v14 }
 0x391   :  { %2275 = vtanh.f32 %v1602_v22  ;;  %v1639_v27 = vmul.f32 0.5, %v1623_v54  ;;  %v1627_v35 = vadd.f32 1.0, %v2264_v1  ;;  %v1651_v33 = vmul.f32 %v1635_v30, %v3408_v38 }
 0x392   :  { %v2268_v5 = vpop.eup %2267  ;;  %2277 = vtanh.f32 %v1600_v25  ;;  %v1652_v26 = vmul.f32 %v1636_v52, %v3428_v19  ;;  %v1640_v55 = vmul.f32 0.5, %v1624_v4  ;;  %v1653_v57 = vmul.f32 %v3540_v45, %v3400_v41 }
 0x393   :  { %2028 = vmatmul.mubr.bf16.gmra.mxu1 %v886_v62  ;;  %v2270_v21 = vpop.eup %2269  ;;  %v1658_v2 = vmul.f32 %v1642_v44, %v3452_v8  ;;  %v1655_v40 = vmul.f32 %v1639_v27, %v3444_v18  ;;  %v1643_v14 = vmul.f32 0.5, %v1627_v35  ;;  %v1630_v37 = vadd.f32 1.0, %v2268_v5 }
 0x394   :  { %v1667_v61 = vpack.c.bf16 %v1652_v26, %v1651_v33  ;;  %v1656_v51 = vmul.f32 %v1640_v55, %v3456_v15  ;;  %v1628_v34 = vadd.f32 1.0, %v2270_v21  ;;  %v1668_v49 = vpack.c.bf16 %v3567_v39, %v1653_v57  ;;  %v2279_v26 = vld [vmem:[%s3795_s26 + $0x10] sm:$0xff] }
 0x395   :  { %v1657_v38 = vmul.f32 %v1641_v12, %v3433_v36  ;;  %v1629_v31 = vadd.f32 1.0, %v2266_v58  ;;  %v1659_v18 = vmul.f32 %v1643_v14, %v3497_v16  ;;  %v1646_v45 = vmul.f32 0.5, %v1630_v37  ;;  %v3619_v12 = vld [vmem:[%s3790_s16] ss:$0 sm:$0xff] }
 0x396   :  { %2067 = vmatprep.mubr.bf16.mxu0 %v1667_v61  ;;  %v1669_v19 = vpack.c.bf16 %v1656_v51, %v1655_v40  ;;  %v1644_v59 = vmul.f32 0.5, %v1628_v34  ;;  %v2272_v63 = vpop.eup %2271  ;;  %v2280_v61 = vld [vmem:[%s3795_s26] sm:$0xff] }
 0x397   :  { %2068 = vmatmul.mubr.bf16.vlgmr.msra.gmra.mxu0 %v1668_v49  ;;  %v1670_v41 = vpack.c.bf16 %v1658_v2, %v1657_v38  ;;  %v1645_v53 = vmul.f32 0.5, %v1629_v31  ;;  %v1662_v39 = vmul.f32 %v1646_v45, %v3507_v50  ;;  %v1633_v43 = vadd.f32 1.0, %v2272_v63 }
 0x398   :  { %2071 = vmatprep.mubr.bf16.mxu1 %v1669_v19  ;;  %v1660_v8 = vmul.f32 %v1644_v59, %v3510_v7  ;;  %v2281_v19 = vld [vmem:[%s3795_s26 + $0x30] sm:$0xff] }
 0x399   :  { %v1661_v44 = vmul.f32 %v1645_v53, %v3470_v60  ;;  %v1649_v10 = vmul.f32 0.5, %v1633_v43 }
 0x39a   :  { %v1671_v15 = vpack.c.bf16 %v1660_v8, %v1659_v18  ;;  %v2282_v18 = vld [vmem:[%s3795_s26 + $0x18] sm:$0xff] }
 0x39b   :  { %2072 = vmatmul.mubr.bf16.vlgmr.msra.gmra.mxu1 %v1670_v41  ;;  %v1672_v48 = vpack.c.bf16 %v1662_v39, %v1661_v44  ;;  %v1665_v60 = vmul.f32 %v1649_v10, %v3516_v23  ;;  %v3609_v23 = vld [vmem:[%s3789_s8] ss:$0 sm:$0xff] }
 0x39c   :  { %2075 = vmatprep.mubr.bf16.mxu1 %v1671_v15  ;;  %v2283_v39 = vld [vmem:[%s3795_s26 + $0x20] sm:$0xff] }
 0x39d   :  { %v2274_v36 = vpop.eup %2273 }
 0x39e   :  { %v2276_v6 = vpop.eup %2275  ;;  %v1631_v3 = vadd.f32 1.0, %v2274_v36 }
 0x39f   :  { %v2278_v13 = vpop.eup %2277  ;;  %v1634_v29 = vadd.f32 1.0, %v2276_v6 }
 0x3a0   :  { %v1632_v0 = vadd.f32 1.0, %v2278_v13  ;;  %v1647_v16 = vmul.f32 0.5, %v1631_v3  ;;  %v2284_v13 = vld [vmem:[%s3795_s26 + $0x8] sm:$0xff] }
 0x3a1   :  { %v1650_v20 = vmul.f32 0.5, %v1634_v29 }
 0x3a2   :  { %v1648_v7 = vmul.f32 0.5, %v1632_v0  ;;  %v1663_v28 = vmul.f32 %v1647_v16, %v3547_v46 }
 0x3a3   :  { %2076 = vmatmul.mubr.bf16.gmra.mxu1 %v1672_v48  ;;  %v1666_v50 = vmul.f32 %v1650_v20, %v3550_v56  ;;  %v2285_v20 = vld [vmem:[%s3795_s26 + $0x38] sm:$0xff] }
 0x3a4   :  { %v1664_v9 = vmul.f32 %v1648_v7, %v3553_v47 }
 0x3a5   :  { %v1674_v42 = vpack.c.bf16 %v1666_v50, %v1665_v60  ;;  %v2286_v60 = vld [vmem:[%s3795_s26 + $0x28] sm:$0xff] }
 0x3a6   :  { %v1673_v32 = vpack.c.bf16 %v1664_v9, %v1663_v28 }
 0x3a8   :  { %2079 = vmatprep.mubr.bf16.mxu1 %v1673_v32 }
 0x3ab   :  { %2080 = vmatmul.mubr.bf16.gmra.mxu1 %v1674_v42 }
 0x430   :  { %v2017_v17 = vpop.f32.mrf.mxu1 }
 0x431   :  { %v1001_v52 = vadd.f32 %v2017_v17, %v3609_v23 }
 0x432   :  { %v992_v24 = vpop.f32.mrf.mxu1 }
 0x433   :  { %v993_v27 = vadd.f32 %v3609_v23, %v992_v24  ;;  %v1057_v55 = vadd.f32 %v2279_v26, %v1001_v52  ;;  %v2288_v52 = vld [vmem:[%s3795_s26 + $0x40] sm:$0xff] }
 0x434   :  { %v2018_v11 = vpop.f32.mrf.mxu1 }
 0x435   :  { %v1004_v21 = vadd.f32 %v2018_v11, %v3609_v23  ;;  %v1055_v51 = vadd.f32 %v2280_v61, %v993_v27  ;;  %v2290_v61 = vld [vmem:[%s3795_s26 + $0x48] sm:$0xff] }
 0x436   :  { %v995_v1 = vpop.f32.mrf.mxu1 }
 0x437   :  { %v996_v34 = vadd.f32 %v3609_v23, %v995_v1  ;;  %v1058_v8 = vadd.f32 %v2282_v18, %v1004_v21 }
 0x439   :  { %v1056_v29 = vadd.f32 %v2284_v13, %v996_v34 }
 0x43d   :  { %v2021_v22 = vpop.f32.mrf.mxu1 }
 0x43e   :  { %v1017_v5 = vadd.f32 %v2021_v22, %v3609_v23  ;;  %v2287_v22 = vld [vmem:[%s3795_s26 + $0x50] sm:$0xff] }
 0x43f   :  { %v1008_v25 = vpop.f32.mrf.mxu1 }
 0x440   :  { %v1009_v40 = vadd.f32 %v3609_v23, %v1008_v25  ;;  %v1061_v59 = vadd.f32 %v2281_v19, %v1017_v5 }
 0x441   :  { %v2022_v30 = vpop.f32.mrf.mxu1 }
 0x442   :  { %v1020_v31 = vadd.f32 %v2022_v30, %v3609_v23  ;;  %v1059_v36 = vadd.f32 %v2283_v39, %v1009_v40 }
 0x443   :  { %v1011_v54 = vpop.f32.mrf.mxu1 }
 0x444   :  { %v1012_v6 = vadd.f32 %v3609_v23, %v1011_v54  ;;  %v1062_v7 = vadd.f32 %v2285_v20, %v1020_v31 }
 0x446   :  { %v1060_v42 = vadd.f32 %v2286_v60, %v1012_v6  ;;  %v2294_v6 = vld [vmem:[%s3795_s26 + $0x68] sm:$0xff] }
 0x44b   :  { %v2025_v58 = vpop.f32.mrf.mxu1 }
 0x44c   :  { %v1033_v10 = vadd.f32 %v2025_v58, %v3609_v23 }
 0x44d   :  { %v1024_v46 = vpop.f32.mrf.mxu1 }
 0x44e   :  { %v1025_v17 = vadd.f32 %v3609_v23, %v1024_v46  ;;  %v1065_v25 = vadd.f32 %v2287_v22, %v1033_v10 }
 0x44f   :  { %v3602_v62 = vpop.f32.mrf.mxu1 }
 0x450   :  { %v1036_v30 = vadd.f32 %v3602_v62, %v3609_v23  ;;  %v1063_v27 = vadd.f32 %v2288_v52, %v1025_v17 }
 0x451   :  { %v3604_v47 = vpop.f32.mrf.mxu1 }
 0x452   :  { %v1028_v5 = vadd.f32 %v3609_v23, %v3604_v47 }
 0x453   :  { %v3611_v56 = vpop.f32.mrf.mxu1 }
 0x455   :  { %v3614_v4 = vpop.f32.mrf.mxu1 }
 0x456   :  { %v1041_v34 = vadd.f32 %v3609_v23, %v3614_v4 }
 0x457   :  { %v3622_v35 = vpop.f32.mrf.mxu1  ;;  %v2069_v33 = vpop.f32.mrf.mxu0 }
 0x458   :  { %v1789_v2 = vadd.f32 %v2069_v33, %v3619_v12 }
 0x459   :  { %v3629_v57 = vpop.f32.mrf.mxu1  ;;  %v1780_v14 = vpop.f32.mrf.mxu0 }
 0x45a   :  { %v1845_v37 = vadd.f32 %v1789_v2, %v1057_v55  ;;  %v1781_v49 = vadd.f32 %v3619_v12, %v1780_v14  ;;  %v2289_v55 = vld [vmem:[%s3795_s26 + $0x58] sm:$0xff]  ;;  %v1049_v2 = vadd.f32 %v3611_v56, %v3609_v23 }
 0x45b   :  { %v2073_v38 = vpop.f32.mrf.mxu1  ;;  %v2070_v63 = vpop.f32.mrf.mxu0  ;;  %v1066_v21 = vadd.f32 %v2289_v55, %v1036_v30 }
 0x45c   :  { %v1805_v41 = vadd.f32 %v2073_v38, %v3619_v12  ;;  %1861 = vst.msk [vmem:[%s3791_s17 + $0x10] sm:$0xff] %vm75_vm0, %v1845_v37  ;;  %v1843_v45 = vadd.f32 %v1781_v49, %v1055_v51  ;;  %v1792_v15 = vadd.f32 %v2070_v63, %v3619_v12  ;;  %v1064_v51 = vadd.f32 %v2290_v61, %v1028_v5  ;;  %v2291_v38 = vld [vmem:[%s3795_s26 + $0x70] sm:$0xff] }
 0x45d   :  { %v1796_v53 = vpop.f32.mrf.mxu1  ;;  %v1783_v44 = vpop.f32.mrf.mxu0  ;;  %v1069_v19 = vadd.f32 %v2291_v38, %v1049_v2 }
 0x45e   :  { %v1849_v3 = vadd.f32 %v1805_v41, %v1061_v59  ;;  %v1797_v43 = vadd.f32 %v3619_v12, %v1796_v53  ;;  %1859 = vst.msk [vmem:[%s3791_s17] sm:$0xff] %vm75_vm0, %v1843_v45  ;;  %v1846_v48 = vadd.f32 %v1792_v15, %v1058_v8  ;;  %v1784_v0 = vadd.f32 %v3619_v12, %v1783_v44  ;;  %v2292_v41 = vld [vmem:[%s3795_s26 + $0x60] sm:$0xff]  ;;  %v2293_v53 = vld [vmem:[%s3795_s26 + $0x78] sm:$0xff] }
 0x45f   :  { %v2074_v16 = vpop.f32.mrf.mxu1  ;;  %v1052_v59 = vadd.f32 %v3622_v35, %v3609_v23  ;;  %v1067_v18 = vadd.f32 %v2292_v41, %v1041_v34  ;;  %v1044_v8 = vadd.f32 %v3609_v23, %v3629_v57 }
 0x460   :  { %1865 = vst.msk [vmem:[%s3791_s17 + $0x30] sm:$0xff] %vm75_vm0, %v1849_v3  ;;  %v1847_v28 = vadd.f32 %v1797_v43, %v1059_v36  ;;  %v1808_v9 = vadd.f32 %v2074_v16, %v3619_v12  ;;  %1862 = vst.msk [vmem:[%s3791_s17 + $0x18] sm:$0xff] %vm75_vm0, %v1846_v48  ;;  %v1844_v50 = vadd.f32 %v1784_v0, %v1056_v29 }
 0x461   :  { %v1799_v32 = vpop.f32.mrf.mxu1  ;;  %v1070_v39 = vadd.f32 %v2293_v53, %v1052_v59  ;;  %v1068_v44 = vadd.f32 %v2294_v6, %v1044_v8 }
 0x462   :  { %1863 = vst.msk [vmem:[%s3791_s17 + $0x20] sm:$0xff] %vm75_vm0, %v1847_v28  ;;  %v1850_v24 = vadd.f32 %v1808_v9, %v1062_v7  ;;  %v1800_v11 = vadd.f32 %v3619_v12, %v1799_v32  ;;  %1860 = vst.msk [vmem:[%s3791_s17 + $0x8] sm:$0xff] %vm75_vm0, %v1844_v50 }
 0x463   :  { %v2077_v1 = vpop.f32.mrf.mxu1 }
 0x464   :  { %1866 = vst.msk [vmem:[%s3791_s17 + $0x38] sm:$0xff] %vm75_vm0, %v1850_v24  ;;  %v1848_v54 = vadd.f32 %v1800_v11, %v1060_v42  ;;  %v1821_v58 = vadd.f32 %v2077_v1, %v3619_v12 }
 0x465   :  { %v1812_v46 = vpop.f32.mrf.mxu1 }
 0x466   :  { %1864 = vst.msk [vmem:[%s3791_s17 + $0x28] sm:$0xff] %vm75_vm0, %v1848_v54  ;;  %v1853_v62 = vadd.f32 %v1821_v58, %v1065_v25  ;;  %v1813_v33 = vadd.f32 %v3619_v12, %v1812_v46 }
 0x467   :  { %v2078_v26 = vpop.f32.mrf.mxu1 }
 0x468   :  { %1869 = vst.msk [vmem:[%s3791_s17 + $0x50] sm:$0xff] %vm75_vm0, %v1853_v62  ;;  %v1851_v47 = vadd.f32 %v1813_v33, %v1063_v27  ;;  %v1824_v40 = vadd.f32 %v2078_v26, %v3619_v12 }
 0x469   :  { %v1815_v14 = vpop.f32.mrf.mxu1 }
 0x46a   :  { %1867 = vst.msk [vmem:[%s3791_s17 + $0x40] sm:$0xff] %vm75_vm0, %v1851_v47  ;;  %v1854_v56 = vadd.f32 %v1824_v40, %v1066_v21  ;;  %v1816_v37 = vadd.f32 %v3619_v12, %v1815_v14 }
 0x46b   :  { %v2081_v49 = vpop.f32.mrf.mxu1 }
 0x46c   :  { %1870 = vst.msk [vmem:[%s3791_s17 + $0x58] sm:$0xff] %vm75_vm0, %v1854_v56  ;;  %v1852_v4 = vadd.f32 %v1816_v37, %v1064_v51  ;;  %v1837_v31 = vadd.f32 %v2081_v49, %v3619_v12 }
 0x46d   :  { %v1828_v63 = vpop.f32.mrf.mxu1 }
 0x46e   :  { %1868 = vst.msk [vmem:[%s3791_s17 + $0x48] sm:$0xff] %vm75_vm0, %v1852_v4  ;;  %v1857_v35 = vadd.f32 %v1837_v31, %v1069_v19  ;;  %v1829_v45 = vadd.f32 %v3619_v12, %v1828_v63 }
 0x46f   :  { %v2082_v15 = vpop.f32.mrf.mxu1 }
 0x470   :  { %1873 = vst.msk [vmem:[%s3791_s17 + $0x70] sm:$0xff] %vm75_vm0, %v1857_v35  ;;  %v1855_v23 = vadd.f32 %v1829_v45, %v1067_v18  ;;  %v1840_v57 = vadd.f32 %v2082_v15, %v3619_v12 }
 0x471   :  { %v1831_v36 = vpop.f32.mrf.mxu1 }
 0x472   :  { %1871 = vst.msk [vmem:[%s3791_s17 + $0x60] sm:$0xff] %vm75_vm0, %v1855_v23  ;;  %v1858_v3 = vadd.f32 %v1840_v57, %v1070_v39  ;;  %v1832_v43 = vadd.f32 %v3619_v12, %v1831_v36 }
 0x474   :  { %1874 = vst.msk [vmem:[%s3791_s17 + $0x78] sm:$0xff] %vm75_vm0, %v1858_v3  ;;  %v1856_v13 = vadd.f32 %v1832_v43, %v1068_v44 }
 0x476   :  { %1872 = vst.msk [vmem:[%s3791_s17 + $0x68] sm:$0xff] %vm75_vm0, %v1856_v13 }

// kernel: _forward_impl.2
= control target key start
LH: loop header
LB: loop body
LE: loop exit
PB: predicated region body
PF: predicated region fallthrough
CT: control target
= control target key end

     0   :  { %s4338_s0 = inlined_call_operand.hbm [shape: f32[2,8,32], index: 0, kind: input, shape index: {}]   ;;  %s4339_s1 = inlined_call_operand.vmem [shape: f32[1,32], index: 1, kind: input, shape index: {}]   ;;  %s4340_s2 = inlined_call_operand.hbm [shape: f32[1,32], index: 2, kind: input, shape index: {}]   ;;  %s4341_s3 = inlined_call_operand.hbm [shape: bf16[32,96], index: 3, kind: input, shape index: {}]   ;;  %s4342_s4 = inlined_call_operand.hbm [shape: bf16[32,32], index: 4, kind: input, shape index: {}]   ;;  %s4343_s5 = inlined_call_operand.vmem [shape: f32[1,32], index: 5, kind: input, shape index: {}]   ;;  %s4344_s6 = inlined_call_operand.hbm [shape: f32[1,32], index: 6, kind: input, shape index: {}]   ;;  %s4345_s7 = inlined_call_operand.hbm [shape: f32[1,32], index: 7, kind: input, shape index: {}]   ;;  %s4346_s8 = inlined_call_operand.vmem [shape: bf16[32,96], index: 8, kind: input, shape index: {}]   ;;  %s4347_s9 = inlined_call_operand.hbm [shape: bf16[32,32], index: 9, kind: input, shape index: {}]   ;;  %s4348_s10 = inlined_call_operand.hbm [shape: f32[1,32], index: 10, kind: input, shape index: {}]   ;;  %s4349_s11 = inlined_call_operand.vmem [shape: f32[2,8,32], index: 11, kind: output, shape index: {}]  }
   0x1   :  { %4356 = sst [smem:[#allocation20_spill]] %s4340_s2 }
   0x2   :  { %4357 = sst [smem:[#allocation21_spill]] %s4341_s3 }
   0x3   :  { %16 = vsyncpa [#allocation3], 0 }
   0x4   :  { %18 = vsyncpa [#allocation3 + $0x1], 0 }
   0x5   :  { %19 = vsyncpa [#allocation5], 0 }
   0x6   :  { %20 = vsyncpa [#allocation8], 0 }
   0x7   :  { %21 = vsyncpa [#allocation11], 0 }
   0x8   :  { %22 = vsyncpa [#allocation14], 0  ;;  %s3737_s17 = smov 0   ;;  %s3739_s18 = smov 0  }
   0x9   :  { %s3741_s19 = smov 0   ;;  %s3743_s20 = smov 0  }
   0xa LB: > { %s3655_s21 = smov [#allocation4]   ;;  %s3758_s23 = sadd.s32 4294967295, %s3653_s20   ;;  %s3653_s20 = sphi %s3743_s20, %s4380_s20   ;;  %s3649_s19 = sphi %s3741_s19, %s4379_s19   ;;  %s3645_s18 = sphi %s3739_s18, %s4378_s18   ;;  %s3641_s17 = sphi %s3737_s17, %s4377_s17  }
   0xb   : > { %s311_s22 = sshll.u32 %s3655_s21, 4  ;;  %p2981_p0 = scmp.ge.s32.totalorder %s3653_s20, 1  ;;  %s312_s22 = int_to_ptr.vmem [resolvable:$true] %s311_s22 }
   0xc   : > { %p4353_p1 = scmp.eq.s32.totalorder %s3758_s23, 0  ;;  %p295_p2 = scmp.lt.s32.totalorder %s3653_s20, 3 }
   0xd   : > { %s3656_s25 = smov [#allocation7]   ;;  %s3657_s28 = smov [#allocation10]  }
   0xe   : > { %p3763_p3 = pnand %p2981_p0, %p295_p2  ;;  %s334_s26 = sshll.u32 %s3656_s25, 4  ;;  %s3775_s26 = int_to_ptr.vmem [resolvable:$true] %s334_s26 }
   0xf   : > { %s362_s29 = sshll.u32 %s3657_s28, 4  ;;  %s3404_s12 = scalar_lea.vmem %s312_s22, 16  ;;  %s3777_s29 = int_to_ptr.vmem [resolvable:$true] %s362_s29 }
  0x10   : > { %s4358_s24 = scalar_select %p3763_p3, 1, 0 }
  0x11   : > { %p3256_p4 = pneg %p3763_p3  ;;  %p3405_p7 = scmp.ne.s32.totalorder %s312_s22, %s3404_s12 }
  0x12   : > { %s3411_s13 = scalar_lea.vmem %s312_s22, 32  ;;  %p3412_p10 = scmp.lt.s32.totalorder %s312_s22, %s312_s22 }
  0x13   : > { %p3771_p5 = pnand %p3256_p4, %p4353_p1  ;;  %p3413_p11 = scmp.lt.s32.totalorder %s3411_s13, %s3404_s12 }
  0x15   : > { %p3781_p6 = pneg %p3771_p5  ;;  %p3414_p12 = por %p3413_p11, %p3412_p10 }
  0x17   : > { %p3407_p8 = pnand %p3405_p7, %p3781_p6 }
  0x19   : > { %p3408_p9 = pneg %p3407_p8 }
  0x1b   : > { %p3415_p13 = pnand %p3414_p12, %p3408_p9 }
  0x1d   : > { %3418 = shalt.err (!%p3415_p13)
}
  0x1e   : > { %s4361_s2 = sld [smem:[#allocation20_spill]]  ;;  %s3430_s16 = scalar_lea.vmem %s3775_s26, 256 }
  0x1f   : > { %p3431_p0 = scmp.ne.s32.totalorder %s3775_s26, %s3430_s16  ;;  %p3438_p7 = scmp.lt.s32.totalorder %s3775_s26, %s3775_s26 }
  0x20   : > { %p3439_p8 = scmp.lt.s32.totalorder %s3430_s16, %s3430_s16 }
  0x21   : > { %p3433_p2 = pnand %p3431_p0, %p3781_p6 }
  0x22   : > { %p3440_p9 = por %p3439_p8, %p3438_p7 }
  0x23   : > { %p3434_p4 = pneg %p3433_p2 }
  0x24   : > { %3259 = dma.hbm_to_vmem [thread:$0]  (!%p3771_p5), %s4361_s2, 16, %s312_s22, [#allocation5]  }
  0x25   : > { %p3441_p10 = pnand %p3440_p9, %p3434_p4 }
  0x27   : > { %3444 = shalt.err (!%p3441_p10)
}
  0x28   : > { %s4350_s21 = smov 64   ;;  %s4352_s22 = smov 4  }
  0x29   : > { %3265 = dma.hbm_to_vmem [thread:$0]  (!%p3771_p5), %s4342_s4, 256, %s3775_s26, [#allocation8], %s4350_s21, %s4350_s21, %s4352_s22  }
  0x2a   : > { %s3456_s12 = scalar_lea.vmem %s3777_s29, 16  ;;  %s3463_s13 = scalar_lea.vmem %s3777_s29, 32 }
  0x2b   : > { %p3457_p11 = scmp.ne.s32.totalorder %s3777_s29, %s3456_s12  ;;  %p3464_p0 = scmp.lt.s32.totalorder %s3777_s29, %s3777_s29 }
  0x2c   : > { %p3465_p2 = scmp.lt.s32.totalorder %s3463_s13, %s3456_s12 }
  0x2d   : > { %p3459_p12 = pnand %p3457_p11, %p3781_p6 }
  0x2e   : > { %p3466_p4 = por %p3465_p2, %p3464_p0 }
  0x2f   : > { %p3460_p13 = pneg %p3459_p12 }
  0x31   : > { %p3467_p7 = pnand %p3466_p4, %p3460_p13 }
  0x33   : > { %3470 = shalt.err (!%p3467_p7)
}
  0x34   : > { %3271 = dma.hbm_to_vmem [thread:$0]  (!%p3771_p5), %s4345_s7, 16, %s3777_s29, [#allocation11]  }
  0x35   : > { %s3660_s26 = smov [#allocation6]   ;;  %s3661_s25 = smov [#allocation9]  }
  0x36   : > { %s321_s16 = sshll.u32 %s3660_s26, 4  ;;  %s351_s28 = sshll.u32 %s3661_s25, 4  ;;  %s322_s16 = int_to_ptr.vmem [resolvable:$true] %s321_s16  ;;  %s352_s28 = int_to_ptr.vmem [resolvable:$true] %s351_s28 }
  0x37   : > { %s3482_s21 = scalar_lea.vmem %s322_s16, 256  ;;  %p3490_p11 = scmp.lt.s32.totalorder %s322_s16, %s322_s16 }
  0x38   : > { %p3483_p8 = scmp.ne.s32.totalorder %s322_s16, %s3482_s21  ;;  %p3491_p12 = scmp.lt.s32.totalorder %s3482_s21, %s3482_s21 }
  0x3a   : > { %p3485_p9 = pnand %p3483_p8, %p3781_p6  ;;  %p3492_p13 = por %p3491_p12, %p3490_p11 }
  0x3c   : > { %p3486_p10 = pneg %p3485_p9 }
  0x3e   : > { %p3493_p0 = pnand %p3492_p13, %p3486_p10 }
  0x40   : > { %3496 = shalt.err (!%p3493_p0)
}
  0x41   : > { %s4362_s12 = smov 64   ;;  %s4363_s3 = sld [smem:[#allocation21_spill]] }
  0x42   : > { %s3508_s14 = scalar_lea.vmem %s352_s28, 16  ;;  %s3515_s21 = scalar_lea.vmem %s352_s28, 32 }
  0x43   : > { %p3509_p2 = scmp.ne.s32.totalorder %s352_s28, %s3508_s14  ;;  %p3516_p8 = scmp.lt.s32.totalorder %s352_s28, %s352_s28 }
  0x44   : > { %p3517_p9 = scmp.lt.s32.totalorder %s3515_s21, %s3508_s14 }
  0x45   : > { %p3511_p4 = pnand %p3509_p2, %p3781_p6 }
  0x46   : > { %p3518_p10 = por %p3517_p9, %p3516_p8 }
  0x47   : > { %3262 = dma.hbm_to_vmem [thread:$0]  (!%p3771_p5), %s4363_s3, 256, %s322_s16, [#allocation5], %s4362_s12, %s4362_s12, %s4352_s22  }
  0x48   : > { %p3512_p7 = pneg %p3511_p4 }
  0x4a   : > { %p3519_p11 = pnand %p3518_p10, %p3512_p7 }
  0x4c   : > { %3522 = shalt.err (!%p3519_p11)
}
  0x4d   : > { %3268 = dma.hbm_to_vmem [thread:$0]  (!%p3771_p5), %s4344_s6, 16, %s352_s28, [#allocation8]  }
  0x4e   : > { %s3662_s16 = smov [#allocation12]   ;;  %s3663_s29 = smov [#allocation13]  }
  0x4f   : > { %s375_s25 = sshll.u32 %s3662_s16, 4  ;;  %s389_s13 = sshll.u32 %s3663_s29, 4  ;;  %s376_s25 = int_to_ptr.vmem [resolvable:$true] %s375_s25  ;;  %s390_s13 = int_to_ptr.vmem [resolvable:$true] %s389_s13 }
  0x50   : > { %s3534_s22 = scalar_lea.vmem %s376_s25, 256  ;;  %p3542_p2 = scmp.lt.s32.totalorder %s376_s25, %s376_s25 }
  0x51   : > { %p3535_p12 = scmp.ne.s32.totalorder %s376_s25, %s3534_s22  ;;  %p3543_p4 = scmp.lt.s32.totalorder %s3534_s22, %s3534_s22 }
  0x53   : > { %p3537_p13 = pnand %p3535_p12, %p3781_p6  ;;  %p3544_p7 = por %p3543_p4, %p3542_p2 }
  0x55   : > { %p3538_p0 = pneg %p3537_p13 }
  0x57   : > { %p3545_p8 = pnand %p3544_p7, %p3538_p0 }
  0x59   : > { %3548 = shalt.err (!%p3545_p8)
}
  0x5a   : > { %s4364_s14 = smov 4   ;;  %s3560_s15 = scalar_lea.vmem %s390_s13, 16 }
  0x5b   : > { %3274 = dma.hbm_to_vmem [thread:$0]  (!%p3771_p5), %s4347_s9, 256, %s376_s25, [#allocation11], %s4362_s12, %s4362_s12, %s4364_s14  }
  0x5c   : > { %p3561_p9 = scmp.ne.s32.totalorder %s390_s13, %s3560_s15  ;;  %s3567_s22 = scalar_lea.vmem %s390_s13, 32 }
  0x5d   : > { %p3568_p12 = scmp.lt.s32.totalorder %s390_s13, %s390_s13  ;;  %p3569_p13 = scmp.lt.s32.totalorder %s3567_s22, %s3560_s15 }
  0x5e   : > { %p3563_p10 = pnand %p3561_p9, %p3781_p6 }
  0x5f   : > { %p3570_p0 = por %p3569_p13, %p3568_p12 }
  0x60   : > { %p3564_p11 = pneg %p3563_p10 }
  0x62   : > { %p3571_p2 = pnand %p3570_p0, %p3564_p11 }
  0x64   : > { %3574 = shalt.err (!%p3571_p2)
}
  0x65   : > { %3277 = dma.hbm_to_vmem [thread:$0]  (!%p3771_p5), %s4348_s10, 16, %s390_s13, [#allocation14]  }
  0x66   : > { %s3855_s30 = sadd.s32 1, %s3653_s20   ;;  %s35_s12 = sadd.s32 1, %s3649_s19 }
  0x67   : > { %s32_s27 = ssub.s32 %s3653_s20, %s3855_s30  ;;  %p42_p4 = scmp.ne.s32.totalorder %s3649_s19, %s3645_s18 }
  0x68   : > { %p33_p6 = scmp.eq.s32.totalorder %s32_s27, 0  ;;  %p43_p7 = scmp.eq.s32.totalorder %s3653_s20, 0 }
  0x69   : > { %p48_p8 = scmp.ne.s32.totalorder %s3645_s18, %s3641_s17  ;;  %p3289_p11 = scmp.lt.s32.totalorder %s3653_s20, 2 }
  0x6a   : > { %s3866_s25 = scalar_select %p33_p6, %s3649_s19, %s35_s12  }
  0x6b   : > { %p44_p9 = por %p43_p7, %p42_p4  ;;  %p3870_p10 = por %p4353_p1, %p48_p8 }
  0x6c   : > { %s400_s14 = sand.u32 1, %s3649_s19   ;;  %s2991_s28 = sshll.u32 %s3653_s20, 7 }
  0x6d   : > { %s4365_s29 = scalar_select %p3870_p10, 1, 0 }
  0x6e   : > { %s2990_s13 = sshll.u32 %s400_s14, 3  ;;  %s3880_s22 = scalar_lea.hbm %s4338_s0, %s2991_s28 }
  0x6f   : > { %s404_s17 = scalar_lea.vmem [#allocation2], %s2990_s13  ;;  %p3882_p5 = pnand %p3289_p11, %p44_p9 }
  0x70   : > { %s411_s26 = sshll.u32 %s404_s17, 4  ;;  %s401_s27 = scalar_lea.sflag [#allocation3], %s400_s14  ;;  %s412_s26 = int_to_ptr.vmem [resolvable:$true] %s411_s26 }
  0x71   : > { %s3575_s12 = scalar_lea.hbm %s3880_s22, 128  ;;  %p3577_p13 = pneg %p3882_p5 }
  0x72   : > { %p3576_p12 = scmp.ne.s32.totalorder %s3880_s22, %s3575_s12  ;;  %s3580_s21 = scalar_lea.hbm %s4338_s0, 256 }
  0x73   : > { %p3581_p6 = scmp.lt.s32.totalorder %s3880_s22, %s4338_s0  ;;  %p3582_p4 = scmp.lt.s32.totalorder %s3580_s21, %s3575_s12 }
  0x74   : > { %p3578_p0 = pnand %p3577_p13, %p3576_p12 }
  0x75   : > { %p3583_p7 = por %p3582_p4, %p3581_p6 }
  0x76   : > { %p3579_p2 = pneg %p3578_p0 }
  0x78   : > { %p3584_p8 = pnand %p3583_p7, %p3579_p2 }
  0x7a   : > { %3587 = shalt.err (!%p3584_p8)
}
  0x7b   : > { %s3588_s17 = scalar_lea.vmem %s412_s26, 128  ;;  %s3664_s14 = smov [#allocation2]  }
  0x7c   : > { %p3589_p9 = scmp.ne.s32.totalorder %s412_s26, %s3588_s17  ;;  %s3593_s2 = sshll.u32 %s3664_s14, 4  ;;  %s3594_s2 = int_to_ptr.vmem [resolvable:$false] %s3593_s2 }
  0x7d   : > { %s3595_s3 = scalar_lea.vmem %s3594_s2, 256  ;;  %p3596_p12 = scmp.lt.s32.totalorder %s412_s26, %s3594_s2 }
  0x7e   : > { %p3591_p11 = pnand %p3589_p9, %p3577_p13  ;;  %p3597_p0 = scmp.lt.s32.totalorder %s3595_s3, %s3588_s17 }
  0x80   : > { %p3592_p1 = pneg %p3591_p11  ;;  %p3598_p10 = por %p3597_p0, %p3596_p12 }
  0x82   : > { %p3599_p3 = pnand %p3598_p10, %p3592_p1 }
  0x84   : > { %3602 = shalt.err (!%p3599_p3)
}
  0x85   : > { %3281 = dma.hbm_to_vmem [thread:$0]  (!%p3882_p5), %s3880_s22, 128, %s412_s26, %s401_s27  }
  0x86   : > { %p4367_p2 = scmp.ne.s32.totalorder %s4358_s24, 0 }
  0x87   : > { %s422_s12 = sand.u32 (!%p4367_p2), 1, %s3645_s18   ;;  %p4368_p13 = scmp.ne.s32.totalorder (!%p4367_p2), %s4365_s29, 0 }
  0x88   : > { %420 = sbr.rel (%p4367_p2) target bundleno = 3043 (0xbe3), region = 64  ;;  %s3903_s20 = sshll.u32 (!%p4367_p2), %s422_s12, 3 }
  0x89   : > { %s423_s28 = scalar_lea.sflag (!%p4367_p2), [#allocation3], %s422_s12  ;;  %s426_s21 = scalar_lea.vmem (!%p4367_p2), [#allocation2], %s3903_s20 }
  0x8d   : > { %3620 = dma.done.wait (%p4368_p13), %s423_s28, 128  }
  0x8e   : > { %3622 = vsyncadd (%p4368_p13), %s423_s28, 4294967168  ;;  %p4369_p1 = scmp.eq.s32.totalorder %s3758_s23, 0 }
  0x90   : > { %3624 = dma.done.wait (%p4369_p1), [#allocation5], 272   ;;  %p4370_p3 = pmov %p4369_p1 }
  0x91   : > { %p4371_p10 = pmov %p4369_p1 }
  0x92   : > { %3626 = vsyncadd (%p4370_p3), [#allocation5], 4294967024 }
  0x93   : > { %3628 = dma.done.wait (%p4371_p10), [#allocation8], 272   ;;  %p4372_p5 = pmov %p4369_p1 }
  0x94   : > { %p4373_p6 = pmov %p4369_p1 }
  0x95   : > { %3630 = vsyncadd (%p4372_p5), [#allocation8], 4294967024 }
  0x96   : > { %3632 = dma.done.wait (%p4373_p6), [#allocation11], 272   ;;  %p4374_p4 = pmov %p4369_p1 }
  0x97   : > { %p4375_p7 = pmov %p4369_p1 }
  0x98   : > { %3634 = vsyncadd (%p4374_p4), [#allocation11], 4294967024 }
  0x99   : > { %3636 = dma.done.wait (%p4375_p7), [#allocation14], 16   ;;  %p4376_p8 = pmov %p4369_p1 }
  0x9a   : > { %vm500_vm0 = vcmask 261120   ;;  %v497_v0 = vld [vmem:[%s426_s21] sm:$0xff]  ;;  %v3665_v8 = vmov 0.0   ;;  %vm3666_vm1 = vmmov 0   ;;  %v3351_v9 = vld [vmem:[#allocation6] sm:$0xff]   ;;  %s3667_s24 = smov 104   ;;  %v604_v29 = vlaneseq }
  0x9b   : > { %3638 = vsyncadd (%p4376_p8), [#allocation14], 4294967280  ;;  %v501_v1 = vsel %vm500_vm0, %v497_v0, 0.0  ;;  %v3350_v7 = vld [vmem:[#allocation6 + $0x8] sm:$0xff]   ;;  %3098 = vmatprep.subr.bf16.mxu0 %v3665_v8  ;;  %3102 = vmatprep.mubr.msk.bf16.mxu0 %vm3666_vm1, %v3665_v8  ;;  %v3003_v16 = vld [vmem:[#allocation4] ss:$0 sm:$0xff] }
  0x9c   : > { %502 = vadd.xlane.f32.xlu0 %v501_v1  ;;  %3099 = vmatpush3.bf16.msra.mxu0 %v3350_v7  ;;  %v3002_v14 = vld [vmem:[%s4339_s1] ss:$0 sm:$0xff]  ;;  %s3668_s29 = smov 120   ;;  %s3669_s22 = smov 112   ;;  %v3671_v27 = vmov 1983009808  }
  0x9d   : > { %3106 = vmatprep.subr.bf16.mxu1 %v3665_v8  ;;  %3100 = vmatprep.subr.bf16.mxu0 %v3665_v8  ;;  %s3670_s26 = smov 96   ;;  %v602_v28 = vunpack.c.l.s4 %v3671_v27  ;;  %v605_v31 = vshrl.u32 %v604_v29, 7  ;;  %v3672_v33 = vmov 1934713408   ;;  %vm1039_vm2 = vcmask 64512   ;;  %s3673_s16 = smov 64  }
  0x9e   : > { %3108 = vmatprep.mubr.msk.bf16.mxu1 %vm3666_vm1, %v3665_v8  ;;  %v634_v34 = vunpack.c.l.s4 %v3672_v33  ;;  %vm1279_vm3 = vcmask 1043456   ;;  %s3674_s14 = smov 8   ;;  %s3675_s12 = smov 24   ;;  %vm1610_vm4 = vcmask 130048   ;;  %vm1612_vm5 = vcmask 195584  }
  0x9f   : > { %v603_v30 = vunpack.c.0.s8 %v602_v28  ;;  %s3676_s28 = smov 16   ;;  %p492_p9 = scmp.lt.s32.totalorder %s3758_s23, 1 }
  0xa0   : > { %3101 = vmatpush3.bf16.msra.mxu0 %v3351_v9  ;;  %v635_v41 = vunpack.c.0.s8 %v634_v34 }
  0xa1   : > { %3112 = vmatprep.subr.bf16.mxu0 %v3665_v8  ;;  %v3973_v37 = vsub.s32 %v603_v30, %v605_v31  ;;  %s4382_s23 = smov (!%p492_p9, %s3758_s23), 1 }
  0xa2   : > { %v3983_v47 = vsub.s32 %v635_v41, %v605_v31 }
 0x125   : > { %v503_v2 = vpop.xlane.xlu0 %502 }
 0x126   : > { %v505_v3 = vmul.f32 0.03125, %v503_v2 }
 0x128   : > { %v506_v4 = vsub.f32 %v497_v0, %v505_v3 }
 0x12a   : > { %v507_v5 = vmul.f32 %v506_v4, %v506_v4 }
 0x12c   : > { %v508_v6 = vsel %vm500_vm0, %v507_v5, 0.0 }
 0x12d   : > { %509 = vadd.xlane.f32.xlu0 %v508_v6 }
 0x1b6   : > { %v510_v10 = vpop.xlane.xlu0 %509 }
 0x1b7   : > { %v511_v11 = vmul.f32 0.03125, %v510_v10 }
 0x1b9   : > { %v512_v12 = vadd.f32 1e-05, %v511_v11 }
 0x1bb   : > { %3358 = vrsqrt.f32 %v512_v12 }
 0x1c8   : > { %v3359_v13 = vpop.eup %3358 }
 0x1c9   : > { %v3941_v15 = vmul.f32 %v3359_v13, %v506_v4 }
 0x1cb   : > { %v521_v17 = vmul.f32 %v3002_v14, %v3941_v15 }
 0x1cd   : > { %v528_v18 = vadd.f32 %v3003_v16, %v521_v17 }
 0x1cf   : > { %v529_v19 = vpack.c.bf16 %v528_v18, %v528_v18 }
 0x1d1   : > { %3103 = vmatmul.mubr.msk.bf16.vlgmr.msra.gmra.mxu0 %vm500_vm0, %v529_v19 }
 0x1d2   : > { %3114 = vmatprep.mubr.msk.bf16.mxu0 %vm3666_vm1, %v3665_v8 }
 0x291   : > { %v3947_v20 = vpop.f32.mrf.mxu0 }
 0x292   : > { %596 = vrot.lane.b32.xlu0 %v3947_v20, %s3667_s24  ;;  %590 = vrot.lane.b32.xlu1 %v3947_v20, %s3668_s29 }
 0x293   : > { %v3104_v21 = vpop.f32.mrf.mxu0 }
 0x295   : > { %v586_v22 = vpop.f32.mrf.mxu0 }
 0x296   : > { %593 = vrot.lane.b32.xlu1 %v3947_v20, %s3669_s22 }
 0x297   : > { %v3105_v23 = vpop.f32.mrf.mxu0 }
 0x29a   : > { %735 = vrot.lane.b32.xlu1 %v3947_v20, %s3670_s26 }
 0x304   : > { %v3957_v24 = vpop.permute.xlu1 %590  ;;  %v3965_v26 = vpop.permute.xlu0 %596 }
 0x305   : > { %737 = vrot.lane.b32.xlu1 %v3957_v24, %s3670_s26  ;;  %v615_v38 = vcombine.low %v3957_v24, %v3965_v26  ;;  %v616_v39 = vcombine.high %v3957_v24, %v3965_v26 }
 0x307   : > { %v623_v44 = vrot.slane %v615_v38, %v3973_v37  ;;  %v630_v45 = vrot.slane %v616_v39, %v3973_v37 }
 0x308   : > { %v3961_v25 = vpop.permute.xlu1 %593 }
 0x309   : > { %739 = vrot.lane.b32.xlu1 %v3961_v25, %s3670_s26  ;;  %v599_v35 = vcombine.low %v3947_v20, %v3961_v25  ;;  %v600_v36 = vcombine.high %v3947_v20, %v3961_v25 }
 0x30b   : > { %v607_v42 = vrot.slane %v599_v35, %v3973_v37  ;;  %v614_v43 = vrot.slane %v600_v36, %v3973_v37 }
 0x30c   : > { %v736_v32 = vpop.permute.xlu1 %735 }
 0x30d   : > { %741 = vrot.lane.b32.xlu1 %v3965_v26, %s3670_s26  ;;  %v631_v48 = vcombine.low %v607_v42, %v623_v44  ;;  %v632_v49 = vcombine.high %v607_v42, %v623_v44  ;;  %v647_v50 = vcombine.low %v614_v43, %v630_v45  ;;  %v648_v51 = vcombine.high %v614_v43, %v630_v45 }
 0x30f   : > { %v639_v57 = vrot.slane %v631_v48, %v3983_v47  ;;  %v646_v58 = vrot.slane %v632_v49, %v3983_v47  ;;  %v655_v59 = vrot.slane %v647_v50, %v3983_v47  ;;  %v662_v60 = vrot.slane %v648_v51, %v3983_v47 }
 0x311   : > { %v667_v5 = vcombine.low %v639_v57, %v646_v58  ;;  %v3007_v6 = vcombine.high %v639_v57, %v646_v58  ;;  %v683_v7 = vcombine.low %v655_v59, %v662_v60  ;;  %v3008_v9 = vcombine.high %v655_v59, %v662_v60 }
 0x313   : > { %v674_v19 = vrot.slane %v667_v5, %v3973_v37  ;;  %v682_v21 = vrot.slane %v3007_v6, %v3973_v37  ;;  %v690_v22 = vrot.slane %v683_v7, %v3973_v37  ;;  %v698_v23 = vrot.slane %v3008_v9, %v3973_v37 }
 0x315   : > { %v699_v38 = vcombine.low %v674_v19, %v682_v21  ;;  %v715_v39 = vcombine.low %v690_v22, %v698_v23 }
 0x317   : > { %v723_v48 = vrot.slane %v715_v39, %v3983_v47 }
 0x377   : > { %v738_v40 = vpop.permute.xlu1 %737 }
 0x37b   : > { %v740_v46 = vpop.permute.xlu1 %739 }
 0x37c   : > { %v747_v52 = vcombine.low %v736_v32, %v740_v46  ;;  %v748_v53 = vcombine.high %v736_v32, %v740_v46  ;;  %v707_v46 = vrot.slane %v699_v38, %v3983_v47 }
 0x37e   : > { %v755_v61 = vrot.slane %v747_v52, %v3973_v37  ;;  %v762_v62 = vrot.slane %v748_v53, %v3973_v37  ;;  %v700_v53 = vcombine.high %v674_v19, %v682_v21 }
 0x37f   : > { %v742_v54 = vpop.permute.xlu1 %741 }
 0x380   : > { %v763_v55 = vcombine.low %v738_v40, %v742_v54  ;;  %v764_v56 = vcombine.high %v738_v40, %v742_v54  ;;  %v716_v54 = vcombine.high %v690_v22, %v698_v23 }
 0x382   : > { %v771_v63 = vrot.slane %v763_v55, %v3973_v37  ;;  %v778_v0 = vrot.slane %v764_v56, %v3973_v37  ;;  %v731_v55 = vcombine.low %v707_v46, %v723_v48  ;;  %v732_v56 = vcombine.high %v707_v46, %v723_v48 }
 0x384   : > { %v779_v1 = vcombine.low %v755_v61, %v771_v63  ;;  %v780_v2 = vcombine.high %v755_v61, %v771_v63  ;;  %v795_v3 = vcombine.low %v762_v62, %v778_v0  ;;  %v796_v4 = vcombine.high %v762_v62, %v778_v0 }
 0x385   : > { %v1031_v59 = vpack.c.bf16 %v731_v55, %v731_v55  ;;  %v1032_v60 = vpack.c.bf16 %v732_v56, %v732_v56  ;;  %v714_v61 = vrot.slane %v700_v53, %v3983_v47  ;;  %v730_v62 = vrot.slane %v716_v54, %v3983_v47 }
 0x386   : > { %v787_v10 = vrot.slane %v779_v1, %v3983_v47  ;;  %v794_v11 = vrot.slane %v780_v2, %v3983_v47  ;;  %v803_v12 = vrot.slane %v795_v3, %v3983_v47  ;;  %v810_v13 = vrot.slane %v796_v4, %v3983_v47 }
 0x387   : > { %v733_v1 = vcombine.low %v714_v61, %v730_v62  ;;  %v734_v2 = vcombine.high %v714_v61, %v730_v62 }
 0x388   : > { %v815_v14 = vcombine.low %v787_v10, %v794_v11  ;;  %v3009_v16 = vcombine.high %v787_v10, %v794_v11  ;;  %v831_v17 = vcombine.low %v803_v12, %v810_v13  ;;  %v3010_v18 = vcombine.high %v803_v12, %v810_v13 }
 0x389   : > { %v1033_v3 = vpack.c.bf16 %v733_v1, %v733_v1  ;;  %v1034_v4 = vpack.c.bf16 %v734_v2, %v734_v2 }
 0x38a   : > { %v822_v27 = vrot.slane %v815_v14, %v3973_v37  ;;  %v830_v28 = vrot.slane %v3009_v16, %v3973_v37  ;;  %v838_v29 = vrot.slane %v831_v17, %v3973_v37  ;;  %v846_v30 = vrot.slane %v3010_v18, %v3973_v37 }
 0x38c   : > { %v847_v31 = vcombine.low %v822_v27, %v830_v28  ;;  %v863_v32 = vcombine.low %v838_v29, %v846_v30  ;;  %v848_v33 = vcombine.high %v822_v27, %v830_v28  ;;  %v864_v34 = vcombine.high %v838_v29, %v846_v30 }
 0x38e   : > { %v855_v35 = vrot.slane %v847_v31, %v3983_v47  ;;  %v871_v36 = vrot.slane %v863_v32, %v3983_v47  ;;  %v862_v42 = vrot.slane %v848_v33, %v3983_v47  ;;  %v878_v43 = vrot.slane %v864_v34, %v3983_v47 }
 0x390   : > { %v879_v40 = vcombine.low %v855_v35, %v871_v36  ;;  %v880_v41 = vcombine.high %v855_v35, %v871_v36  ;;  %v881_v51 = vcombine.low %v862_v42, %v878_v43  ;;  %v882_v52 = vcombine.high %v862_v42, %v878_v43 }
 0x392   : > { %v1035_v44 = vpack.c.bf16 %v879_v40, %v879_v40  ;;  %v1036_v45 = vpack.c.bf16 %v880_v41, %v880_v41  ;;  %v1037_v57 = vpack.c.bf16 %v881_v51, %v881_v51  ;;  %v1038_v58 = vpack.c.bf16 %v882_v52, %v882_v52 }
 0x394   : > { %v1044_v49 = vsel %vm1039_vm2, %v1035_v44, 0  ;;  %v1090_v50 = vsel %vm1039_vm2, %v1036_v45, 0  ;;  %v1136_v63 = vsel %vm1039_vm2, %v1037_v57, 0  ;;  %v1182_v0 = vsel %vm1039_vm2, %v1038_v58, 0 }
 0x395   : > { %3107 = vmatpush3.bf16.xpose.msra.mxu1 %v1044_v49  ;;  %3113 = vmatpush3.bf16.xpose.msra.mxu0 %v1090_v50 }
 0x396   : > { %3118 = vmatprep.subr.bf16.mxu1 %v3665_v8  ;;  %3124 = vmatprep.subr.bf16.mxu0 %v3665_v8 }
 0x39c   : > { %3109 = vmatmul.mubr.msk.bf16.vlgmr.msra.gmra.mxu1 %vm1039_vm2, %v1031_v59  ;;  %3115 = vmatmul.mubr.msk.bf16.vlgmr.msra.gmra.mxu0 %vm1039_vm2, %v1032_v60 }
 0x39d   : > { %3119 = vmatpush3.bf16.xpose.msra.mxu1 %v1136_v63  ;;  %3125 = vmatpush3.bf16.xpose.msra.mxu0 %v1182_v0 }
 0x39e   : > { %3120 = vmatprep.mubr.msk.bf16.mxu1 %vm3666_vm1, %v3665_v8  ;;  %3126 = vmatprep.mubr.msk.bf16.mxu0 %vm3666_vm1, %v3665_v8 }
 0x39f   : > { %3130 = vmatprep.subr.bf16.mxu1 %v3665_v8  ;;  %3136 = vmatprep.subr.bf16.mxu0 %v3665_v8 }
 0x3a4   : > { %3121 = vmatmul.mubr.msk.bf16.vlgmr.msra.gmra.mxu1 %vm1039_vm2, %v1033_v3  ;;  %3127 = vmatmul.mubr.msk.bf16.vlgmr.msra.gmra.mxu0 %vm1039_vm2, %v1034_v4 }
 0x3a5   : > { %3132 = vmatprep.mubr.msk.bf16.mxu1 %vm3666_vm1, %v3665_v8  ;;  %3138 = vmatprep.mubr.msk.bf16.mxu0 %vm3666_vm1, %v3665_v8 }
 0x45c   : > { %v1080_v5 = vpop.f32.mrf.mxu1  ;;  %v1126_v6 = vpop.f32.mrf.mxu0 }
 0x45d   : > { %v1227_v7 = vsel %vm1039_vm2, %v1126_v6, -inf  ;;  %v1224_v13 = vsel %vm1039_vm2, %v1080_v5, -inf }
 0x45e   : > { %v3110_v9 = vpop.f32.mrf.mxu1  ;;  %1228 = vmax.xlane.f32.xlu1 %v1227_v7  ;;  %v3116_v10 = vpop.f32.mrf.mxu0 }
 0x460   : > { %v1083_v11 = vpop.f32.mrf.mxu1  ;;  %v1129_v12 = vpop.f32.mrf.mxu0 }
 0x462   : > { %v3111_v14 = vpop.f32.mrf.mxu1  ;;  %1225 = vmax.xlane.f32.xlu1 %v1224_v13  ;;  %v3117_v16 = vpop.f32.mrf.mxu0 }
 0x464   : > { %v1172_v17 = vpop.f32.mrf.mxu1  ;;  %v1218_v18 = vpop.f32.mrf.mxu0 }
 0x465   : > { %v1233_v19 = vsel %vm1039_vm2, %v1218_v18, -inf  ;;  %v1230_v30 = vsel %vm1039_vm2, %v1172_v17, -inf }
 0x466   : > { %v3122_v21 = vpop.f32.mrf.mxu1  ;;  %1234 = vmax.xlane.f32.xlu0 %v1233_v19  ;;  %v3128_v22 = vpop.f32.mrf.mxu0 }
 0x468   : > { %v1175_v23 = vpop.f32.mrf.mxu1  ;;  %v1221_v27 = vpop.f32.mrf.mxu0 }
 0x46a   : > { %v3123_v28 = vpop.f32.mrf.mxu1  ;;  %v3129_v29 = vpop.f32.mrf.mxu0 }
 0x473   : > { %885 = vrot.lane.b32.xlu1 %v3957_v24, %s3673_s16 }
 0x47c   : > { %883 = vrot.lane.b32.xlu0 %v3947_v20, %s3673_s16 }
 0x49b   : > { %1231 = vmax.xlane.f32.xlu0 %v1230_v30 }
 0x4b1   : > { %889 = vrot.lane.b32.xlu0 %v3965_v26, %s3673_s16 }
 0x4e7   : > { %v1229_v31 = vpop.xlane.xlu1 %1228 }
 0x4e8   : > { %v1237_v32 = vsub.f32 %v1126_v6, %v1229_v31 }
 0x4ea   : > { %v1242_v33 = vmul.f32 1.442695, %v1237_v32 }
 0x4eb   : > { %v1226_v34 = vpop.xlane.xlu1 %1225 }
 0x4ec   : > { %3360 = vpow2.f32 %v1242_v33  ;;  %v1236_v35 = vsub.f32 %v1080_v5, %v1226_v34 }
 0x4ee   : > { %v1240_v36 = vmul.f32 1.442695, %v1236_v35 }
 0x4ef   : > { %v1235_v26 = vpop.xlane.xlu0 %1234  ;;  %v886_v50 = vpop.permute.xlu1 %885 }
 0x4f0   : > { %3362 = vpow2.f32 %v1240_v36  ;;  %v1239_v40 = vsub.f32 %v1218_v18, %v1235_v26 }
 0x4f2   : > { %v1246_v41 = vmul.f32 1.442695, %v1239_v40 }
 0x4f3   : > { %v884_v42 = vpop.permute.xlu0 %883 }
 0x4f4   : > { %3364 = vpow2.f32 %v1246_v41 }
 0x4f9   : > { %v4043_v38 = vpop.eup %3360 }
 0x4fa   : > { %v1251_v24 = vsel %vm1039_vm2, %v4043_v38, 0.0 }
 0x4fb   : > { %1252 = vadd.xlane.f32.xlu1 %v1251_v24 }
 0x4fd   : > { %v4047_v20 = vpop.eup %3362 }
 0x4fe   : > { %v1248_v39 = vsel %vm1039_vm2, %v4047_v20, 0.0 }
 0x4ff   : > { %1249 = vadd.xlane.f32.xlu0 %v1248_v39 }
 0x501   : > { %v4053_v46 = vpop.eup %3364 }
 0x502   : > { %v1257_v48 = vsel %vm1039_vm2, %v4053_v46, 0.0 }
 0x50c   : > { %887 = vrot.lane.b32.xlu1 %v3961_v25, %s3673_s16 }
 0x524   : > { %v1232_v43 = vpop.xlane.xlu0 %1231 }
 0x525   : > { %v1238_v44 = vsub.f32 %v1172_v17, %v1232_v43 }
 0x527   : > { %v1244_v45 = vmul.f32 1.442695, %v1238_v44 }
 0x528   : > { %v890_v51 = vpop.permute.xlu0 %889 }
 0x529   : > { %3366 = vpow2.f32 %v1244_v45  ;;  %v911_v53 = vcombine.low %v886_v50, %v890_v51  ;;  %v912_v54 = vcombine.high %v886_v50, %v890_v51  ;;  %v3027_v50 = vld [vmem:[#allocation9] ss:$0 sm:$0xff] }
 0x52b   : > { %v919_v59 = vrot.slane %v911_v53, %v3973_v37  ;;  %v926_v60 = vrot.slane %v912_v54, %v3973_v37  ;;  %v1690_v53 = vmul.f32 %v3027_v50, %v3941_v15 }
 0x530   : > { %1258 = vadd.xlane.f32.xlu1 %v1257_v48 }
 0x536   : > { %v4057_v49 = vpop.eup %3366 }
 0x537   : > { %v1254_v25 = vsel %vm1039_vm2, %v4057_v49, 0.0 }
 0x538   : > { %1255 = vadd.xlane.f32.xlu0 %v1254_v25 }
 0x584   : > { %v1253_v52 = vpop.xlane.xlu1 %1252 }
 0x585   : > { %3368 = vrcp.f32 %v1253_v52  ;;  %v3352_v52 = vld [vmem:[%s4346_s8 + $0x8] sm:$0xff]  }
 0x588   : > { %v888_v55 = vpop.permute.xlu1 %887  ;;  %v1250_v56 = vpop.xlane.xlu0 %1249 }
 0x589   : > { %v895_v57 = vcombine.low %v884_v42, %v888_v55  ;;  %v896_v58 = vcombine.high %v884_v42, %v888_v55  ;;  %3370 = vrcp.f32 %v1250_v56  ;;  %v3028_v55 = vld [vmem:[#allocation10] ss:$0 sm:$0xff]  ;;  %v3353_v56 = vld [vmem:[%s4346_s8] sm:$0xff]  }
 0x58b   : > { %v903_v61 = vrot.slane %v895_v57, %v3973_v37  ;;  %v910_v62 = vrot.slane %v896_v58, %v3973_v37 }
 0x58d   : > { %v927_v63 = vcombine.low %v903_v61, %v919_v59  ;;  %v928_v0 = vcombine.high %v903_v61, %v919_v59  ;;  %v943_v1 = vcombine.low %v910_v62, %v926_v60  ;;  %v944_v2 = vcombine.high %v910_v62, %v926_v60 }
 0x58f   : > { %v935_v3 = vrot.slane %v927_v63, %v3983_v47  ;;  %v942_v4 = vrot.slane %v928_v0, %v3983_v47  ;;  %v951_v5 = vrot.slane %v943_v1, %v3983_v47  ;;  %v958_v6 = vrot.slane %v944_v2, %v3983_v47 }
 0x591   : > { %v963_v7 = vcombine.low %v935_v3, %v942_v4  ;;  %v3011_v9 = vcombine.high %v935_v3, %v942_v4  ;;  %v979_v10 = vcombine.low %v951_v5, %v958_v6  ;;  %v3012_v11 = vcombine.high %v951_v5, %v958_v6 }
 0x592   : > { %v3369_v22 = vpop.eup %3368 }
 0x593   : > { %v970_v12 = vrot.slane %v963_v7, %v3973_v37  ;;  %v978_v13 = vrot.slane %v3011_v9, %v3973_v37  ;;  %v986_v14 = vrot.slane %v979_v10, %v3973_v37  ;;  %v994_v16 = vrot.slane %v3012_v11, %v3973_v37 }
 0x594   : > { %v1265_v39 = vmul.f32 %v3369_v22, %v4043_v38 }
 0x595   : > { %v995_v17 = vcombine.low %v970_v12, %v978_v13  ;;  %v1011_v18 = vcombine.low %v986_v14, %v994_v16  ;;  %v996_v19 = vcombine.high %v970_v12, %v978_v13  ;;  %v1012_v21 = vcombine.high %v986_v14, %v994_v16 }
 0x596   : > { %v3371_v29 = vpop.eup %3370  ;;  %v1269_v44 = vpack.c.bf16 %v1265_v39, %v1265_v39 }
 0x597   : > { %v1003_v23 = vrot.slane %v995_v17, %v3983_v47  ;;  %v1019_v27 = vrot.slane %v1011_v18, %v3983_v47  ;;  %v1010_v28 = vrot.slane %v996_v19, %v3983_v47  ;;  %v1026_v30 = vrot.slane %v1012_v21, %v3983_v47 }
 0x598   : > { %v1264_v24 = vmul.f32 %v3371_v29, %v4047_v20 }
 0x599   : > { %v1027_v31 = vcombine.low %v1003_v23, %v1019_v27  ;;  %v1028_v32 = vcombine.high %v1003_v23, %v1019_v27  ;;  %v1029_v33 = vcombine.low %v1010_v28, %v1026_v30  ;;  %v1030_v34 = vcombine.high %v1010_v28, %v1026_v30 }
 0x59a   : > { %v1268_v43 = vpack.c.bf16 %v1264_v24, %v1264_v24 }
 0x59b   : > { %v1272_v35 = vpack.c.bf16 %v1027_v31, %v1027_v31  ;;  %v1273_v36 = vpack.c.bf16 %v1028_v32, %v1028_v32  ;;  %v1274_v41 = vpack.c.bf16 %v1029_v33, %v1029_v33  ;;  %v1275_v42 = vpack.c.bf16 %v1030_v34, %v1030_v34 }
 0x59d   : > { %v1281_v26 = vsel %vm1279_vm3, %v1272_v35, 0  ;;  %v1327_v40 = vsel %vm1279_vm3, %v1273_v36, 0  ;;  %v1373_v38 = vsel %vm1279_vm3, %v1274_v41, 0  ;;  %v1419_v20 = vsel %vm1279_vm3, %v1275_v42, 0 }
 0x59e   : > { %3131 = vmatpush3.bf16.msra.mxu1 %v1281_v26  ;;  %3137 = vmatpush3.bf16.msra.mxu0 %v1327_v40 }
 0x59f   : > { %3142 = vmatprep.subr.bf16.mxu1 %v3665_v8  ;;  %3148 = vmatprep.subr.bf16.mxu0 %v3665_v8 }
 0x5a1   : > { %3133 = vmatmul.mubr.msk.bf16.vlgmr.msra.gmra.mxu1 %vm1039_vm2, %v1268_v43  ;;  %3139 = vmatmul.mubr.msk.bf16.vlgmr.msra.gmra.mxu0 %vm1039_vm2, %v1269_v44 }
 0x5a2   : > { %3143 = vmatpush3.bf16.msra.mxu1 %v1373_v38  ;;  %3149 = vmatpush3.bf16.msra.mxu0 %v1419_v20 }
 0x5a3   : > { %3150 = vmatprep.mubr.msk.bf16.mxu0 %vm3666_vm1, %v3665_v8  ;;  %3162 = vmatprep.subr.bf16.mxu0 %v3665_v8 }
 0x5a4   : > { %3144 = vmatprep.mubr.msk.bf16.mxu1 %vm3666_vm1, %v3665_v8  ;;  %3154 = vmatprep.subr.bf16.mxu1 %v3665_v8 }
 0x5b9   : > { %v1259_v45 = vpop.xlane.xlu1 %1258 }
 0x5ba   : > { %3372 = vrcp.f32 %v1259_v45 }
 0x5c1   : > { %v1256_v48 = vpop.xlane.xlu0 %1255 }
 0x5c2   : > { %3374 = vrcp.f32 %v1256_v48 }
 0x5c7   : > { %v3373_v25 = vpop.eup %3372 }
 0x5c8   : > { %v1267_v51 = vmul.f32 %v3373_v25, %v4053_v46  ;;  %v1697_v46 = vadd.f32 %v3028_v55, %v1690_v53 }
 0x5ca   : > { %v1271_v54 = vpack.c.bf16 %v1267_v51, %v1267_v51  ;;  %v1698_v59 = vpack.c.bf16 %v1697_v46, %v1697_v46  ;;  %v3354_v46 = vld [vmem:[#allocation7 + $0x8] sm:$0xff]  }
 0x5cc   : > { %3151 = vmatmul.mubr.msk.bf16.vlgmr.msra.gmra.mxu0 %vm1039_vm2, %v1271_v54 }
 0x5cd   : > { %3163 = vmatpush3.bf16.msra.mxu0 %v3352_v52  ;;  %3166 = vmatprep.mubr.msk.bf16.mxu0 %vm3666_vm1, %v3665_v8 }
 0x5ce   : > { %3164 = vmatprep.subr.bf16.mxu0 %v3665_v8 }
 0x5cf   : > { %v3375_v57 = vpop.eup %3374 }
 0x5d0   : > { %v1266_v58 = vmul.f32 %v3375_v57, %v4057_v49  ;;  %v3355_v57 = vld [vmem:[#allocation7] sm:$0xff]  }
 0x5d1   : > { %3165 = vmatpush3.bf16.msra.mxu0 %v3353_v56 }
 0x5d2   : > { %v1270_v15 = vpack.c.bf16 %v1266_v58, %v1266_v58  ;;  %3176 = vmatprep.subr.bf16.mxu0 %v3665_v8 }
 0x5d4   : > { %3145 = vmatmul.mubr.msk.bf16.vlgmr.msra.gmra.mxu1 %vm1039_vm2, %v1270_v15  ;;  %3167 = vmatmul.mubr.msk.bf16.vlgmr.msra.gmra.mxu0 %vm500_vm0, %v1698_v59 }
 0x5d5   : > { %3158 = vmatprep.mubr.msk.bf16.mxu1 %vm3666_vm1, %v3665_v8  ;;  %3178 = vmatprep.mubr.msk.bf16.mxu0 %vm3666_vm1, %v3665_v8 }
 0x5d6   : > { %3155 = vmatpush3.bf16.msra.mxu1 %v3354_v46 }
 0x5d7   : > { %3156 = vmatprep.subr.bf16.mxu1 %v3665_v8 }
 0x5da   : > { %3157 = vmatpush3.bf16.msra.mxu1 %v3355_v57 }
 0x5db   : > { %3170 = vmatprep.subr.bf16.mxu1 %v3665_v8 }
 0x661   : > { %v1317_v60 = vpop.f32.mrf.mxu1  ;;  %v1363_v61 = vpop.f32.mrf.mxu0 }
 0x663   : > { %v3134_v62 = vpop.f32.mrf.mxu1  ;;  %v3140_v63 = vpop.f32.mrf.mxu0 }
 0x665   : > { %v1320_v49 = vpop.f32.mrf.mxu1  ;;  %v1366_v0 = vpop.f32.mrf.mxu0 }
 0x667   : > { %v3135_v1 = vpop.f32.mrf.mxu1  ;;  %v3141_v2 = vpop.f32.mrf.mxu0 }
 0x68c   : > { %v1455_v3 = vpop.f32.mrf.mxu0 }
 0x68d   : > { %v1477_v4 = vcombine.low %v1363_v61, %v1455_v3  ;;  %v1478_v5 = vcombine.high %v1363_v61, %v1455_v3 }
 0x68e   : > { %v3152_v6 = vpop.f32.mrf.mxu0 }
 0x68f   : > { %v1485_v17 = vrot.slane %v1477_v4, %v3973_v37  ;;  %v1492_v18 = vrot.slane %v1478_v5, %v3973_v37 }
 0x690   : > { %v1458_v7 = vpop.f32.mrf.mxu0 }
 0x692   : > { %v3153_v9 = vpop.f32.mrf.mxu0 }
 0x694   : > { %v1409_v10 = vpop.f32.mrf.mxu1  ;;  %v4113_v11 = vpop.f32.mrf.mxu0 }
 0x695   : > { %v1461_v12 = vcombine.low %v1317_v60, %v1409_v10  ;;  %v1462_v13 = vcombine.high %v1317_v60, %v1409_v10  ;;  %1762 = vrot.lane.b32.xlu0 %v4113_v11, %s3669_s22  ;;  %1759 = vrot.lane.b32.xlu1 %v4113_v11, %s3668_s29 }
 0x696   : > { %v3146_v14 = vpop.f32.mrf.mxu1  ;;  %v3168_v16 = vpop.f32.mrf.mxu0 }
 0x697   : > { %v1469_v19 = vrot.slane %v1461_v12, %v3973_v37  ;;  %v1476_v21 = vrot.slane %v1462_v13, %v3973_v37 }
 0x698   : > { %v1412_v22 = vpop.f32.mrf.mxu1  ;;  %v1755_v23 = vpop.f32.mrf.mxu0 }
 0x699   : > { %v1493_v27 = vcombine.low %v1469_v19, %v1485_v17  ;;  %v1494_v28 = vcombine.high %v1469_v19, %v1485_v17  ;;  %v1509_v29 = vcombine.low %v1476_v21, %v1492_v18  ;;  %v1510_v30 = vcombine.high %v1476_v21, %v1492_v18  ;;  %1765 = vrot.lane.b32.xlu1 %v4113_v11, %s3667_s24  ;;  %s3001_s24 = sshll.u32 %s4382_s23, 3 }
 0x69a   : > { %v3147_v31 = vpop.f32.mrf.mxu1  ;;  %v3169_v32 = vpop.f32.mrf.mxu0 }
 0x69b   : > { %v1501_v33 = vrot.slane %v1493_v27, %v3983_v47  ;;  %v1508_v34 = vrot.slane %v1494_v28, %v3983_v47  ;;  %v1517_v35 = vrot.slane %v1509_v29, %v3983_v47  ;;  %v1524_v36 = vrot.slane %v1510_v30, %v3983_v47 }
 0x69d   : > { %v1529_v24 = vcombine.low %v1501_v33, %v1508_v34  ;;  %v3021_v39 = vcombine.high %v1501_v33, %v1508_v34  ;;  %v1545_v26 = vcombine.low %v1517_v35, %v1524_v36  ;;  %v3022_v40 = vcombine.high %v1517_v35, %v1524_v36  ;;  %1904 = vrot.lane.b32.xlu1 %v4113_v11, %s3670_s26 }
 0x69f   : > { %v1536_v41 = vrot.slane %v1529_v24, %v3973_v37  ;;  %v1544_v42 = vrot.slane %v3021_v39, %v3973_v37  ;;  %v1552_v43 = vrot.slane %v1545_v26, %v3973_v37  ;;  %v1560_v44 = vrot.slane %v3022_v40, %v3973_v37 }
 0x6a1   : > { %v1561_v38 = vcombine.low %v1536_v41, %v1544_v42  ;;  %v1577_v20 = vcombine.low %v1552_v43, %v1560_v44  ;;  %v1562_v45 = vcombine.high %v1536_v41, %v1544_v42  ;;  %v1578_v48 = vcombine.high %v1552_v43, %v1560_v44 }
 0x6a3   : > { %v1569_v25 = vrot.slane %v1561_v38, %v3983_v47  ;;  %v1585_v50 = vrot.slane %v1577_v20, %v3983_v47  ;;  %v1576_v51 = vrot.slane %v1562_v45, %v3983_v47  ;;  %v1592_v52 = vrot.slane %v1578_v48, %v3983_v47 }
 0x6a5   : > { %v1594_v53 = vcombine.high %v1569_v25, %v1585_v50  ;;  %v1596_v54 = vcombine.high %v1576_v51, %v1592_v52  ;;  %v1595_v55 = vcombine.low %v1576_v51, %v1592_v52  ;;  %v1593_v56 = vcombine.low %v1569_v25, %v1585_v50 }
 0x707   : > { %v4140_v58 = vpop.permute.xlu0 %1762  ;;  %v4142_v15 = vpop.permute.xlu1 %1759 }
 0x708   : > { %1908 = vrot.lane.b32.xlu1 %v4140_v58, %s3670_s26  ;;  %1906 = vrot.lane.b32.xlu0 %v4142_v15, %s3670_s26  ;;  %v1768_v61 = vcombine.low %v4113_v11, %v4140_v58  ;;  %v1769_v63 = vcombine.high %v4113_v11, %v4140_v58 }
 0x70a   : > { %v1776_v1 = vrot.slane %v1768_v61, %v3973_v37  ;;  %v1783_v3 = vrot.slane %v1769_v63, %v3973_v37 }
 0x70b   : > { %v4149_v59 = vpop.permute.xlu1 %1765 }
 0x70c   : > { %1598 = vrot.lane.b32.xlu1 %v1594_v53, %s3674_s14  ;;  %1910 = vrot.lane.b32.xlu0 %v4149_v59, %s3670_s26  ;;  %v1784_v60 = vcombine.low %v4142_v15, %v4149_v59  ;;  %v1785_v62 = vcombine.high %v4142_v15, %v4149_v59  ;;  %s495_s26 = scalar_lea.vmem %s4349_s11, %s3001_s24 }
 0x70e   : > { %v1792_v49 = vrot.slane %v1784_v60, %v3973_v37  ;;  %v1799_v2 = vrot.slane %v1785_v62, %v3973_v37 }
 0x70f   : > { %v1905_v0 = vpop.permute.xlu1 %1904 }
 0x710   : > { %1606 = vrot.lane.b32.xlu1 %v1596_v54, %s3675_s12  ;;  %1602 = vrot.lane.b32.xlu0 %v1595_v55, %s3676_s28  ;;  %v1800_v4 = vcombine.low %v1776_v1, %v1792_v49  ;;  %v1801_v5 = vcombine.high %v1776_v1, %v1792_v49  ;;  %v1816_v9 = vcombine.low %v1783_v3, %v1799_v2 }
 0x711   : > { %v1817_v10 = vcombine.high %v1783_v3, %v1799_v2 }
 0x712   : > { %v1808_v14 = vrot.slane %v1800_v4, %v3983_v47  ;;  %v1815_v16 = vrot.slane %v1801_v5, %v3983_v47  ;;  %v1824_v22 = vrot.slane %v1816_v9, %v3983_v47 }
 0x713   : > { %v1831_v23 = vrot.slane %v1817_v10, %v3983_v47 }
 0x714   : > { %v1836_v31 = vcombine.low %v1808_v14, %v1815_v16  ;;  %v3032_v26 = vcombine.high %v1808_v14, %v1815_v16 }
 0x715   : > { %v1852_v40 = vcombine.low %v1824_v22, %v1831_v23  ;;  %v3033_v41 = vcombine.high %v1824_v22, %v1831_v23 }
 0x716   : > { %v1843_v45 = vrot.slane %v1836_v31, %v3973_v37  ;;  %v1851_v53 = vrot.slane %v3032_v26, %v3973_v37 }
 0x717   : > { %v1859_v54 = vrot.slane %v1852_v40, %v3973_v37  ;;  %v1867_v55 = vrot.slane %v3033_v41, %v3973_v37 }
 0x718   : > { %v1868_v3 = vcombine.low %v1843_v45, %v1851_v53 }
 0x719   : > { %v1884_v4 = vcombine.low %v1859_v54, %v1867_v55 }
 0x71b   : > { %v1892_v14 = vrot.slane %v1884_v4, %v3983_v47 }
 0x77a   : > { %v1907_v6 = vpop.permute.xlu0 %1906  ;;  %v1909_v7 = vpop.permute.xlu1 %1908 }
 0x77b   : > { %v1916_v12 = vcombine.low %v1905_v0, %v1909_v7  ;;  %v1917_v13 = vcombine.high %v1905_v0, %v1909_v7 }
 0x77d   : > { %v1924_v27 = vrot.slane %v1916_v12, %v3973_v37  ;;  %v1931_v28 = vrot.slane %v1917_v13, %v3973_v37  ;;  %v1876_v13 = vrot.slane %v1868_v3, %v3983_v47 }
 0x77e   : > { %v1911_v17 = vpop.permute.xlu0 %1910  ;;  %v1599_v18 = vpop.permute.xlu1 %1598 }
 0x77f   : > { %v1932_v19 = vcombine.low %v1907_v6, %v1911_v17  ;;  %v1933_v21 = vcombine.high %v1907_v6, %v1911_v17  ;;  %v1609_v32 = vsel %vm1039_vm2, %v1593_v56, %v1599_v18  ;;  %v1900_v22 = vcombine.low %v1876_v13, %v1892_v14 }
 0x780   : > { %v1901_v23 = vcombine.high %v1876_v13, %v1892_v14 }
 0x781   : > { %v1940_v29 = vrot.slane %v1932_v19, %v3973_v37  ;;  %v1947_v30 = vrot.slane %v1933_v21, %v3973_v37  ;;  %v1869_v21 = vcombine.high %v1843_v45, %v1851_v53 }
 0x782   : > { %v1603_v24 = vpop.permute.xlu0 %1602  ;;  %v1607_v39 = vpop.permute.xlu1 %1606  ;;  %v2201_v31 = vpack.c.bf16 %v1901_v23, %v1901_v23 }
 0x783   : > { %v1948_v33 = vcombine.low %v1924_v27, %v1940_v29  ;;  %v1949_v34 = vcombine.high %v1924_v27, %v1940_v29  ;;  %v1964_v35 = vcombine.low %v1931_v28, %v1947_v30  ;;  %v1965_v36 = vcombine.high %v1931_v28, %v1947_v30 }
 0x784   : > { %v1611_v42 = vsel %vm1610_vm4, %v1609_v32, %v1603_v24  ;;  %v1885_v27 = vcombine.high %v1859_v54, %v1867_v55  ;;  %v2200_v30 = vpack.c.bf16 %v1900_v22, %v1900_v22  ;;  %v1883_v32 = vrot.slane %v1869_v21, %v3983_v47 }
 0x785   : > { %v1956_v43 = vrot.slane %v1948_v33, %v3983_v47  ;;  %v1963_v44 = vrot.slane %v1949_v34, %v3983_v47  ;;  %v1972_v38 = vrot.slane %v1964_v35, %v3983_v47  ;;  %v1979_v20 = vrot.slane %v1965_v36, %v3983_v47 }
 0x786   : > { %v1613_v48 = vsel %vm1612_vm5, %v1611_v42, %v1607_v39  ;;  %v1899_v33 = vrot.slane %v1885_v27, %v3983_v47 }
 0x787   : > { %v1984_v25 = vcombine.low %v1956_v43, %v1963_v44  ;;  %v3034_v50 = vcombine.high %v1956_v43, %v1963_v44  ;;  %v2000_v51 = vcombine.low %v1972_v38, %v1979_v20  ;;  %v3035_v52 = vcombine.high %v1972_v38, %v1979_v20 }
 0x788   : > { %v1614_v56 = vpack.c.bf16 %v1613_v48, %v1613_v48  ;;  %v1902_v36 = vcombine.low %v1883_v32, %v1899_v33  ;;  %v1903_v24 = vcombine.high %v1883_v32, %v1899_v33 }
 0x789   : > { %v1991_v46 = vrot.slane %v1984_v25, %v3973_v37  ;;  %v1999_v57 = vrot.slane %v3034_v50, %v3973_v37  ;;  %v2007_v60 = vrot.slane %v2000_v51, %v3973_v37  ;;  %v2015_v61 = vrot.slane %v3035_v52, %v3973_v37 }
 0x78a   : > { %3159 = vmatmul.mubr.msk.bf16.vlgmr.msra.gmra.mxu1 %vm500_vm0, %v1614_v56  ;;  %v2202_v39 = vpack.c.bf16 %v1902_v36, %v1902_v36  ;;  %v2203_v26 = vpack.c.bf16 %v1903_v24, %v1903_v24 }
 0x78b   : > { %v2016_v62 = vcombine.low %v1991_v46, %v1999_v57  ;;  %v2032_v63 = vcombine.low %v2007_v60, %v2015_v61  ;;  %3172 = vmatprep.mubr.msk.bf16.mxu1 %vm3666_vm1, %v3665_v8  ;;  %v2017_v49 = vcombine.high %v1991_v46, %v1999_v57  ;;  %v2033_v0 = vcombine.high %v2007_v60, %v2015_v61 }
 0x78d   : > { %v2024_v1 = vrot.slane %v2016_v62, %v3983_v47  ;;  %v2040_v2 = vrot.slane %v2032_v63, %v3983_v47  ;;  %v2031_v7 = vrot.slane %v2017_v49, %v3983_v47  ;;  %v2047_v9 = vrot.slane %v2033_v0, %v3983_v47 }
 0x78f   : > { %v2048_v5 = vcombine.low %v2024_v1, %v2040_v2  ;;  %v2049_v6 = vcombine.high %v2024_v1, %v2040_v2  ;;  %v2050_v18 = vcombine.low %v2031_v7, %v2047_v9  ;;  %v2051_v19 = vcombine.high %v2031_v7, %v2047_v9 }
 0x791   : > { %v2204_v10 = vpack.c.bf16 %v2048_v5, %v2048_v5  ;;  %v2205_v12 = vpack.c.bf16 %v2049_v6, %v2049_v6  ;;  %v2206_v28 = vpack.c.bf16 %v2050_v18, %v2050_v18  ;;  %v2207_v29 = vpack.c.bf16 %v2051_v19, %v2051_v19 }
 0x793   : > { %v2212_v16 = vsel %vm1039_vm2, %v2204_v10, 0  ;;  %v2258_v17 = vsel %vm1039_vm2, %v2205_v12, 0  ;;  %v2304_v34 = vsel %vm1039_vm2, %v2206_v28, 0  ;;  %v2350_v35 = vsel %vm1039_vm2, %v2207_v29, 0 }
 0x794   : > { %3171 = vmatpush3.bf16.xpose.msra.mxu1 %v2212_v16  ;;  %3177 = vmatpush3.bf16.xpose.msra.mxu0 %v2258_v17 }
 0x795   : > { %3182 = vmatprep.subr.bf16.mxu1 %v3665_v8  ;;  %3188 = vmatprep.subr.bf16.mxu0 %v3665_v8 }
 0x79b   : > { %3173 = vmatmul.mubr.msk.bf16.vlgmr.msra.gmra.mxu1 %vm1039_vm2, %v2200_v30  ;;  %3179 = vmatmul.mubr.msk.bf16.vlgmr.msra.gmra.mxu0 %vm1039_vm2, %v2201_v31 }
 0x79c   : > { %3183 = vmatpush3.bf16.xpose.msra.mxu1 %v2304_v34  ;;  %3189 = vmatpush3.bf16.xpose.msra.mxu0 %v2350_v35 }
 0x79d   : > { %3184 = vmatprep.mubr.msk.bf16.mxu1 %vm3666_vm1, %v3665_v8  ;;  %3190 = vmatprep.mubr.msk.bf16.mxu0 %vm3666_vm1, %v3665_v8 }
 0x79e   : > { %3194 = vmatprep.subr.bf16.mxu1 %v3665_v8  ;;  %3200 = vmatprep.subr.bf16.mxu0 %v3665_v8 }
 0x7a3   : > { %3185 = vmatmul.mubr.msk.bf16.vlgmr.msra.gmra.mxu1 %vm1039_vm2, %v2202_v39  ;;  %3191 = vmatmul.mubr.msk.bf16.vlgmr.msra.gmra.mxu0 %vm1039_vm2, %v2203_v26 }
 0x7a4   : > { %3196 = vmatprep.mubr.msk.bf16.mxu1 %vm3666_vm1, %v3665_v8  ;;  %3202 = vmatprep.mubr.msk.bf16.mxu0 %vm3666_vm1, %v3665_v8 }
 0x84a   : > { %v4222_v40 = vpop.f32.mrf.mxu1 }
 0x84c   : > { %v3160_v41 = vpop.f32.mrf.mxu1 }
 0x84e   : > { %v1678_v42 = vpop.f32.mrf.mxu1 }
 0x850   : > { %v3161_v43 = vpop.f32.mrf.mxu1 }
 0x85b   : > { %v2248_v44 = vpop.f32.mrf.mxu1  ;;  %v2294_v38 = vpop.f32.mrf.mxu0 }
 0x85c   : > { %v2392_v20 = vsel %vm1039_vm2, %v2248_v44, -inf  ;;  %v2395_v45 = vsel %vm1039_vm2, %v2294_v38, -inf }
 0x85d   : > { %2393 = vmax.xlane.f32.xlu0 %v2392_v20  ;;  %v3174_v48 = vpop.f32.mrf.mxu1  ;;  %2396 = vmax.xlane.f32.xlu1 %v2395_v45  ;;  %v3180_v25 = vpop.f32.mrf.mxu0 }
 0x85f   : > { %v2251_v50 = vpop.f32.mrf.mxu1  ;;  %v2297_v51 = vpop.f32.mrf.mxu0 }
 0x861   : > { %v3175_v52 = vpop.f32.mrf.mxu1  ;;  %v3181_v53 = vpop.f32.mrf.mxu0 }
 0x863   : > { %v2340_v54 = vpop.f32.mrf.mxu1  ;;  %v2386_v55 = vpop.f32.mrf.mxu0 }
 0x864   : > { %v2398_v56 = vsel %vm1039_vm2, %v2340_v54, -inf  ;;  %v2401_v62 = vsel %vm1039_vm2, %v2386_v55, -inf }
 0x865   : > { %2399 = vmax.xlane.f32.xlu0 %v2398_v56  ;;  %v3186_v46 = vpop.f32.mrf.mxu1  ;;  %v3192_v57 = vpop.f32.mrf.mxu0 }
 0x867   : > { %v2343_v60 = vpop.f32.mrf.mxu1  ;;  %v2389_v61 = vpop.f32.mrf.mxu0 }
 0x869   : > { %v3187_v63 = vpop.f32.mrf.mxu1  ;;  %2402 = vmax.xlane.f32.xlu0 %v2401_v62  ;;  %v3193_v49 = vpop.f32.mrf.mxu0 }
 0x86e   : > { %2052 = vrot.lane.b32.xlu1 %v4113_v11, %s3673_s16 }
 0x8e6   : > { %v2394_v0 = vpop.xlane.xlu0 %2393  ;;  %v2397_v1 = vpop.xlane.xlu1 %2396 }
 0x8e7   : > { %v2404_v2 = vsub.f32 %v2248_v44, %v2394_v0  ;;  %v2405_v3 = vsub.f32 %v2294_v38, %v2397_v1 }
 0x8e9   : > { %v2408_v4 = vmul.f32 1.442695, %v2404_v2  ;;  %v2410_v5 = vmul.f32 1.442695, %v2405_v3 }
 0x8eb   : > { %3376 = vpow2.f32 %v2408_v4 }
 0x8ec   : > { %3378 = vpow2.f32 %v2410_v5 }
 0x8ee   : > { %v2400_v11 = vpop.xlane.xlu0 %2399 }
 0x8ef   : > { %v2406_v12 = vsub.f32 %v2340_v54, %v2400_v11 }
 0x8f1   : > { %v2412_v16 = vmul.f32 1.442695, %v2406_v12 }
 0x8f2   : > { %v2403_v13 = vpop.xlane.xlu0 %2402 }
 0x8f3   : > { %v2407_v14 = vsub.f32 %v2386_v55, %v2403_v13  ;;  %3380 = vpow2.f32 %v2412_v16 }
 0x8f5   : > { %v2414_v17 = vmul.f32 1.442695, %v2407_v14 }
 0x8f7   : > { %3382 = vpow2.f32 %v2414_v17 }
 0x8f8   : > { %v4230_v6 = vpop.eup %3376 }
 0x8f9   : > { %v4232_v7 = vpop.eup %3378  ;;  %v2416_v9 = vsel %vm1039_vm2, %v4230_v6, 0.0 }
 0x8fa   : > { %2417 = vadd.xlane.f32.xlu1 %v2416_v9  ;;  %v2419_v10 = vsel %vm1039_vm2, %v4232_v7, 0.0 }
 0x8fb   : > { %2420 = vadd.xlane.f32.xlu0 %v2419_v10 }
 0x900   : > { %v4244_v18 = vpop.eup %3380 }
 0x904   : > { %v4246_v19 = vpop.eup %3382 }
 0x90b   : > { %2056 = vrot.lane.b32.xlu1 %v4140_v58, %s3673_s16  ;;  %v2422_v58 = vsel %vm1039_vm2, %v4244_v18, 0.0 }
 0x90f   : > { %2058 = vrot.lane.b32.xlu1 %v4149_v59, %s3673_s16  ;;  %v2425_v59 = vsel %vm1039_vm2, %v4246_v19, 0.0 }
 0x911   : > { %2054 = vrot.lane.b32.xlu0 %v4142_v15, %s3673_s16  ;;  %v2053_v15 = vpop.permute.xlu1 %2052 }
 0x930   : > { %2423 = vadd.xlane.f32.xlu0 %v2422_v58 }
 0x933   : > { %2426 = vadd.xlane.f32.xlu1 %v2425_v59 }
 0x983   : > { %v2418_v21 = vpop.xlane.xlu1 %2417 }
 0x984   : > { %v2421_v22 = vpop.xlane.xlu0 %2420  ;;  %3384 = vrcp.f32 %v2418_v21 }
 0x985   : > { %3386 = vrcp.f32 %v2421_v22 }
 0x987   : > { %v2057_v23 = vpop.permute.xlu1 %2056 }
 0x988   : > { %v2064_v27 = vcombine.low %v2053_v15, %v2057_v23  ;;  %v2065_v28 = vcombine.high %v2053_v15, %v2057_v23  ;;  %v2055_v29 = vpop.permute.xlu0 %2054 }
 0x98a   : > { %v2072_v33 = vrot.slane %v2064_v27, %v3973_v37  ;;  %v2079_v34 = vrot.slane %v2065_v28, %v3973_v37 }
 0x98b   : > { %v2059_v30 = vpop.permute.xlu1 %2058 }
 0x98c   : > { %v2080_v31 = vcombine.low %v2055_v29, %v2059_v30  ;;  %v2081_v32 = vcombine.high %v2055_v29, %v2059_v30 }
 0x98e   : > { %v2088_v35 = vrot.slane %v2080_v31, %v3973_v37  ;;  %v2095_v36 = vrot.slane %v2081_v32, %v3973_v37 }
 0x990   : > { %v2096_v24 = vcombine.low %v2072_v33, %v2088_v35  ;;  %v2097_v39 = vcombine.high %v2072_v33, %v2088_v35  ;;  %v2112_v26 = vcombine.low %v2079_v34, %v2095_v36  ;;  %v2113_v41 = vcombine.high %v2079_v34, %v2095_v36 }
 0x991   : > { %v3385_v57 = vpop.eup %3384 }
 0x992   : > { %v2104_v42 = vrot.slane %v2096_v24, %v3983_v47  ;;  %v2111_v43 = vrot.slane %v2097_v39, %v3983_v47  ;;  %v2120_v44 = vrot.slane %v2112_v26, %v3983_v47  ;;  %v2127_v38 = vrot.slane %v2113_v41, %v3983_v47  ;;  %v3387_v60 = vpop.eup %3386 }
 0x993   : > { %v2432_v9 = vmul.f32 %v3385_v57, %v4230_v6  ;;  %v2433_v10 = vmul.f32 %v3387_v60, %v4232_v7 }
 0x994   : > { %v2132_v20 = vcombine.low %v2104_v42, %v2111_v43  ;;  %v3036_v45 = vcombine.high %v2104_v42, %v2111_v43  ;;  %v2148_v48 = vcombine.low %v2120_v44, %v2127_v38  ;;  %v3037_v25 = vcombine.high %v2120_v44, %v2127_v38 }
 0x995   : > { %v2436_v16 = vpack.c.bf16 %v2432_v9, %v2432_v9  ;;  %v2437_v17 = vpack.c.bf16 %v2433_v10, %v2433_v10 }
 0x996   : > { %v2139_v50 = vrot.slane %v2132_v20, %v3973_v37  ;;  %v2147_v51 = vrot.slane %v3036_v45, %v3973_v37  ;;  %v2155_v52 = vrot.slane %v2148_v48, %v3973_v37  ;;  %v2163_v53 = vrot.slane %v3037_v25, %v3973_v37 }
 0x998   : > { %v2164_v54 = vcombine.low %v2139_v50, %v2147_v51  ;;  %v2180_v55 = vcombine.low %v2155_v52, %v2163_v53  ;;  %v2165_v56 = vcombine.high %v2139_v50, %v2147_v51  ;;  %v2181_v46 = vcombine.high %v2155_v52, %v2163_v53 }
 0x99a   : > { %v2172_v61 = vrot.slane %v2164_v54, %v3983_v47  ;;  %v2188_v62 = vrot.slane %v2180_v55, %v3983_v47  ;;  %v2179_v63 = vrot.slane %v2165_v56, %v3983_v47  ;;  %v2195_v49 = vrot.slane %v2181_v46, %v3983_v47  ;;  %v3356_v56 = vld [vmem:[#allocation12 + $0x8] sm:$0xff]  }
 0x99c   : > { %v2196_v0 = vcombine.low %v2172_v61, %v2188_v62  ;;  %v2197_v1 = vcombine.high %v2172_v61, %v2188_v62  ;;  %v2198_v2 = vcombine.low %v2179_v63, %v2195_v49  ;;  %v2199_v3 = vcombine.high %v2179_v63, %v2195_v49 }
 0x99e   : > { %v2440_v4 = vpack.c.bf16 %v2196_v0, %v2196_v0  ;;  %v2441_v5 = vpack.c.bf16 %v2197_v1, %v2197_v1  ;;  %v2442_v13 = vpack.c.bf16 %v2198_v2, %v2198_v2  ;;  %v2443_v14 = vpack.c.bf16 %v2199_v3, %v2199_v3 }
 0x9a0   : > { %v2448_v11 = vsel %vm1279_vm3, %v2440_v4, 0  ;;  %v2494_v12 = vsel %vm1279_vm3, %v2441_v5, 0  ;;  %v2540_v6 = vsel %vm1279_vm3, %v2442_v13, 0  ;;  %v2586_v7 = vsel %vm1279_vm3, %v2443_v14, 0  ;;  %v3357_v5 = vld [vmem:[#allocation12] sm:$0xff]  }
 0x9a1   : > { %3195 = vmatpush3.bf16.msra.mxu1 %v2448_v11  ;;  %3201 = vmatpush3.bf16.msra.mxu0 %v2494_v12 }
 0x9a2   : > { %3206 = vmatprep.subr.bf16.mxu1 %v3665_v8  ;;  %3212 = vmatprep.subr.bf16.mxu0 %v3665_v8 }
 0x9a4   : > { %3197 = vmatmul.mubr.msk.bf16.vlgmr.msra.gmra.mxu1 %vm1039_vm2, %v2436_v16  ;;  %3203 = vmatmul.mubr.msk.bf16.vlgmr.msra.gmra.mxu0 %vm1039_vm2, %v2437_v17 }
 0x9a5   : > { %3207 = vmatpush3.bf16.msra.mxu1 %v2540_v6  ;;  %3213 = vmatpush3.bf16.msra.mxu0 %v2586_v7 }
 0x9a6   : > { %3208 = vmatprep.mubr.msk.bf16.mxu1 %vm3666_vm1, %v3665_v8  ;;  %3214 = vmatprep.mubr.msk.bf16.mxu0 %vm3666_vm1, %v3665_v8 }
 0x9a7   : > { %3218 = vmatprep.subr.bf16.mxu1 %v3665_v8 }
 0x9b9   : > { %v2424_v58 = vpop.xlane.xlu0 %2423 }
 0x9ba   : > { %3388 = vrcp.f32 %v2424_v58 }
 0x9bc   : > { %v2427_v59 = vpop.xlane.xlu1 %2426 }
 0x9bd   : > { %3390 = vrcp.f32 %v2427_v59 }
 0x9c7   : > { %v3389_v15 = vpop.eup %3388 }
 0x9c8   : > { %v2434_v21 = vmul.f32 %v3389_v15, %v4244_v18 }
 0x9ca   : > { %v3391_v22 = vpop.eup %3390  ;;  %v2438_v23 = vpack.c.bf16 %v2434_v21, %v2434_v21 }
 0x9cb   : > { %v2435_v27 = vmul.f32 %v3391_v22, %v4246_v19 }
 0x9cc   : > { %3209 = vmatmul.mubr.msk.bf16.vlgmr.msra.gmra.mxu1 %vm1039_vm2, %v2438_v23 }
 0x9cd   : > { %v2439_v28 = vpack.c.bf16 %v2435_v27, %v2435_v27  ;;  %3222 = vmatprep.mubr.msk.bf16.mxu1 %vm3666_vm1, %v3665_v8  ;;  %3219 = vmatpush3.bf16.msra.mxu1 %v3356_v56  ;;  %v3023_v27 = vld [vmem:[%s4343_s5] ss:$0 sm:$0xff] }
 0x9ce   : > { %3220 = vmatprep.subr.bf16.mxu1 %v3665_v8 }
 0x9cf   : > { %3215 = vmatmul.mubr.msk.bf16.vlgmr.msra.gmra.mxu0 %vm1039_vm2, %v2439_v28  ;;  %v1676_v28 = vadd.f32 %v3023_v27, %v4222_v40 }
 0x9d1   : > { %3221 = vmatpush3.bf16.msra.mxu1 %v3357_v5 }
 0xa64   : > { %v2484_v29 = vpop.f32.mrf.mxu1  ;;  %v2530_v30 = vpop.f32.mrf.mxu0 }
 0xa66   : > { %v3198_v31 = vpop.f32.mrf.mxu1  ;;  %v3204_v32 = vpop.f32.mrf.mxu0 }
 0xa67   : > { %v3392_v31 = vld [vmem:[%s426_s21] sm:$0xff] }
 0xa68   : > { %v2487_v33 = vpop.f32.mrf.mxu1  ;;  %v2533_v34 = vpop.f32.mrf.mxu0  ;;  %v1681_v32 = vadd.f32 %v3392_v31, %v1676_v28 }
 0xa6a   : > { %v3199_v35 = vpop.f32.mrf.mxu1  ;;  %v3205_v18 = vpop.f32.mrf.mxu0 }
 0xa8c   : > { %v2576_v36 = vpop.f32.mrf.mxu1 }
 0xa8d   : > { %v2628_v24 = vcombine.low %v2484_v29, %v2576_v36  ;;  %v2629_v39 = vcombine.high %v2484_v29, %v2576_v36  ;;  %v3048_v29 = vld [vmem:[#allocation13] ss:$0 sm:$0xff] }
 0xa8e   : > { %v3210_v19 = vpop.f32.mrf.mxu1 }
 0xa8f   : > { %v2622_v26 = vpop.f32.mrf.mxu0  ;;  %v2636_v38 = vrot.slane %v2628_v24, %v3973_v37  ;;  %v2643_v20 = vrot.slane %v2629_v39, %v3973_v37 }
 0xa90   : > { %v2579_v41 = vpop.f32.mrf.mxu1  ;;  %v2644_v42 = vcombine.low %v2530_v30, %v2622_v26  ;;  %v2645_v43 = vcombine.high %v2530_v30, %v2622_v26 }
 0xa91   : > { %v3216_v44 = vpop.f32.mrf.mxu0 }
 0xa92   : > { %v2652_v45 = vrot.slane %v2644_v42, %v3973_v37  ;;  %v2659_v48 = vrot.slane %v2645_v43, %v3973_v37  ;;  %v3211_v25 = vpop.f32.mrf.mxu1 }
 0xa93   : > { %v2625_v50 = vpop.f32.mrf.mxu0 }
 0xa94   : > { %v2660_v51 = vcombine.low %v2636_v38, %v2652_v45  ;;  %v2661_v52 = vcombine.high %v2636_v38, %v2652_v45  ;;  %v2676_v53 = vcombine.low %v2643_v20, %v2659_v48  ;;  %v2677_v54 = vcombine.high %v2643_v20, %v2659_v48 }
 0xa95   : > { %v3217_v55 = vpop.f32.mrf.mxu0 }
 0xa96   : > { %v2668_v46 = vrot.slane %v2660_v51, %v3983_v47  ;;  %v2675_v57 = vrot.slane %v2661_v52, %v3983_v47  ;;  %v2684_v60 = vrot.slane %v2676_v53, %v3983_v47  ;;  %v2691_v61 = vrot.slane %v2677_v54, %v3983_v47 }
 0xa98   : > { %v2696_v62 = vcombine.low %v2668_v46, %v2675_v57  ;;  %v3046_v63 = vcombine.high %v2668_v46, %v2675_v57  ;;  %v2712_v49 = vcombine.low %v2684_v60, %v2691_v61  ;;  %v3047_v0 = vcombine.high %v2684_v60, %v2691_v61 }
 0xa9a   : > { %v2703_v1 = vrot.slane %v2696_v62, %v3973_v37  ;;  %v2711_v2 = vrot.slane %v3046_v63, %v3973_v37  ;;  %v2719_v3 = vrot.slane %v2712_v49, %v3973_v37  ;;  %v2727_v4 = vrot.slane %v3047_v0, %v3973_v37 }
 0xa9c   : > { %v2729_v9 = vcombine.high %v2703_v1, %v2711_v2  ;;  %v2745_v10 = vcombine.high %v2719_v3, %v2727_v4  ;;  %v2728_v11 = vcombine.low %v2703_v1, %v2711_v2  ;;  %v2744_v12 = vcombine.low %v2719_v3, %v2727_v4 }
 0xa9e   : > { %v2743_v13 = vrot.slane %v2729_v9, %v3983_v47  ;;  %v2759_v14 = vrot.slane %v2745_v10, %v3983_v47  ;;  %v2736_v8 = vrot.slane %v2728_v11, %v3983_v47  ;;  %v2752_v16 = vrot.slane %v2744_v12, %v3983_v47 }
 0xaa0   : > { %v2762_v17 = vcombine.low %v2743_v13, %v2759_v14  ;;  %v2761_v6 = vcombine.high %v2736_v8, %v2752_v16  ;;  %v2760_v7 = vcombine.low %v2736_v8, %v2752_v16  ;;  %v2763_v37 = vcombine.high %v2743_v13, %v2759_v14 }
 0xaa2   : > { %2769 = vrot.lane.b32.xlu1 %v2762_v17, %s3676_s28  ;;  %2765 = vrot.lane.b32.xlu0 %v2761_v6, %s3674_s14 }
 0xaa6   : > { %2773 = vrot.lane.b32.xlu0 %v2763_v37, %s3675_s12 }
 0xb14   : > { %v2766_v58 = vpop.permute.xlu0 %2765  ;;  %v2770_v59 = vpop.permute.xlu1 %2769 }
 0xb15   : > { %v2776_v15 = vsel %vm1039_vm2, %v2760_v7, %v2766_v58 }
 0xb16   : > { %v2777_v47 = vsel %vm1610_vm4, %v2776_v15, %v2770_v59 }
 0xb18   : > { %v2774_v21 = vpop.permute.xlu0 %2773 }
 0xb19   : > { %v2778_v22 = vsel %vm1612_vm5, %v2777_v47, %v2774_v21 }
 0xb1a   : > { %v2779_v23 = vpack.c.bf16 %v2778_v22, %v2778_v22 }
 0xb1c   : > { %3223 = vmatmul.mubr.msk.bf16.vlgmr.msra.gmra.mxu1 %vm500_vm0, %v2779_v23 }
 0xbdc   : > { %v2840_v30 = vpop.f32.mrf.mxu1 }
 0xbdd   : > { %v2841_v33 = vadd.f32 %v3048_v29, %v2840_v30 }
 0xbde   : > { %v3224_v34 = vpop.f32.mrf.mxu1 }
 0xbdf   : > { %v2846_v35 = vadd.f32 %v2841_v33, %v1681_v32 }
 0xbe0   : > { %v2843_v18 = vpop.f32.mrf.mxu1 }
 0xbe1   : > { %2847 = vst.msk [vmem:[%s495_s26] sm:$0xff] %vm500_vm0, %v2846_v35 }
 0xbe2   : > { %v3225_v36 = vpop.f32.mrf.mxu1 }
 0xbe3 PF: > { %p25_p11 = scmp.ge.s32.totalorder %s3855_s30, 4   ;;  %s4377_s17 = smov %s3645_s18 }
 0xbe4   : > { %s4378_s18 = smov %s3649_s19  ;;  %s4379_s19 = smov %s3866_s25 }
 0xbe5   : > { %s4380_s20 = smov %s3855_s30  ;;  %27 = sbr.rel (!%p25_p11) target bundleno = 10 (0xa), region = 132 }
 0xbea   :  { %2867 = vsyncpa [#allocation3], 1 }
 0xbeb   :  { %2869 = vsyncpa [#allocation3 + $0x1], 1 }
 0xbec   :  { %2870 = vsyncpa [#allocation5], 1 }
 0xbed   :  { %2871 = vsyncpa [#allocation8], 1 }
 0xbee   :  { %2872 = vsyncpa [#allocation11], 1 }
 0xbef   :  { %2873 = vsyncpa [#allocation14], 1 }

</bundles_post_ra>
